<compile_context>
chip_gen: v7x
topology: tpu7x:2x2x1
jax: 0.10.0
libtpu: 0.0.40
codegen_flags: <defaults>
</compile_context>

<pallas_src>
import functools

import jax
import jax.numpy as jnp
from jax.experimental import pallas as pl
from jax.experimental.pallas import tpu as pltpu


_VMEM_LIMIT = 32 * 1024 * 1024  # explicit scoped-VMEM limit, safe on v5e/v6e/v7x


# ---------------------------------------------------------------------------
# Kernels
# ---------------------------------------------------------------------------
def _matmul_bias_relu_kernel(x_ref, w_ref, b_ref, o_ref):
    """out = relu(x @ w + b).  bf16 operands on the MXU, f32 accumulate."""
    acc = jnp.dot(x_ref[...], w_ref[...], preferred_element_type=jnp.float32)
    acc = jnp.maximum(acc + b_ref[...], 0.0)
    o_ref[...] = acc.astype(o_ref.dtype)


def _maxpool_2x2_kernel(x_ref, o_ref):
    """x_ref: (bt, 2, 2, Hp, Wp, C) = pooling windows on leading axes.

    Single input ref; the 4 window taps are cheap major-dim selects of the
    already-resident VMEM block (no pre-sliced HBM copies).
    """
    x = x_ref[...]
    o_ref[...] = jnp.maximum(jnp.maximum(x[:, 0, 0], x[:, 0, 1]),
                             jnp.maximum(x[:, 1, 0], x[:, 1, 1]))


def _fc_fused_kernel(x_ref, w1_ref, b1_ref, w2_ref, b2_ref, o_ref, acc_ref):
    """fc1 (K-tiled, f32 VMEM accumulator) + ReLU + fc2 + log_softmax, fused."""
    k = pl.program_id(1)

    @pl.when(k == 0)
    def _init():
        acc_ref[...] = jnp.zeros_like(acc_ref)

    acc_ref[...] += jnp.dot(x_ref[...], w1_ref[...],
                            preferred_element_type=jnp.float32)

    @pl.when(k == pl.num_programs(1) - 1)
    def _finalize():
        h = jnp.maximum(acc_ref[...] + b1_ref[...], 0.0)          # fc1 + ReLU (f32)
        logits = jnp.dot(h.astype(jnp.bfloat16), w2_ref[...],
                         preferred_element_type=jnp.float32) + b2_ref[...]
        m = jnp.max(logits, axis=-1, keepdims=True)               # stable log-softmax
        s = logits - m
        lse = jnp.log(jnp.sum(jnp.exp(s), axis=-1, keepdims=True))
        o_ref[...] = (s - lse).astype(o_ref.dtype)


# ---------------------------------------------------------------------------
# pallas_call wrappers
# ---------------------------------------------------------------------------
def matmul_bias_relu(x, w, b, *, out_dtype, tm=256):
    """Row-tiled (parallel) matmul + bias + ReLU.  K/N kept as single blocks
    (K<=288, N<=64 here); tm capped so the working set stays tiny on v7x."""
    M, K = x.shape
    N = w.shape[1]
    tm = min(tm, M)
    return pl.pallas_call(
        _matmul_bias_relu_kernel,
        out_shape=jax.ShapeDtypeStruct((M, N), out_dtype),
        grid=(pl.cdiv(M, tm),),
        in_specs=[pl.BlockSpec((tm, K), lambda i: (i, 0)),
                  pl.BlockSpec((K, N), lambda i: (0, 0)),
                  pl.BlockSpec((1, N), lambda i: (0, 0))],
        out_specs=pl.BlockSpec((tm, N), lambda i: (i, 0)),
        compiler_params=pltpu.CompilerParams(
            dimension_semantics=("parallel",),
            vmem_limit_bytes=_VMEM_LIMIT),
    )(x, w, b)


def maxpool_2x2(x6):
    """x6: (B, 2, 2, Hp, Wp, C) -> (B, Hp, Wp, C), tiled over batch."""
    B, _, _, Hp, Wp, C = x6.shape
    bt = min(8, B)
    return pl.pallas_call(
        _maxpool_2x2_kernel,
        out_shape=jax.ShapeDtypeStruct((B, Hp, Wp, C), x6.dtype),
        grid=(pl.cdiv(B, bt),),
        in_specs=[pl.BlockSpec((bt, 2, 2, Hp, Wp, C),
                               lambda i: (i, 0, 0, 0, 0, 0))],
        out_specs=pl.BlockSpec((bt, Hp, Wp, C), lambda i: (i, 0, 0, 0)),
        compiler_params=pltpu.CompilerParams(
            dimension_semantics=("parallel",),
            vmem_limit_bytes=_VMEM_LIMIT),
    )(x6)


def fc_fused(x, w1, b1, w2, b2, *, tm=256, tk=1152):
    """log_softmax(relu(x @ w1 + b1) @ w2 + b2), K-tiled over fc1's 9216."""
    M, K = x.shape
    H = w1.shape[1]       # 128
    N = w2.shape[1]       # 10
    assert K % tk == 0, "fc1 contraction tile must divide K"
    tm = min(tm, M)
    return pl.pallas_call(
        _fc_fused_kernel,
        out_shape=jax.ShapeDtypeStruct((M, N), jnp.float32),
        grid=(pl.cdiv(M, tm), K // tk),
        in_specs=[pl.BlockSpec((tm, tk), lambda i, k: (i, k)),
                  pl.BlockSpec((tk, H), lambda i, k: (k, 0)),
                  pl.BlockSpec((1, H), lambda i, k: (0, 0)),
                  pl.BlockSpec((H, N), lambda i, k: (0, 0)),
                  pl.BlockSpec((1, N), lambda i, k: (0, 0))],
        out_specs=pl.BlockSpec((tm, N), lambda i, k: (i, 0)),
        scratch_shapes=[pltpu.VMEM((tm, H), jnp.float32)],
        compiler_params=pltpu.CompilerParams(
            dimension_semantics=("parallel", "arbitrary"),
            vmem_limit_bytes=_VMEM_LIMIT),
    )(x, w1, b1, w2, b2)


# ---------------------------------------------------------------------------
# im2col lowering of the 3x3 / stride-1 / valid convolutions
# ---------------------------------------------------------------------------
def _im2col_3x3(x_nhwc):
    B, H, W, C = x_nhwc.shape
    Ho, Wo = H - 2, W - 2
    cols = [x_nhwc[:, i:i + Ho, j:j + Wo, :] for i in range(3) for j in range(3)]
    p = jnp.stack(cols, axis=3)                      # (B, Ho, Wo, 9, C)
    return p.reshape(B * Ho * Wo, 9 * C), (B, Ho, Wo)


def conv3x3_relu(x_nhwc, w2d, b, cout):
    patches, (B, Ho, Wo) = _im2col_3x3(x_nhwc)       # (B*Ho*Wo, 9*Cin) bf16
    y = matmul_bias_relu(patches, w2d, b, out_dtype=jnp.bfloat16)
    return y.reshape(B, Ho, Wo, cout)


# ---------------------------------------------------------------------------
# Parameters (torch-shaped init, one-time prep into kernel layouts / bf16)
# ---------------------------------------------------------------------------
def init_params(key):
    ks = jax.random.split(key, 8)
    s = 0.05
    return {
        "conv1_w": jax.random.normal(ks[0], (32, 1, 3, 3), jnp.float32) * s,
        "conv1_b": jax.random.normal(ks[1], (32,), jnp.float32) * s,
        "conv2_w": jax.random.normal(ks[2], (64, 32, 3, 3), jnp.float32) * s,
        "conv2_b": jax.random.normal(ks[3], (64,), jnp.float32) * s,
        "fc1_w": jax.random.normal(ks[4], (128, 9216), jnp.float32) * s,
        "fc1_b": jax.random.normal(ks[5], (128,), jnp.float32) * s,
        "fc2_w": jax.random.normal(ks[6], (10, 128), jnp.float32) * s,
        "fc2_b": jax.random.normal(ks[7], (10,), jnp.float32) * s,
    }


def prepare_params(p):
    """One-time layout prep: (K,N) bf16 weights, (1,N) f32 biases."""
    def conv_w(w):   # torch (Co,Ci,3,3) -> (9*Ci, Co); column order (ki,kj,ci)
        Co, Ci = w.shape[0], w.shape[1]
        return jnp.transpose(w, (2, 3, 1, 0)).reshape(9 * Ci, Co).astype(jnp.bfloat16)

    # fc1 columns are permuted from torch's (C,H,W) flatten order to our NHWC
    # (H,W,C) flatten order, so the forward needs no per-call activation
    # transpose yet matches torch.flatten(x, 1) exactly.
    w_fc1 = (p["fc1_w"].reshape(128, 64, 12, 12)
             .transpose(2, 3, 1, 0).reshape(9216, 128).astype(jnp.bfloat16))
    return {
        "conv1_w": conv_w(p["conv1_w"]),
        "conv1_b": p["conv1_b"].reshape(1, 32).astype(jnp.float32),
        "conv2_w": conv_w(p["conv2_w"]),
        "conv2_b": p["conv2_b"].reshape(1, 64).astype(jnp.float32),
        "fc1_w": w_fc1,
        "fc1_b": p["fc1_b"].reshape(1, 128).astype(jnp.float32),
        "fc2_w": p["fc2_w"].T.astype(jnp.bfloat16),            # (128, 10)
        "fc2_b": p["fc2_b"].reshape(1, 10).astype(jnp.float32),
    }


# ---------------------------------------------------------------------------
# Forward pass (inference semantics of CNN.forward; dropout = identity)
# ---------------------------------------------------------------------------
def cnn_forward(p, x_nchw):
    x = jnp.transpose(x_nchw, (0, 2, 3, 1)).astype(jnp.bfloat16)     # NHWC bf16
    B = x.shape[0]
    x = conv3x3_relu(x, p["conv1_w"], p["conv1_b"], 32)              # (B,26,26,32)
    x = conv3x3_relu(x, p["conv2_w"], p["conv2_b"], 64)              # (B,24,24,64)
    # 2x2 max pool: expose the (dh, dw) pooling taps as leading axes of a single
    # array (cheap jitted reshape+transpose) and reduce them inside one kernel.
    x = x.reshape(B, 12, 2, 12, 2, 64).transpose(0, 2, 4, 1, 3, 5)   # (B,2,2,12,12,64)
    x = maxpool_2x2(x)                                               # (B,12,12,64)
    # dropout1 / dropout2: identity (eval mode).
    feats = x.reshape(B, 12 * 12 * 64)     # NHWC flatten; fc1_w pre-permuted to match
    return fc_fused(feats, p["fc1_w"], p["fc1_b"], p["fc2_w"], p["fc2_b"])  # (B,10) f32


if __name__ == "__main__":
    key = jax.random.PRNGKey(0)
    pkey, xkey = jax.random.split(key)
    params = prepare_params(init_params(pkey))
    # MNIST-shaped input: fc1 in_features=9216 implies 1x28x28; small batch=2.
    x = jax.random.normal(xkey, (2, 1, 28, 28), jnp.float32)
    fwd = jax.jit(cnn_forward)
    out = jax.block_until_ready(fwd(params, x))
    assert out.shape == (2, 10) and out.dtype == jnp.float32
    assert bool(jnp.all(jnp.isfinite(out)))
    print("KERNEL_OK")
</pallas_src>

<mosaic_0001>
module attributes {stable_mosaic.version = 11 : i64} {
  func.func @_matmul_bias_relu_kernel(%arg0: i32, %arg1: memref<256x9xbf16, #tpu.memory_space<vmem>>, %arg2: memref<9x32xbf16, #tpu.memory_space<vmem>>, %arg3: memref<1x32xf32, #tpu.memory_space<vmem>>, %arg4: memref<256x32xbf16, #tpu.memory_space<vmem>>) attributes {dimension_semantics = [#tpu.dimension_semantics<parallel>], iteration_bounds = array<i64: 6>, scalar_prefetch = 0 : i64, scratch_operands = 0 : i64, tpu.core_type = #tpu.core_type<tc>, window_params = [{transform_indices = @transform_0, window_bounds = array<i64: 256, 9>}, {pipeline_mode = #tpu.pipeline_mode<synchronous>, transform_indices = @transform_1, window_bounds = array<i64: 9, 32>}, {pipeline_mode = #tpu.pipeline_mode<synchronous>, transform_indices = @transform_2, window_bounds = array<i64: 1, 32>}, {transform_indices = @transform_3, window_bounds = array<i64: 256, 32>}]} {
    %c0 = arith.constant 0 : index
    %c0_0 = arith.constant 0 : index
    %0 = vector.load %arg1[%c0, %c0_0] : memref<256x9xbf16, #tpu.memory_space<vmem>>, vector<256x9xbf16>
    %c0_1 = arith.constant 0 : index
    %c0_2 = arith.constant 0 : index
    %1 = vector.load %arg2[%c0_1, %c0_2] : memref<9x32xbf16, #tpu.memory_space<vmem>>, vector<9x32xbf16>
    %cst = arith.constant dense<0.000000e+00> : vector<256x32xf32>
    %2 = tpu.matmul %0, %1, %cst {dimension_numbers = #tpu.dot_dimension_numbers<[1], [0], [0], [1], [0, 0, 1, 1], [], []>} : vector<256x9xbf16>, vector<9x32xbf16>, vector<256x32xf32> -> vector<256x32xf32>
    %c0_3 = arith.constant 0 : index
    %c0_4 = arith.constant 0 : index
    %3 = vector.load %arg3[%c0_3, %c0_4] : memref<1x32xf32, #tpu.memory_space<vmem>>, vector<1x32xf32>
    %4 = vector.broadcast %3 : vector<1x32xf32> to vector<256x32xf32>
    %5 = arith.addf %2, %4 : vector<256x32xf32>
    %cst_5 = arith.constant 0.000000e+00 : f32
    %6 = vector.broadcast %cst_5 : f32 to vector<256x32xf32>
    %7 = arith.maximumf %5, %6 : vector<256x32xf32>
    %8 = arith.truncf %7 : vector<256x32xf32> to vector<256x32xbf16>
    %c0_6 = arith.constant 0 : index
    %c0_7 = arith.constant 0 : index
    %9 = vector.load %arg4[%c0_6, %c0_7] : memref<256x32xbf16, #tpu.memory_space<vmem>>, vector<256x32xbf16>
    tpu.vector_store %arg4[%c0_6, %c0_7], %8 {strides = array<i32>} : memref<256x32xbf16, #tpu.memory_space<vmem>>, vector<256x32xbf16>,
    return
  }
  func.func @transform_0(%arg0: i32) -> (i32, i32) {
    %c0_i32 = arith.constant 0 : i32
    %c0_i32_0 = arith.constant 0 : i32
    return %arg0, %c0_i32 : i32, i32
  }
  func.func @transform_1(%arg0: i32) -> (i32, i32) {
    %c0_i32 = arith.constant 0 : i32
    %c0_i32_0 = arith.constant 0 : i32
    %c0_i32_1 = arith.constant 0 : i32
    return %c0_i32, %c0_i32_0 : i32, i32
  }
  func.func @transform_2(%arg0: i32) -> (i32, i32) {
    %c0_i32 = arith.constant 0 : i32
    %c0_i32_0 = arith.constant 0 : i32
    %c0_i32_1 = arith.constant 0 : i32
    return %c0_i32, %c0_i32_0 : i32, i32
  }
  func.func @transform_3(%arg0: i32) -> (i32, i32) {
    %c0_i32 = arith.constant 0 : i32
    %c0_i32_0 = arith.constant 0 : i32
    return %arg0, %c0_i32 : i32, i32
  }
}

module attributes {stable_mosaic.version = 11 : i64} {
  func.func @_matmul_bias_relu_kernel(%arg0: i32, %arg1: memref<256x288xbf16, #tpu.memory_space<vmem>>, %arg2: memref<288x64xbf16, #tpu.memory_space<vmem>>, %arg3: memref<1x64xf32, #tpu.memory_space<vmem>>, %arg4: memref<256x64xbf16, #tpu.memory_space<vmem>>) attributes {dimension_semantics = [#tpu.dimension_semantics<parallel>], iteration_bounds = array<i64: 5>, scalar_prefetch = 0 : i64, scratch_operands = 0 : i64, tpu.core_type = #tpu.core_type<tc>, window_params = [{transform_indices = @transform_0, window_bounds = array<i64: 256, 288>}, {pipeline_mode = #tpu.pipeline_mode<synchronous>, transform_indices = @transform_1, window_bounds = array<i64: 288, 64>}, {pipeline_mode = #tpu.pipeline_mode<synchronous>, transform_indices = @transform_2, window_bounds = array<i64: 1, 64>}, {transform_indices = @transform_3, window_bounds = array<i64: 256, 64>}]} {
    %c0 = arith.constant 0 : index
    %c0_0 = arith.constant 0 : index
    %0 = vector.load %arg1[%c0, %c0_0] : memref<256x288xbf16, #tpu.memory_space<vmem>>, vector<256x288xbf16>
    %c0_1 = arith.constant 0 : index
    %c0_2 = arith.constant 0 : index
    %1 = vector.load %arg2[%c0_1, %c0_2] : memref<288x64xbf16, #tpu.memory_space<vmem>>, vector<288x64xbf16>
    %cst = arith.constant dense<0.000000e+00> : vector<256x64xf32>
    %2 = tpu.matmul %0, %1, %cst {dimension_numbers = #tpu.dot_dimension_numbers<[1], [0], [0], [1], [0, 0, 1, 1], [], []>} : vector<256x288xbf16>, vector<288x64xbf16>, vector<256x64xf32> -> vector<256x64xf32>
    %c0_3 = arith.constant 0 : index
    %c0_4 = arith.constant 0 : index
    %3 = vector.load %arg3[%c0_3, %c0_4] : memref<1x64xf32, #tpu.memory_space<vmem>>, vector<1x64xf32>
    %4 = vector.broadcast %3 : vector<1x64xf32> to vector<256x64xf32>
    %5 = arith.addf %2, %4 : vector<256x64xf32>
    %cst_5 = arith.constant 0.000000e+00 : f32
    %6 = vector.broadcast %cst_5 : f32 to vector<256x64xf32>
    %7 = arith.maximumf %5, %6 : vector<256x64xf32>
    %8 = arith.truncf %7 : vector<256x64xf32> to vector<256x64xbf16>
    %c0_6 = arith.constant 0 : index
    %c0_7 = arith.constant 0 : index
    %9 = vector.load %arg4[%c0_6, %c0_7] : memref<256x64xbf16, #tpu.memory_space<vmem>>, vector<256x64xbf16>
    tpu.vector_store %arg4[%c0_6, %c0_7], %8 {strides = array<i32>} : memref<256x64xbf16, #tpu.memory_space<vmem>>, vector<256x64xbf16>,
    return
  }
  func.func @transform_0(%arg0: i32) -> (i32, i32) {
    %c0_i32 = arith.constant 0 : i32
    %c0_i32_0 = arith.constant 0 : i32
    return %arg0, %c0_i32 : i32, i32
  }
  func.func @transform_1(%arg0: i32) -> (i32, i32) {
    %c0_i32 = arith.constant 0 : i32
    %c0_i32_0 = arith.constant 0 : i32
    %c0_i32_1 = arith.constant 0 : i32
    return %c0_i32, %c0_i32_0 : i32, i32
  }
  func.func @transform_2(%arg0: i32) -> (i32, i32) {
    %c0_i32 = arith.constant 0 : i32
    %c0_i32_0 = arith.constant 0 : i32
    %c0_i32_1 = arith.constant 0 : i32
    return %c0_i32, %c0_i32_0 : i32, i32
  }
  func.func @transform_3(%arg0: i32) -> (i32, i32) {
    %c0_i32 = arith.constant 0 : i32
    %c0_i32_0 = arith.constant 0 : i32
    return %arg0, %c0_i32 : i32, i32
  }
}

module attributes {stable_mosaic.version = 11 : i64} {
  func.func @_maxpool_2x2_kernel(%arg0: i32, %arg1: memref<2x2x2x12x12x64xbf16, #tpu.memory_space<vmem>>, %arg2: memref<2x12x12x64xbf16, #tpu.memory_space<vmem>>) attributes {dimension_semantics = [#tpu.dimension_semantics<parallel>], iteration_bounds = array<i64: 1>, scalar_prefetch = 0 : i64, scratch_operands = 0 : i64, tpu.core_type = #tpu.core_type<tc>, window_params = [{transform_indices = @transform_0, window_bounds = array<i64: 2, 2, 2, 12, 12, 64>}, {transform_indices = @transform_1, window_bounds = array<i64: 2, 12, 12, 64>}]} {
    %c0 = arith.constant 0 : index
    %c0_0 = arith.constant 0 : index
    %c0_1 = arith.constant 0 : index
    %c0_2 = arith.constant 0 : index
    %c0_3 = arith.constant 0 : index
    %c0_4 = arith.constant 0 : index
    %0 = vector.load %arg1[%c0, %c0_0, %c0_1, %c0_2, %c0_3, %c0_4] : memref<2x2x2x12x12x64xbf16, #tpu.memory_space<vmem>>, vector<2x2x2x12x12x64xbf16>
    %1 = vector.extract_strided_slice %0 {offsets = [0, 0, 0, 0, 0, 0], sizes = [2, 1, 1, 12, 12, 64], strides = [1, 1, 1, 1, 1, 1]} : vector<2x2x2x12x12x64xbf16> to vector<2x1x1x12x12x64xbf16>
    %2 = vector.shape_cast %1 : vector<2x1x1x12x12x64xbf16> to vector<2x12x12x64xbf16>
    %3 = vector.extract_strided_slice %0 {offsets = [0, 0, 1, 0, 0, 0], sizes = [2, 1, 1, 12, 12, 64], strides = [1, 1, 1, 1, 1, 1]} : vector<2x2x2x12x12x64xbf16> to vector<2x1x1x12x12x64xbf16>
    %4 = vector.shape_cast %3 : vector<2x1x1x12x12x64xbf16> to vector<2x12x12x64xbf16>
    %5 = arith.maximumf %2, %4 : vector<2x12x12x64xbf16>
    %6 = vector.extract_strided_slice %0 {offsets = [0, 1, 0, 0, 0, 0], sizes = [2, 1, 1, 12, 12, 64], strides = [1, 1, 1, 1, 1, 1]} : vector<2x2x2x12x12x64xbf16> to vector<2x1x1x12x12x64xbf16>
    %7 = vector.shape_cast %6 : vector<2x1x1x12x12x64xbf16> to vector<2x12x12x64xbf16>
    %8 = vector.extract_strided_slice %0 {offsets = [0, 1, 1, 0, 0, 0], sizes = [2, 1, 1, 12, 12, 64], strides = [1, 1, 1, 1, 1, 1]} : vector<2x2x2x12x12x64xbf16> to vector<2x1x1x12x12x64xbf16>
    %9 = vector.shape_cast %8 : vector<2x1x1x12x12x64xbf16> to vector<2x12x12x64xbf16>
    %10 = arith.maximumf %7, %9 : vector<2x12x12x64xbf16>
    %11 = arith.maximumf %5, %10 : vector<2x12x12x64xbf16>
    %c0_5 = arith.constant 0 : index
    %c0_6 = arith.constant 0 : index
    %c0_7 = arith.constant 0 : index
    %c0_8 = arith.constant 0 : index
    %12 = vector.load %arg2[%c0_5, %c0_6, %c0_7, %c0_8] : memref<2x12x12x64xbf16, #tpu.memory_space<vmem>>, vector<2x12x12x64xbf16>
    tpu.vector_store %arg2[%c0_5, %c0_6, %c0_7, %c0_8], %11 {strides = array<i32>} : memref<2x12x12x64xbf16, #tpu.memory_space<vmem>>, vector<2x12x12x64xbf16>,
    return
  }
  func.func @transform_0(%arg0: i32) -> (i32, i32, i32, i32, i32, i32) {
    %c0_i32 = arith.constant 0 : i32
    %c0_i32_0 = arith.constant 0 : i32
    %c0_i32_1 = arith.constant 0 : i32
    %c0_i32_2 = arith.constant 0 : i32
    %c0_i32_3 = arith.constant 0 : i32
    %c0_i32_4 = arith.constant 0 : i32
    return %arg0, %c0_i32, %c0_i32_0, %c0_i32_1, %c0_i32_2, %c0_i32_3 : i32, i32, i32, i32, i32, i32
  }
  func.func @transform_1(%arg0: i32) -> (i32, i32, i32, i32) {
    %c0_i32 = arith.constant 0 : i32
    %c0_i32_0 = arith.constant 0 : i32
    %c0_i32_1 = arith.constant 0 : i32
    %c0_i32_2 = arith.constant 0 : i32
    return %arg0, %c0_i32, %c0_i32_0, %c0_i32_1 : i32, i32, i32, i32
  }
}

module attributes {stable_mosaic.version = 11 : i64} {
  func.func @_fc_fused_kernel(%arg0: i32, %arg1: i32, %arg2: memref<2x1152xbf16, #tpu.memory_space<vmem>>, %arg3: memref<1152x128xbf16, #tpu.memory_space<vmem>>, %arg4: memref<1x128xf32, #tpu.memory_space<vmem>>, %arg5: memref<128x10xbf16, #tpu.memory_space<vmem>>, %arg6: memref<1x10xf32, #tpu.memory_space<vmem>>, %arg7: memref<2x10xf32, #tpu.memory_space<vmem>>, %arg8: memref<2x128xf32, #tpu.memory_space<vmem>>) attributes {dimension_semantics = [#tpu.dimension_semantics<parallel>, #tpu.dimension_semantics<arbitrary>], iteration_bounds = array<i64: 1, 8>, scalar_prefetch = 0 : i64, scratch_operands = 1 : i64, tpu.core_type = #tpu.core_type<tc>, window_params = [{transform_indices = @transform_0, window_bounds = array<i64: 2, 1152>}, {transform_indices = @transform_1, window_bounds = array<i64: 1152, 128>}, {pipeline_mode = #tpu.pipeline_mode<synchronous>, transform_indices = @transform_2, window_bounds = array<i64: 1, 128>}, {pipeline_mode = #tpu.pipeline_mode<synchronous>, transform_indices = @transform_3, window_bounds = array<i64: 128, 10>}, {pipeline_mode = #tpu.pipeline_mode<synchronous>, transform_indices = @transform_4, window_bounds = array<i64: 1, 10>}, {transform_indices = @transform_5, window_bounds = array<i64: 2, 10>}]} {
    %c0_i32 = arith.constant 0 : i32
    %0 = arith.cmpi eq, %arg1, %c0_i32 : i32
    %1 = arith.extui %0 : i1 to i32
    %c0_i32_0 = arith.constant 0 : i32
    %2 = arith.cmpi ne, %1, %c0_i32_0 : i32
    scf.if %2 {
      %cst_9 = arith.constant 0.000000e+00 : f32
      %12 = vector.broadcast %cst_9 : f32 to vector<2x128xf32>
      %c0_10 = arith.constant 0 : index
      %c0_11 = arith.constant 0 : index
      %13 = vector.load %arg8[%c0_10, %c0_11] : memref<2x128xf32, #tpu.memory_space<vmem>>, vector<2x128xf32>
      tpu.vector_store %arg8[%c0_10, %c0_11], %12 {strides = array<i32>} : memref<2x128xf32, #tpu.memory_space<vmem>>, vector<2x128xf32>,
    } else {
    }
    %c0 = arith.constant 0 : index
    %c0_1 = arith.constant 0 : index
    %3 = vector.load %arg8[%c0, %c0_1] : memref<2x128xf32, #tpu.memory_space<vmem>>, vector<2x128xf32>
    %c0_2 = arith.constant 0 : index
    %c0_3 = arith.constant 0 : index
    %4 = vector.load %arg2[%c0_2, %c0_3] : memref<2x1152xbf16, #tpu.memory_space<vmem>>, vector<2x1152xbf16>
    %c0_4 = arith.constant 0 : index
    %c0_5 = arith.constant 0 : index
    %5 = vector.load %arg3[%c0_4, %c0_5] : memref<1152x128xbf16, #tpu.memory_space<vmem>>, vector<1152x128xbf16>
    %cst = arith.constant dense<0.000000e+00> : vector<2x128xf32>
    %6 = tpu.matmul %4, %5, %cst {dimension_numbers = #tpu.dot_dimension_numbers<[1], [0], [0], [1], [0, 0, 1, 1], [], []>} : vector<2x1152xbf16>, vector<1152x128xbf16>, vector<2x128xf32> -> vector<2x128xf32>
    %7 = arith.addf %3, %6 : vector<2x128xf32>
    %c0_6 = arith.constant 0 : index
    %c0_7 = arith.constant 0 : index
    %8 = vector.load %arg8[%c0_6, %c0_7] : memref<2x128xf32, #tpu.memory_space<vmem>>, vector<2x128xf32>
    tpu.vector_store %arg8[%c0_6, %c0_7], %7 {strides = array<i32>} : memref<2x128xf32, #tpu.memory_space<vmem>>, vector<2x128xf32>,
    %c7_i32 = arith.constant 7 : i32
    %9 = arith.cmpi eq, %arg1, %c7_i32 : i32
    %10 = arith.extui %9 : i1 to i32
    %c0_i32_8 = arith.constant 0 : i32
    %11 = arith.cmpi ne, %10, %c0_i32_8 : i32
    scf.if %11 {
      %c0_9 = arith.constant 0 : index
      %c0_10 = arith.constant 0 : index
      %12 = vector.load %arg8[%c0_9, %c0_10] : memref<2x128xf32, #tpu.memory_space<vmem>>, vector<2x128xf32>
      %c0_11 = arith.constant 0 : index
      %c0_12 = arith.constant 0 : index
      %13 = vector.load %arg4[%c0_11, %c0_12] : memref<1x128xf32, #tpu.memory_space<vmem>>, vector<1x128xf32>
      %14 = vector.broadcast %13 : vector<1x128xf32> to vector<2x128xf32>
      %15 = arith.addf %12, %14 : vector<2x128xf32>
      %cst_13 = arith.constant 0.000000e+00 : f32
      %16 = vector.broadcast %cst_13 : f32 to vector<2x128xf32>
      %17 = arith.maximumf %15, %16 : vector<2x128xf32>
      %18 = arith.truncf %17 : vector<2x128xf32> to vector<2x128xbf16>
      %c0_14 = arith.constant 0 : index
      %c0_15 = arith.constant 0 : index
      %19 = vector.load %arg5[%c0_14, %c0_15] : memref<128x10xbf16, #tpu.memory_space<vmem>>, vector<128x10xbf16>
      %cst_16 = arith.constant dense<0.000000e+00> : vector<2x10xf32>
      %20 = tpu.matmul %18, %19, %cst_16 {dimension_numbers = #tpu.dot_dimension_numbers<[1], [0], [0], [1], [0, 0, 1, 1], [], []>} : vector<2x128xbf16>, vector<128x10xbf16>, vector<2x10xf32> -> vector<2x10xf32>
      %c0_17 = arith.constant 0 : index
      %c0_18 = arith.constant 0 : index
      %21 = vector.load %arg6[%c0_17, %c0_18] : memref<1x10xf32, #tpu.memory_space<vmem>>, vector<1x10xf32>
      %22 = vector.broadcast %21 : vector<1x10xf32> to vector<2x10xf32>
      %23 = arith.addf %20, %22 : vector<2x10xf32>
      %cst_19 = arith.constant dense<0xFF800000> : vector<2xf32>
      %24 = vector.multi_reduction <maximumf>, %23, %cst_19 [1] : vector<2x10xf32> to vector<2xf32>
      %25 = vector.shape_cast %24 : vector<2xf32> to vector<2x1xf32>
      %26 = vector.broadcast %25 : vector<2x1xf32> to vector<2x10xf32>
      %27 = arith.subf %23, %26 : vector<2x10xf32>
      %28 = math.exp %27 : vector<2x10xf32>
      %cst_20 = arith.constant dense<0.000000e+00> : vector<2xf32>
      %29 = vector.multi_reduction <add>, %28, %cst_20 [1] : vector<2x10xf32> to vector<2xf32>
      %30 = vector.shape_cast %29 : vector<2xf32> to vector<2x1xf32>
      %31 = math.log %30 : vector<2x1xf32>
      %32 = vector.broadcast %31 : vector<2x1xf32> to vector<2x10xf32>
      %33 = arith.subf %27, %32 : vector<2x10xf32>
      %c0_21 = arith.constant 0 : index
      %c0_22 = arith.constant 0 : index
      %34 = vector.load %arg7[%c0_21, %c0_22] : memref<2x10xf32, #tpu.memory_space<vmem>>, vector<2x10xf32>
      tpu.vector_store %arg7[%c0_21, %c0_22], %33 {strides = array<i32>} : memref<2x10xf32, #tpu.memory_space<vmem>>, vector<2x10xf32>,
    } else {
    }
    return
  }
  func.func @transform_0(%arg0: i32, %arg1: i32) -> (i32, i32) {
    %c0_i32 = arith.constant 0 : i32
    return %arg0, %arg1 : i32, i32
  }
  func.func @transform_1(%arg0: i32, %arg1: i32) -> (i32, i32) {
    %c0_i32 = arith.constant 0 : i32
    %c0_i32_0 = arith.constant 0 : i32
    return %arg1, %c0_i32 : i32, i32
  }
  func.func @transform_2(%arg0: i32, %arg1: i32) -> (i32, i32) {
    %c0_i32 = arith.constant 0 : i32
    %c0_i32_0 = arith.constant 0 : i32
    %c0_i32_1 = arith.constant 0 : i32
    return %c0_i32, %c0_i32_0 : i32, i32
  }
  func.func @transform_3(%arg0: i32, %arg1: i32) -> (i32, i32) {
    %c0_i32 = arith.constant 0 : i32
    %c0_i32_0 = arith.constant 0 : i32
    %c0_i32_1 = arith.constant 0 : i32
    return %c0_i32, %c0_i32_0 : i32, i32
  }
  func.func @transform_4(%arg0: i32, %arg1: i32) -> (i32, i32) {
    %c0_i32 = arith.constant 0 : i32
    %c0_i32_0 = arith.constant 0 : i32
    %c0_i32_1 = arith.constant 0 : i32
    return %c0_i32, %c0_i32_0 : i32, i32
  }
  func.func @transform_5(%arg0: i32, %arg1: i32) -> (i32, i32) {
    %c0_i32 = arith.constant 0 : i32
    %c0_i32_0 = arith.constant 0 : i32
    return %arg0, %c0_i32 : i32, i32
  }
}

</mosaic_0001>

<bundles_post_ra>
// kernel: cnn_forward.4
= control target key start
LH: loop header
LB: loop body
LE: loop exit
PB: predicated region body
PF: predicated region fallthrough
CT: control target
= control target key end

     0   :  { %8 = vsyncpa [#allocation3], 0  ;;  %s1985_s0 = inlined_call_operand.vmem [shape: bf16[1352,9], index: 0, kind: input, shape index: {}]   ;;  %s1986_s1 = inlined_call_operand.hbm [shape: bf16[9,32], index: 1, kind: input, shape index: {}]   ;;  %s1987_s2 = inlined_call_operand.hbm [shape: f32[1,32], index: 2, kind: input, shape index: {}]   ;;  %s1988_s3 = inlined_call_operand.vmem [shape: bf16[1352,32], index: 3, kind: output, shape index: {}]  }
   0x1   :  { %9 = vsyncpa [#allocation5], 0  ;;  %s1605_s12 = smov 0   ;;  %s1607_s13 = smov 0  }
   0x2   :  { %s1609_s14 = smov 0  }
   0x3 LB: > { %s1618_s15 = sadd.s32 4294967295, %s1546_s14   ;;  %s1620_s16 = sadd.s32 1, %s1546_s14   ;;  %s1546_s14 = sphi %s1609_s14, %s2005_s14   ;;  %s1542_s13 = sphi %s1607_s13, %s2004_s13   ;;  %s1538_s12 = sphi %s1605_s12, %s2003_s12  }
   0x4   : > { %s87_s17 = ssub.s32 %s1546_s14, %s1620_s16  ;;  %s90_s18 = sadd.s32 1, %s1542_s13 }
   0x5   : > { %p88_p0 = scmp.eq.s32.totalorder %s87_s17, 0  ;;  %p100_p1 = scmp.ne.s32.totalorder %s1542_s13, %s1538_s12 }
   0x6   : > { %p101_p2 = scmp.eq.s32.totalorder %s1618_s15, 5  ;;  %p1118_p3 = scmp.ge.s32.totalorder %s1546_s14, 1 }
   0x7   : > { %s1628_s19 = scalar_select %p88_p0, %s1542_s13, %s90_s18  }
   0x8   : > { %p1630_p4 = por %p101_p2, %p100_p1  ;;  %p114_p5 = scmp.lt.s32.totalorder %s1546_s14, 7 }
   0x9   : > { %p1989_p6 = scmp.eq.s32.totalorder %s1618_s15, 0  ;;  %s1580_s22 = smov [#allocation2]  }
   0xa   : > { %s1991_s20 = scalar_select %p1630_p4, 1, 0 }
   0xb   : > { %p1635_p7 = pnand %p1118_p3, %p114_p5  ;;  %s126_s23 = sshll.u32 %s1580_s22, 4  ;;  %s127_s23 = int_to_ptr.vmem [resolvable:$true] %s126_s23 }
   0xc   : > { %s1581_s25 = smov [#allocation4]   ;;  %s1428_s29 = scalar_lea.hbm %s1986_s1, 128 }
   0xd   : > { %s1992_s21 = scalar_select %p1635_p7, 1, 0 }
   0xe   : > { %p1307_p8 = pneg %p1635_p7  ;;  %s140_s26 = sshll.u32 %s1581_s25, 4  ;;  %s1647_s26 = int_to_ptr.vmem [resolvable:$true] %s140_s26 }
   0xf   : > { %p1429_p10 = scmp.ne.s32.totalorder %s1986_s1, %s1428_s29  ;;  %p1435_p0 = scmp.lt.u32.totalorder %s1428_s29, %s1986_s1 }
  0x10   : > { %p1643_p9 = pnand %p1989_p6, %p1307_p8 }
  0x12   : > { %p1430_p11 = pneg %p1643_p9 }
  0x14   : > { %p1431_p12 = pnand %p1430_p11, %p1429_p10 }
  0x16   : > { %p1432_p13 = pneg %p1431_p12 }
  0x18   : > { %p1437_p1 = pnand %p1435_p0, %p1432_p13 }
  0x1a   : > { %1440 = shalt.err (!%p1437_p1)
}
  0x1b   : > { %s1441_s7 = scalar_lea.vmem %s127_s23, 128  ;;  %p1449_p8 = scmp.lt.s32.totalorder %s127_s23, %s127_s23 }
  0x1c   : > { %p1442_p2 = scmp.ne.s32.totalorder %s127_s23, %s1441_s7  ;;  %p1450_p6 = scmp.lt.s32.totalorder %s1441_s7, %s1441_s7 }
  0x1e   : > { %p1444_p3 = pnand %p1442_p2, %p1430_p11  ;;  %p1451_p4 = por %p1450_p6, %p1449_p8 }
  0x20   : > { %p1445_p5 = pneg %p1444_p3 }
  0x22   : > { %p1452_p7 = pnand %p1451_p4, %p1445_p5 }
  0x24   : > { %1455 = shalt.err (!%p1452_p7)
}
  0x25   : > { %s1582_s8 = smov 64   ;;  %s1583_s9 = smov 4  }
  0x26   : > { %1310 = dma.hbm_to_vmem [thread:$0]  (!%p1643_p9), %s1986_s1, 128, %s127_s23, [#allocation3], %s1582_s8, %s1582_s8, %s1583_s9  }
  0x27   : > { %s1456_s18 = scalar_lea.hbm %s1987_s2, 16 }
  0x28   : > { %p1457_p10 = scmp.ne.s32.totalorder %s1987_s2, %s1456_s18  ;;  %p1463_p7 = scmp.lt.u32.totalorder %s1456_s18, %s1987_s2 }
  0x2a   : > { %p1459_p4 = pnand %p1457_p10, %p1430_p11 }
  0x2c   : > { %p1460_p6 = pneg %p1459_p4 }
  0x2e   : > { %p1465_p12 = pnand %p1463_p7, %p1460_p6 }
  0x30   : > { %1468 = shalt.err (!%p1465_p12)
}
  0x31   : > { %s1469_s23 = scalar_lea.vmem %s1647_s26, 16  ;;  %s1476_s29 = scalar_lea.vmem %s1647_s26, 32 }
  0x32   : > { %p1470_p13 = scmp.ne.s32.totalorder %s1647_s26, %s1469_s23  ;;  %p1477_p2 = scmp.lt.s32.totalorder %s1647_s26, %s1647_s26 }
  0x33   : > { %p1478_p3 = scmp.lt.s32.totalorder %s1476_s29, %s1469_s23 }
  0x34   : > { %p1472_p0 = pnand %p1470_p13, %p1430_p11 }
  0x35   : > { %p1479_p5 = por %p1478_p3, %p1477_p2 }
  0x36   : > { %p1473_p1 = pneg %p1472_p0 }
  0x38   : > { %p1480_p8 = pnand %p1479_p5, %p1473_p1 }
  0x3a   : > { %1483 = shalt.err (!%p1480_p8)
}
  0x3b   : > { %1313 = dma.hbm_to_vmem [thread:$0]  (!%p1643_p9), %s1987_s2, 16, %s1647_s26, [#allocation5]  }
  0x3c   : > { %p1994_p10 = scmp.ne.s32.totalorder %s1992_s21, 0 }
  0x3d   : > { %p1995_p11 = scmp.eq.s32.totalorder (!%p1994_p10), %s1618_s15, 0 }
  0x3e   : > { %170 = sbr.rel (%p1994_p10) target bundleno = 400 (0x190), region = 32 }
  0x45   : > { %1529 = dma.done.wait (%p1995_p11), [#allocation3], 128   ;;  %p1996_p4 = pmov %p1995_p11 }
  0x47   : > { %1531 = vsyncadd (%p1996_p4), [#allocation3], 4294967168  ;;  %p1997_p6 = pmov %p1996_p4 }
  0x48   : > { %p1998_p7 = pmov %p1996_p4 }
  0x49   : > { %1533 = dma.done.wait (%p1997_p6), [#allocation5], 16  }
  0x4a   : > { %1535 = vsyncadd (%p1998_p7), [#allocation5], 4294967280  ;;  %vm396_vm0 = vcmask 1043456   ;;  %s1708_s24 = sshll.u32 %s1618_s15, 5  ;;  %vm397_vm1 = vcmask 1044480   ;;  %v1584_v0 = vmov 65535  }
  0x4b   : > { %p206_p9 = scmp.lt.s32.totalorder %s1708_s24, 168  ;;  %v398_v1 = vsel %vm396_vm0, 4294967295, %v1584_v0  ;;  %vm347_vm2 = vcmask 72704   ;;  %v1411_v3 = vld [vmem:[#allocation2] sm:$0x1f]   ;;  %s198_s8 = sand.u32 1, %s1538_s12  }
  0x4c   : > { %v399_v2 = vsel %vm397_vm1, %v398_v1, 0  ;;  %v1750_v21 = vld [vmem:[#allocation4] ss:$0 sm:$0xff]  ;;  %s1125_s9 = sshll.u32 %s198_s8, 7  ;;  %vm724_vm3 = vcmask 257024   ;;  %p1999_p12 = scmp.ne.s32.totalorder %s1991_s20, 0 }
  0x4d   : > { %s207_s21 = scalar_select %p206_p9, %s1708_s24, 168  ;;  %v401_v5 = vand.u32 %v1411_v3, %v399_v2 }
  0x4e   : > { %s1760_s12 = scalar_lea.vmem [#allocation6], %s1125_s9   ;;  %s765_s10 = ssub.s32 (%p1999_p12), 169, %s1708_s24 }
  0x4f   : > { %s1127_s26 = sshll.u32 %s207_s21, 2  ;;  %1263 = vmatprep.subr.bf16.mxu0 %v401_v5  ;;  %1297 = vmatprep.subr.bf16.mxu1 %v401_v5  ;;  %s1243_s11 = sshll.u32 (%p1999_p12), %s1618_s15, 7 }
  0x50   : > { %s1715_s7 = scalar_lea.vmem %s1985_s0, %s1127_s26  ;;  %1264 = vmatpush3.bf16.msra.mxu0 %v401_v5  ;;  %1298 = vmatpush3.bf16.msra.mxu1 %v401_v5  ;;  %p766_p13 = scmp.lt.s32.totalorder (%p1999_p12), %s765_s10, 32 }
  0x51   : > { %v1412_v4 = vld [vmem:[%s1715_s7] sm:$0xff]   ;;  %v1414_v7 = vld [vmem:[%s1715_s7 + $0x8] sm:$0xff]   ;;  %v1416_v9 = vld [vmem:[%s1715_s7 + $0x10] sm:$0xff]   ;;  %s1857_s18 = scalar_lea.vmem (%p1999_p12), %s1988_s3, %s1243_s11  }
  0x52   : > { %v1413_v6 = vld [vmem:[%s1715_s7 + $0x40] sm:$0xff]   ;;  %1265 = vmatprep.mubr.msk.bf16.mxu0 %vm347_vm2, %v1412_v4  ;;  %v1415_v8 = vld [vmem:[%s1715_s7 + $0x48] sm:$0xff]   ;;  %v1417_v10 = vld [vmem:[%s1715_s7 + $0x50] sm:$0xff]  }
  0x53   : > { %1281 = vmatprep.mubr.msk.bf16.mxu1 %vm347_vm2, %v1413_v6  ;;  %1266 = vmatmul.mubr.msk.bf16.vlgmr.msra.gmra.mrb[0].mxu0 %vm347_vm2, %v1414_v7  ;;  %v1418_v11 = vld [vmem:[%s1715_s7 + $0x18] sm:$0xff]   ;;  %v1420_v13 = vld [vmem:[%s1715_s7 + $0x20] sm:$0xff]   ;;  %v1422_v15 = vld [vmem:[%s1715_s7 + $0x28] sm:$0xff]  }
  0x54   : > { %1282 = vmatmul.mubr.msk.bf16.vlgmr.msra.gmra.mrb[0].mxu1 %vm347_vm2, %v1415_v8  ;;  %1269 = vmatprep.mubr.msk.bf16.mxu0 %vm347_vm2, %v1416_v9  ;;  %v1419_v12 = vld [vmem:[%s1715_s7 + $0x58] sm:$0xff]   ;;  %v1421_v14 = vld [vmem:[%s1715_s7 + $0x60] sm:$0xff]   ;;  %v1423_v16 = vld [vmem:[%s1715_s7 + $0x68] sm:$0xff]  }
  0x55   : > { %1285 = vmatprep.mubr.msk.bf16.mxu1 %vm347_vm2, %v1417_v10  ;;  %v1424_v17 = vld [vmem:[%s1715_s7 + $0x30] sm:$0xff]   ;;  %v1426_v19 = vld [vmem:[%s1715_s7 + $0x38] sm:$0xff]  }
  0x56   : > { %v1425_v18 = vld [vmem:[%s1715_s7 + $0x70] sm:$0xff]   ;;  %v1427_v20 = vld [vmem:[%s1715_s7 + $0x78] sm:$0xff]  }
  0x5b   : > { %1270 = vmatmul.mubr.msk.bf16.gmra.mrb[4].mxu0 %vm347_vm2, %v1418_v11 }
  0x5c   : > { %1286 = vmatmul.mubr.msk.bf16.gmra.mrb[4].mxu1 %vm347_vm2, %v1419_v12  ;;  %1273 = vmatprep.mubr.msk.bf16.mxu0 %vm347_vm2, %v1420_v13 }
  0x5d   : > { %1289 = vmatprep.mubr.msk.bf16.mxu1 %vm347_vm2, %v1421_v14 }
  0x63   : > { %1274 = vmatmul.mubr.msk.bf16.gmra.mrb[8].mxu0 %vm347_vm2, %v1422_v15 }
  0x64   : > { %1290 = vmatmul.mubr.msk.bf16.gmra.mrb[8].mxu1 %vm347_vm2, %v1423_v16  ;;  %1277 = vmatprep.mubr.msk.bf16.mxu0 %vm347_vm2, %v1424_v17 }
  0x65   : > { %1293 = vmatprep.mubr.msk.bf16.mxu1 %vm347_vm2, %v1425_v18 }
  0x6b   : > { %1278 = vmatmul.mubr.msk.bf16.gmra.mrb[12].mxu0 %vm347_vm2, %v1426_v19 }
  0x6c   : > { %1294 = vmatmul.mubr.msk.bf16.gmra.mrb[12].mxu1 %vm347_vm2, %v1427_v20 }
 0x126   : > { %v1267_v22 = vpop.f32.mrb[0].mxu0 }
 0x127   : > { %v1283_v23 = vpop.f32.mrb[0].mxu1  ;;  %v446_v24 = vadd.f32 %v1267_v22, %v1750_v21  ;;  %v437_v26 = vpop.f32.mrb[1].mxu0 }
 0x128   : > { %v510_v25 = vadd.f32 %v1283_v23, %v1750_v21  ;;  %v501_v27 = vpop.f32.mrb[1].mxu1  ;;  %v438_v28 = vadd.f32 %v1750_v21, %v437_v26  ;;  %v1268_v30 = vpop.f32.mrb[2].mxu0 }
 0x129   : > { %v502_v29 = vadd.f32 %v1750_v21, %v501_v27  ;;  %v1284_v31 = vpop.f32.mrb[2].mxu1  ;;  %v566_v32 = vmax.f32 %v446_v24, 0.0  ;;  %v449_v34 = vadd.f32 %v1268_v30, %v1750_v21  ;;  %v440_v36 = vpop.f32.mrb[3].mxu0 }
 0x12a   : > { %v582_v33 = vmax.f32 %v510_v25, 0.0  ;;  %v513_v35 = vadd.f32 %v1284_v31, %v1750_v21  ;;  %v504_v37 = vpop.f32.mrb[3].mxu1  ;;  %v564_v38 = vmax.f32 %v438_v28, 0.0  ;;  %v441_v40 = vadd.f32 %v1750_v21, %v440_v36 }
 0x12b   : > { %v580_v39 = vmax.f32 %v502_v29, 0.0  ;;  %v505_v41 = vadd.f32 %v1750_v21, %v504_v37  ;;  %v1213_v42 = vpack.c.bf16 %v566_v32, %v566_v32  ;;  %v567_v44 = vmax.f32 %v449_v34, 0.0 }
 0x12c   : > { %v1229_v43 = vpack.c.bf16 %v582_v33, %v582_v33  ;;  %v583_v45 = vmax.f32 %v513_v35, 0.0  ;;  %v1211_v46 = vpack.c.bf16 %v564_v38, %v564_v38  ;;  %v565_v48 = vmax.f32 %v441_v40, 0.0 }
 0x12d   : > { %v1227_v47 = vpack.c.bf16 %v580_v39, %v580_v39  ;;  %v581_v49 = vmax.f32 %v505_v41, 0.0  ;;  %727 = vst.msk [vmem:[%s1760_s12 + $0x8] sm:$0xf] %vm724_vm3, %v1213_v42  ;;  %v1214_v50 = vpack.c.bf16 %v567_v44, %v567_v44 }
 0x12e   : > { %743 = vst.msk [vmem:[%s1760_s12 + $0x48] sm:$0xf] %vm724_vm3, %v1229_v43  ;;  %v1230_v51 = vpack.c.bf16 %v583_v45, %v583_v45  ;;  %725 = vst.msk [vmem:[%s1760_s12] sm:$0xf] %vm724_vm3, %v1211_v46  ;;  %v1212_v52 = vpack.c.bf16 %v565_v48, %v565_v48  ;;  %v1271_v54 = vpop.f32.mrb[4].mxu0 }
 0x12f   : > { %741 = vst.msk [vmem:[%s1760_s12 + $0x40] sm:$0xf] %vm724_vm3, %v1227_v47  ;;  %v1228_v53 = vpack.c.bf16 %v581_v49, %v581_v49  ;;  %v1287_v55 = vpop.f32.mrb[4].mxu1  ;;  %728 = vst.msk [vmem:[%s1760_s12 + $0xc] sm:$0xf] %vm724_vm3, %v1214_v50  ;;  %v462_v56 = vadd.f32 %v1271_v54, %v1750_v21  ;;  %v453_v58 = vpop.f32.mrb[5].mxu0 }
 0x130   : > { %744 = vst.msk [vmem:[%s1760_s12 + $0x4c] sm:$0xf] %vm724_vm3, %v1230_v51  ;;  %v526_v57 = vadd.f32 %v1287_v55, %v1750_v21  ;;  %v517_v59 = vpop.f32.mrb[5].mxu1  ;;  %726 = vst.msk [vmem:[%s1760_s12 + $0x4] sm:$0xf] %vm724_vm3, %v1212_v52  ;;  %v454_v60 = vadd.f32 %v1750_v21, %v453_v58  ;;  %v1272_v62 = vpop.f32.mrb[6].mxu0 }
 0x131   : > { %742 = vst.msk [vmem:[%s1760_s12 + $0x44] sm:$0xf] %vm724_vm3, %v1228_v53  ;;  %v518_v61 = vadd.f32 %v1750_v21, %v517_v59  ;;  %v1288_v63 = vpop.f32.mrb[6].mxu1  ;;  %v570_v0 = vmax.f32 %v462_v56, 0.0  ;;  %v465_v2 = vadd.f32 %v1272_v62, %v1750_v21  ;;  %v456_v4 = vpop.f32.mrb[7].mxu0 }
 0x132   : > { %v586_v1 = vmax.f32 %v526_v57, 0.0  ;;  %v529_v3 = vadd.f32 %v1288_v63, %v1750_v21  ;;  %v520_v5 = vpop.f32.mrb[7].mxu1  ;;  %v568_v6 = vmax.f32 %v454_v60, 0.0  ;;  %v457_v8 = vadd.f32 %v1750_v21, %v456_v4 }
 0x133   : > { %v584_v7 = vmax.f32 %v518_v61, 0.0  ;;  %v521_v9 = vadd.f32 %v1750_v21, %v520_v5  ;;  %v1217_v10 = vpack.c.bf16 %v570_v0, %v570_v0  ;;  %v571_v12 = vmax.f32 %v465_v2, 0.0 }
 0x134   : > { %v1233_v11 = vpack.c.bf16 %v586_v1, %v586_v1  ;;  %v587_v13 = vmax.f32 %v529_v3, 0.0  ;;  %v1215_v14 = vpack.c.bf16 %v568_v6, %v568_v6  ;;  %v569_v16 = vmax.f32 %v457_v8, 0.0 }
 0x135   : > { %v1231_v15 = vpack.c.bf16 %v584_v7, %v584_v7  ;;  %v585_v17 = vmax.f32 %v521_v9, 0.0  ;;  %731 = vst.msk [vmem:[%s1760_s12 + $0x18] sm:$0xf] %vm724_vm3, %v1217_v10  ;;  %v1218_v18 = vpack.c.bf16 %v571_v12, %v571_v12 }
 0x136   : > { %747 = vst.msk [vmem:[%s1760_s12 + $0x58] sm:$0xf] %vm724_vm3, %v1233_v11  ;;  %v1234_v19 = vpack.c.bf16 %v587_v13, %v587_v13  ;;  %729 = vst.msk [vmem:[%s1760_s12 + $0x10] sm:$0xf] %vm724_vm3, %v1215_v14  ;;  %v1216_v20 = vpack.c.bf16 %v569_v16, %v569_v16  ;;  %v1275_v23 = vpop.f32.mrb[8].mxu0 }
 0x137   : > { %745 = vst.msk [vmem:[%s1760_s12 + $0x50] sm:$0xf] %vm724_vm3, %v1231_v15  ;;  %v1232_v22 = vpack.c.bf16 %v585_v17, %v585_v17  ;;  %v1291_v24 = vpop.f32.mrb[8].mxu1  ;;  %732 = vst.msk [vmem:[%s1760_s12 + $0x1c] sm:$0xf] %vm724_vm3, %v1218_v18  ;;  %v478_v25 = vadd.f32 %v1275_v23, %v1750_v21  ;;  %v469_v27 = vpop.f32.mrb[9].mxu0 }
 0x138   : > { %748 = vst.msk [vmem:[%s1760_s12 + $0x5c] sm:$0xf] %vm724_vm3, %v1234_v19  ;;  %v542_v26 = vadd.f32 %v1291_v24, %v1750_v21  ;;  %v533_v28 = vpop.f32.mrb[9].mxu1  ;;  %730 = vst.msk [vmem:[%s1760_s12 + $0x14] sm:$0xf] %vm724_vm3, %v1216_v20  ;;  %v470_v29 = vadd.f32 %v1750_v21, %v469_v27  ;;  %v1276_v31 = vpop.f32.mrb[10].mxu0 }
 0x139   : > { %746 = vst.msk [vmem:[%s1760_s12 + $0x54] sm:$0xf] %vm724_vm3, %v1232_v22  ;;  %v534_v30 = vadd.f32 %v1750_v21, %v533_v28  ;;  %v1292_v32 = vpop.f32.mrb[10].mxu1  ;;  %v574_v33 = vmax.f32 %v478_v25, 0.0  ;;  %v481_v35 = vadd.f32 %v1276_v31, %v1750_v21  ;;  %v472_v37 = vpop.f32.mrb[11].mxu0 }
 0x13a   : > { %v590_v34 = vmax.f32 %v542_v26, 0.0  ;;  %v545_v36 = vadd.f32 %v1292_v32, %v1750_v21  ;;  %v536_v38 = vpop.f32.mrb[11].mxu1  ;;  %v572_v39 = vmax.f32 %v470_v29, 0.0  ;;  %v473_v41 = vadd.f32 %v1750_v21, %v472_v37 }
 0x13b   : > { %v588_v40 = vmax.f32 %v534_v30, 0.0  ;;  %v537_v42 = vadd.f32 %v1750_v21, %v536_v38  ;;  %v1221_v43 = vpack.c.bf16 %v574_v33, %v574_v33  ;;  %v575_v45 = vmax.f32 %v481_v35, 0.0 }
 0x13c   : > { %v1237_v44 = vpack.c.bf16 %v590_v34, %v590_v34  ;;  %v591_v46 = vmax.f32 %v545_v36, 0.0  ;;  %v1219_v47 = vpack.c.bf16 %v572_v39, %v572_v39  ;;  %v573_v49 = vmax.f32 %v473_v41, 0.0 }
 0x13d   : > { %v1235_v48 = vpack.c.bf16 %v588_v40, %v588_v40  ;;  %v589_v50 = vmax.f32 %v537_v42, 0.0  ;;  %735 = vst.msk [vmem:[%s1760_s12 + $0x28] sm:$0xf] %vm724_vm3, %v1221_v43  ;;  %v1222_v51 = vpack.c.bf16 %v575_v45, %v575_v45 }
 0x13e   : > { %751 = vst.msk [vmem:[%s1760_s12 + $0x68] sm:$0xf] %vm724_vm3, %v1237_v44  ;;  %v1238_v52 = vpack.c.bf16 %v591_v46, %v591_v46  ;;  %733 = vst.msk [vmem:[%s1760_s12 + $0x20] sm:$0xf] %vm724_vm3, %v1219_v47  ;;  %v1220_v53 = vpack.c.bf16 %v573_v49, %v573_v49  ;;  %v1279_v55 = vpop.f32.mrb[12].mxu0 }
 0x13f   : > { %749 = vst.msk [vmem:[%s1760_s12 + $0x60] sm:$0xf] %vm724_vm3, %v1235_v48  ;;  %v1236_v54 = vpack.c.bf16 %v589_v50, %v589_v50  ;;  %v1295_v56 = vpop.f32.mrb[12].mxu1  ;;  %736 = vst.msk [vmem:[%s1760_s12 + $0x2c] sm:$0xf] %vm724_vm3, %v1222_v51  ;;  %v494_v57 = vadd.f32 %v1279_v55, %v1750_v21  ;;  %v485_v59 = vpop.f32.mrb[13].mxu0 }
 0x140   : > { %752 = vst.msk [vmem:[%s1760_s12 + $0x6c] sm:$0xf] %vm724_vm3, %v1238_v52  ;;  %v558_v58 = vadd.f32 %v1295_v56, %v1750_v21  ;;  %v549_v60 = vpop.f32.mrb[13].mxu1  ;;  %734 = vst.msk [vmem:[%s1760_s12 + $0x24] sm:$0xf] %vm724_vm3, %v1220_v53  ;;  %v486_v61 = vadd.f32 %v1750_v21, %v485_v59  ;;  %v1280_v63 = vpop.f32.mrb[14].mxu0 }
 0x141   : > { %750 = vst.msk [vmem:[%s1760_s12 + $0x64] sm:$0xf] %vm724_vm3, %v1236_v54  ;;  %v550_v62 = vadd.f32 %v1750_v21, %v549_v60  ;;  %v1296_v0 = vpop.f32.mrb[14].mxu1  ;;  %v578_v1 = vmax.f32 %v494_v57, 0.0  ;;  %v497_v3 = vadd.f32 %v1280_v63, %v1750_v21  ;;  %v488_v5 = vpop.f32.mrb[15].mxu0 }
 0x142   : > { %v594_v2 = vmax.f32 %v558_v58, 0.0  ;;  %v561_v4 = vadd.f32 %v1296_v0, %v1750_v21  ;;  %v552_v6 = vpop.f32.mrb[15].mxu1  ;;  %v576_v7 = vmax.f32 %v486_v61, 0.0  ;;  %v489_v9 = vadd.f32 %v1750_v21, %v488_v5 }
 0x143   : > { %v592_v8 = vmax.f32 %v550_v62, 0.0  ;;  %v553_v10 = vadd.f32 %v1750_v21, %v552_v6  ;;  %v1225_v11 = vpack.c.bf16 %v578_v1, %v578_v1  ;;  %v579_v13 = vmax.f32 %v497_v3, 0.0  ;;  %763 = sbr.rel (!%p1999_p12) target bundleno = 400 (0x190), region = 44 }
 0x144   : > { %v1241_v12 = vpack.c.bf16 %v594_v2, %v594_v2  ;;  %v595_v14 = vmax.f32 %v561_v4, 0.0  ;;  %v1223_v15 = vpack.c.bf16 %v576_v7, %v576_v7  ;;  %v577_v17 = vmax.f32 %v489_v9, 0.0 }
 0x145   : > { %v1239_v16 = vpack.c.bf16 %v592_v8, %v592_v8  ;;  %v593_v18 = vmax.f32 %v553_v10, 0.0  ;;  %739 = vst.msk [vmem:[%s1760_s12 + $0x38] sm:$0xf] %vm724_vm3, %v1225_v11  ;;  %v1226_v19 = vpack.c.bf16 %v579_v13, %v579_v13 }
 0x146   : > { %755 = vst.msk [vmem:[%s1760_s12 + $0x78] sm:$0xf] %vm724_vm3, %v1241_v12  ;;  %v1242_v20 = vpack.c.bf16 %v595_v14, %v595_v14  ;;  %737 = vst.msk [vmem:[%s1760_s12 + $0x30] sm:$0xf] %vm724_vm3, %v1223_v15  ;;  %v1224_v21 = vpack.c.bf16 %v577_v17, %v577_v17 }
 0x147   : > { %753 = vst.msk [vmem:[%s1760_s12 + $0x70] sm:$0xf] %vm724_vm3, %v1239_v16  ;;  %v1240_v22 = vpack.c.bf16 %v593_v18, %v593_v18  ;;  %740 = vst.msk [vmem:[%s1760_s12 + $0x3c] sm:$0xf] %vm724_vm3, %v1226_v19 }
 0x148   : > { %756 = vst.msk [vmem:[%s1760_s12 + $0x7c] sm:$0xf] %vm724_vm3, %v1242_v20  ;;  %738 = vst.msk [vmem:[%s1760_s12 + $0x34] sm:$0xf] %vm724_vm3, %v1224_v21 }
 0x149   : > { %754 = vst.msk [vmem:[%s1760_s12 + $0x74] sm:$0xf] %vm724_vm3, %v1240_v22 }
 0x14a   : > { %s2007_s10 = smov (!%p766_p13, %s765_s10), 32 }
 0x14b   : > { %s1196_s22 = sshll.u32 %s2007_s10, 6 }
 0x14c   : > { %p1199_p0 = scmp.eq.s32.totalorder %s1196_s22, 0 }
 0x14d   : > { %s1863_s25 = sshrl.u32 (!%p1199_p0), %s2007_s10, 5 }
 0x14e   : > { %774 = sbr.rel (%p1199_p0) target bundleno = 400 (0x190), region = 48  ;;  %p1200_p1 = scmp.le.s32.totalorder (!%p1199_p0), %s1863_s25, 0 }
 0x155   : > { %1055 = sbr.rel (%p1200_p1) target bundleno = 379 (0x17b), region = 121  ;;  %s2000_s15 = smov (!%p1200_p1), %s1857_s18 }
 0x156   : > { %s2001_s20 = smov (!%p1200_p1), %s1760_s12  ;;  %s1872_s27 = smov (!%p1200_p1), 0  }
 0x157   : > { %s1874_s28 = smov (!%p1200_p1), 0  }
 0x15c LB: >> { %v790_v23 = vld [vmem:[%s1554_s20] sm:$0xf]  ;;  %v792_v24 = vld [vmem:[%s1554_s20 + $0x4] sm:$0xf]  ;;  %v794_v25 = vld [vmem:[%s1554_s20 + $0x8] sm:$0xf]  ;;  %s1562_s28 = sphi %s1874_s28, %s784_s28   ;;  %s1558_s27 = sphi %s1872_s27, %s2002_s27   ;;  %s1554_s20 = sphi %s2001_s20, %s859_s20   ;;  %s1550_s15 = sphi %s2000_s15, %s860_s15  }
 0x15d   : >> { %791 = vst [vmem:[%s1550_s15] sm:$0xf] %v790_v23  ;;  %793 = vst [vmem:[%s1550_s15 + $0x4] sm:$0xf] %v792_v24  ;;  %v796_v26 = vld [vmem:[%s1554_s20 + $0xc] sm:$0xf]  ;;  %s854_s23 = sadd.s32 1, %s1558_s27 }
 0x15e   : >> { %795 = vst [vmem:[%s1550_s15 + $0x8] sm:$0xf] %v794_v25  ;;  %v798_v27 = vld [vmem:[%s1554_s20 + $0x10] sm:$0xf]  ;;  %v800_v28 = vld [vmem:[%s1554_s20 + $0x14] sm:$0xf]  ;;  %p855_p2 = scmp.ge.s32.totalorder %s854_s23, %s1863_s25 }
 0x15f   : >> { %797 = vst [vmem:[%s1550_s15 + $0xc] sm:$0xf] %v796_v26  ;;  %799 = vst [vmem:[%s1550_s15 + $0x10] sm:$0xf] %v798_v27  ;;  %v802_v29 = vld [vmem:[%s1554_s20 + $0x18] sm:$0xf] }
 0x160   : >> { %801 = vst [vmem:[%s1550_s15 + $0x14] sm:$0xf] %v800_v28  ;;  %v804_v30 = vld [vmem:[%s1554_s20 + $0x1c] sm:$0xf]  ;;  %v806_v31 = vld [vmem:[%s1554_s20 + $0x20] sm:$0xf] }
 0x161   : >> { %803 = vst [vmem:[%s1550_s15 + $0x18] sm:$0xf] %v802_v29  ;;  %805 = vst [vmem:[%s1550_s15 + $0x1c] sm:$0xf] %v804_v30  ;;  %v808_v32 = vld [vmem:[%s1554_s20 + $0x24] sm:$0xf] }
 0x162   : >> { %807 = vst [vmem:[%s1550_s15 + $0x20] sm:$0xf] %v806_v31  ;;  %v810_v33 = vld [vmem:[%s1554_s20 + $0x28] sm:$0xf]  ;;  %v812_v34 = vld [vmem:[%s1554_s20 + $0x2c] sm:$0xf] }
 0x163   : >> { %809 = vst [vmem:[%s1550_s15 + $0x24] sm:$0xf] %v808_v32  ;;  %811 = vst [vmem:[%s1550_s15 + $0x28] sm:$0xf] %v810_v33  ;;  %v814_v35 = vld [vmem:[%s1554_s20 + $0x30] sm:$0xf] }
 0x164   : >> { %813 = vst [vmem:[%s1550_s15 + $0x2c] sm:$0xf] %v812_v34  ;;  %v816_v36 = vld [vmem:[%s1554_s20 + $0x34] sm:$0xf]  ;;  %v818_v37 = vld [vmem:[%s1554_s20 + $0x38] sm:$0xf] }
 0x165   : >> { %815 = vst [vmem:[%s1550_s15 + $0x30] sm:$0xf] %v814_v35  ;;  %817 = vst [vmem:[%s1550_s15 + $0x34] sm:$0xf] %v816_v36  ;;  %v820_v38 = vld [vmem:[%s1554_s20 + $0x3c] sm:$0xf] }
 0x166   : >> { %819 = vst [vmem:[%s1550_s15 + $0x38] sm:$0xf] %v818_v37  ;;  %v822_v39 = vld [vmem:[%s1554_s20 + $0x40] sm:$0xf]  ;;  %v824_v40 = vld [vmem:[%s1554_s20 + $0x44] sm:$0xf] }
 0x167   : >> { %821 = vst [vmem:[%s1550_s15 + $0x3c] sm:$0xf] %v820_v38  ;;  %823 = vst [vmem:[%s1550_s15 + $0x40] sm:$0xf] %v822_v39  ;;  %v826_v41 = vld [vmem:[%s1554_s20 + $0x48] sm:$0xf] }
 0x168   : >> { %825 = vst [vmem:[%s1550_s15 + $0x44] sm:$0xf] %v824_v40  ;;  %v828_v42 = vld [vmem:[%s1554_s20 + $0x4c] sm:$0xf]  ;;  %v830_v43 = vld [vmem:[%s1554_s20 + $0x50] sm:$0xf] }
 0x169   : >> { %827 = vst [vmem:[%s1550_s15 + $0x48] sm:$0xf] %v826_v41  ;;  %829 = vst [vmem:[%s1550_s15 + $0x4c] sm:$0xf] %v828_v42  ;;  %v832_v44 = vld [vmem:[%s1554_s20 + $0x54] sm:$0xf] }
 0x16a   : >> { %831 = vst [vmem:[%s1550_s15 + $0x50] sm:$0xf] %v830_v43  ;;  %v834_v45 = vld [vmem:[%s1554_s20 + $0x58] sm:$0xf]  ;;  %v836_v46 = vld [vmem:[%s1554_s20 + $0x5c] sm:$0xf] }
 0x16b   : >> { %833 = vst [vmem:[%s1550_s15 + $0x54] sm:$0xf] %v832_v44  ;;  %835 = vst [vmem:[%s1550_s15 + $0x58] sm:$0xf] %v834_v45  ;;  %v838_v47 = vld [vmem:[%s1554_s20 + $0x60] sm:$0xf] }
 0x16c   : >> { %837 = vst [vmem:[%s1550_s15 + $0x5c] sm:$0xf] %v836_v46  ;;  %v840_v48 = vld [vmem:[%s1554_s20 + $0x64] sm:$0xf]  ;;  %v842_v49 = vld [vmem:[%s1554_s20 + $0x68] sm:$0xf] }
 0x16d   : >> { %839 = vst [vmem:[%s1550_s15 + $0x60] sm:$0xf] %v838_v47  ;;  %841 = vst [vmem:[%s1550_s15 + $0x64] sm:$0xf] %v840_v48  ;;  %v844_v50 = vld [vmem:[%s1554_s20 + $0x6c] sm:$0xf] }
 0x16e   : >> { %843 = vst [vmem:[%s1550_s15 + $0x68] sm:$0xf] %v842_v49  ;;  %v846_v51 = vld [vmem:[%s1554_s20 + $0x70] sm:$0xf]  ;;  %v848_v52 = vld [vmem:[%s1554_s20 + $0x74] sm:$0xf] }
 0x16f   : >> { %845 = vst [vmem:[%s1550_s15 + $0x6c] sm:$0xf] %v844_v50  ;;  %847 = vst [vmem:[%s1550_s15 + $0x70] sm:$0xf] %v846_v51  ;;  %v850_v53 = vld [vmem:[%s1554_s20 + $0x78] sm:$0xf] }
 0x170   : >> { %849 = vst [vmem:[%s1550_s15 + $0x74] sm:$0xf] %v848_v52  ;;  %v852_v54 = vld [vmem:[%s1554_s20 + $0x7c] sm:$0xf]  ;;  %851 = vst [vmem:[%s1550_s15 + $0x78] sm:$0xf] %v850_v53 }
 0x171   : >> { %853 = vst [vmem:[%s1550_s15 + $0x7c] sm:$0xf] %v852_v54  ;;  %s2009_s23 = smov (%p855_p2, %s854_s23), 0  ;;  %s784_s28 = sadd.s32 1, %s1562_s28  }
 0x172   : >> { %s1201_s29 = sshll.u32 %s2009_s23, 7  ;;  %p783_p3 = scmp.ge.s32.totalorder %s784_s28, %s1863_s25 }
 0x173   : >> { %s859_s20 = scalar_lea.vmem %s1760_s12, %s1201_s29 [#allocation6]   ;;  %s860_s15 = scalar_lea.vmem %s1857_s18, %s1201_s29  }
 0x174   : >> { %s2002_s27 = smov %s2009_s23  ;;  %786 = sbr.rel (!%p783_p3) target bundleno = 348 (0x15c), region = 127 }
 0x17b PF: > { %s1967_s30 = sand.u32 31, %s2007_s10   ;;  %s1244_s4 = sshll.u32 %s1863_s25, 7 }
 0x17c   : > { %s865_s24 = scalar_lea.vmem %s1760_s12, %s1244_s4 [#allocation6]   ;;  %s867_s21 = scalar_lea.vmem %s1857_s18, %s1244_s4  }
 0x17d   : > { %p1206_p5 = scmp.le.s32.totalorder %s1967_s30, 0 }
 0x17e   : > { %s1564_s26 = smov (!%p1206_p5), %s867_s21   ;;  %s1568_s5 = smov (!%p1206_p5), %s865_s24  }
 0x17f   : > { %1069 = sbr.rel (%p1206_p5) target bundleno = 400 (0x190), region = 132  ;;  %s1572_s6 = smov (!%p1206_p5), 0  }
 0x180   : > { %s1576_s7 = smov (!%p1206_p5), 0  }
 0x186 LB: >> { %v877_v55 = vld [vmem:[%s1570_s5] sm:$0xf]  ;;  %s879_s8 = sadd.s32 1, %s1574_s6  ;;  %s871_s7 = sadd.s32 1, %s1578_s7   ;;  %s1578_s7 = sphi %s1576_s7, %s871_s7   ;;  %s1574_s6 = sphi %s1572_s6, %s1573_s6   ;;  %s1570_s5 = sphi %s1568_s5, %s884_s5   ;;  %s1566_s26 = sphi %s1564_s26, %s885_s26  }
 0x187   : >> { %878 = vst [vmem:[%s1566_s26] sm:$0xf] %v877_v55  ;;  %p880_p8 = scmp.ge.s32.totalorder %s879_s8, %s1967_s30  ;;  %p870_p10 = scmp.ge.s32.totalorder %s871_s7, %s1967_s30 }
 0x189   : >> { %s2011_s8 = smov (%p880_p8, %s879_s8), 0  ;;  %873 = sbr.rel (!%p870_p10) target bundleno = 390 (0x186), region = 138 }
 0x18a   : >> { %s1207_s9 = sshll.u32 %s2011_s8, 2  ;;  %s1573_s6 = smov %s2011_s8  }
 0x18b   : >> { %s884_s5 = scalar_lea.vmem %s865_s24, %s1207_s9 [#allocation6]   ;;  %s885_s26 = scalar_lea.vmem %s867_s21, %s1207_s9  }
 0x190 PF: > { %p12_p11 = scmp.ge.s32.totalorder %s1620_s16, 8   ;;  %s2003_s12 = smov %s1542_s13 }
 0x191   : > { %s2004_s13 = smov %s1628_s19  ;;  %s2005_s14 = smov %s1620_s16 }
 0x192   :  { %14 = sbr.rel (!%p12_p11) target bundleno = 3 (0x3), region = 149 }
 0x199   :  { %1008 = vsyncpa [#allocation3], 1 }
 0x19a   :  { %1010 = vsyncpa [#allocation3 + $0x1], 1 }
 0x19b   :  { %1011 = vsyncpa [#allocation5], 1 }

// kernel: cnn_forward.5
= control target key start
LH: loop header
LB: loop body
LE: loop exit
PB: predicated region body
PF: predicated region fallthrough
CT: control target
= control target key end

     0   :  { %s2193_s12 = smov 0   ;;  %s2195_s13 = smov 0   ;;  %s2619_s0 = inlined_call_operand.vmem [shape: bf16[1152,288], index: 0, kind: input, shape index: {}]   ;;  %s2620_s1 = inlined_call_operand.vmem [shape: bf16[288,64], index: 1, kind: input, shape index: {}]   ;;  %s2621_s2 = inlined_call_operand.vmem [shape: f32[1,64], index: 2, kind: input, shape index: {}]   ;;  %s2622_s3 = inlined_call_operand.vmem [shape: bf16[1152,64], index: 3, kind: output, shape index: {}]  }
   0x1   :  { %s2197_s14 = smov 0  }
   0x2 LB: > { %s2206_s15 = sadd.s32 4294967295, %s2139_s14   ;;  %s2208_s16 = sadd.s32 1, %s2139_s14   ;;  %s2139_s14 = sphi %s2197_s14, %s2629_s14   ;;  %s2135_s13 = sphi %s2195_s13, %s2628_s13   ;;  %s2131_s12 = sphi %s2193_s12, %s2627_s12  }
   0x3   : > { %s85_s17 = ssub.s32 %s2139_s14, %s2208_s16  ;;  %s88_s18 = sadd.s32 1, %s2135_s13 }
   0x4   : > { %p86_p0 = scmp.eq.s32.totalorder %s85_s17, 0  ;;  %p98_p1 = scmp.ne.s32.totalorder %s2135_s13, %s2131_s12 }
   0x5   : > { %p99_p2 = scmp.eq.s32.totalorder %s2206_s15, 4  ;;  %p1561_p3 = scmp.ge.s32.totalorder %s2139_s14, 1 }
   0x6   : > { %s2216_s19 = scalar_select %p86_p0, %s2135_s13, %s88_s18  }
   0x7   : > { %p2218_p4 = por %p99_p2, %p98_p1  ;;  %p149_p5 = scmp.lt.s32.totalorder %s2139_s14, 6 }
   0x9   : > { %p150_p6 = pnand %p1561_p3, %p149_p5 }
   0xa   : > { %v2003_v0 = vld [vmem:[%s2620_s1 + $0x40] sm:$0xff] (!%p150_p6)   ;;  %s2226_s23 = sshll.u32 (!%p150_p6), %s2206_s15, 5  ;;  %v2005_v2 = vld [vmem:[%s2620_s1 + $0x48] sm:$0xff] (!%p150_p6)   ;;  %v2007_v4 = vld [vmem:[%s2620_s1 + $0x50] sm:$0xff] (!%p150_p6)   ;;  %vm656_vm0 = vcmask (!%p150_p6), 261120   ;;  %s175_s25 = sand.u32 (!%p150_p6), 1, %s2131_s12  }
   0xb   : > { %153 = sbr.rel (%p150_p6) target bundleno = 427 (0x1ab), region = 32  ;;  %v2004_v1 = vld [vmem:[%s2620_s1] sm:$0xff] (!%p150_p6)   ;;  %1732 = vmatprep.subr.bf16.mxu0 (!%p150_p6), %v2003_v0  ;;  %1898 = vmatprep.subr.bf16.mxu1 (!%p150_p6), %v2003_v0  ;;  %p184_p7 = scmp.lt.s32.totalorder (!%p150_p6), %s2226_s23, 143  ;;  %v2006_v3 = vld [vmem:[%s2620_s1 + $0x8] sm:$0xff] (!%p150_p6)   ;;  %v2008_v5 = vld [vmem:[%s2620_s1 + $0x10] sm:$0xff] (!%p150_p6)   ;;  %vm1187_vm1 = vcmask (!%p150_p6), 519168  }
   0xc   : > { %1733 = vmatpush3.bf16.msra.mxu0 (!%p150_p6), %v2004_v1  ;;  %1906 = vmatpush3.bf16.msra.mxu1 (!%p150_p6), %v2004_v1  ;;  %v2009_v6 = vld [vmem:[%s2620_s1 + $0x58] sm:$0xff] (!%p150_p6)   ;;  %v2011_v8 = vld [vmem:[%s2620_s1 + $0x60] sm:$0xff] (!%p150_p6)   ;;  %v2013_v10 = vld [vmem:[%s2620_s1 + $0x68] sm:$0xff] (!%p150_p6)   ;;  %s1562_s26 = sshll.u32 (!%p150_p6), %s175_s25, 7 }
   0xd   : > { %1734 = vmatprep.subr.bf16.mxu0 (!%p150_p6), %v2005_v2  ;;  %1899 = vmatprep.subr.bf16.mxu1 (!%p150_p6), %v2005_v2  ;;  %v2010_v7 = vld [vmem:[%s2620_s1 + $0x18] sm:$0xff] (!%p150_p6)   ;;  %v2012_v9 = vld [vmem:[%s2620_s1 + $0x20] sm:$0xff] (!%p150_p6)   ;;  %v2014_v13 = vld [vmem:[%s2620_s1 + $0x28] sm:$0xff] (!%p150_p6)   ;;  %s2376_s12 = scalar_lea.vmem (!%p150_p6), [#allocation2], %s1562_s26  }
   0xe   : > { %v2015_v14 = vld [vmem:[%s2620_s1 + $0x70] sm:$0xff] (!%p150_p6)   ;;  %v2017_v16 = vld [vmem:[%s2620_s1 + $0x78] sm:$0xff] (!%p150_p6)   ;;  %v2025_v18 = vld [vmem:[%s2620_s1 + $0x80] sm:$0xff] (!%p150_p6)  }
   0xf   : > { %v2016_v15 = vld [vmem:[%s2620_s1 + $0x30] sm:$0xff] (!%p150_p6)   ;;  %v2018_v17 = vld [vmem:[%s2620_s1 + $0x38] sm:$0xff] (!%p150_p6)   ;;  %v2038_v23 = vld [vmem:[%s2620_s1 + $0x88] sm:$0xff] (!%p150_p6)  }
  0x10   : > { %1735 = vmatpush3.bf16.msra.mxu0 (!%p150_p6), %v2006_v3  ;;  %1907 = vmatpush3.bf16.msra.mxu1 (!%p150_p6), %v2006_v3 }
  0x11   : > { %1736 = vmatprep.subr.bf16.mxu0 (!%p150_p6), %v2007_v4  ;;  %1900 = vmatprep.subr.bf16.mxu1 (!%p150_p6), %v2007_v4 }
  0x12   : > { %s185_s5 = scalar_select %p184_p7, %s2226_s23, 143 }
  0x13   : > { %s1228_s27 = ssub.s32 (%p2218_p4), 144, %s2226_s23  ;;  %s1729_s28 = sshll.u32 (%p2218_p4), %s2206_s15, 7 }
  0x14   : > { %s1914_s10 = smul.u32 12, %s185_s5  ;;  %1737 = vmatpush3.bf16.msra.mxu0 %v2008_v5  ;;  %1908 = vmatpush3.bf16.msra.mxu1 %v2008_v5  ;;  %p1229_p8 = scmp.lt.s32.totalorder (%p2218_p4), %s1228_s27, 32 }
  0x15   : > { %1738 = vmatprep.subr.bf16.mxu0 %v2009_v6  ;;  %1901 = vmatprep.subr.bf16.mxu1 %v2009_v6  ;;  %s2491_s4 = scalar_lea.vmem (%p2218_p4), %s2622_s3, %s1729_s28  }
  0x16   : > { %s2257_s24 = scalar_lea.vmem %s2619_s0, %s1914_s10 }
  0x17   : > { %v2021_v11 = vld [vmem:[%s2257_s24 + $0x4] ss:$12 sps:$4 sm:$0xff]   ;;  %v2019_v19 = vld [vmem:[%s2257_s24] ss:$12 sps:$4 sm:$0xff]   ;;  %v2026_v21 = vld [vmem:[%s2257_s24 + $0x1c] ss:$12 sps:$4 sm:$0xff]  }
  0x18   : > { %1739 = vmatpush3.bf16.msra.mxu0 %v2010_v7  ;;  %1909 = vmatpush3.bf16.msra.mxu1 %v2010_v7  ;;  %v2024_v12 = vld [vmem:[%s2257_s24 + $0x124] ss:$12 sps:$4 sm:$0xff]   ;;  %v2022_v20 = vld [vmem:[%s2257_s24 + $0x120] ss:$12 sps:$4 sm:$0xff]   ;;  %v2028_v22 = vld [vmem:[%s2257_s24 + $0x13c] ss:$12 sps:$4 sm:$0xff]  }
  0x19   : > { %1740 = vmatprep.subr.bf16.mxu0 %v2011_v8  ;;  %1902 = vmatprep.subr.bf16.mxu1 %v2011_v8  ;;  %v2030_v24 = vld [vmem:[%s2257_s24 + $0x18] ss:$12 sps:$4 sm:$0xff]   ;;  %v2032_v26 = vld [vmem:[%s2257_s24 + $0x34] ss:$12 sps:$4 sm:$0xff]   ;;  %v2036_v28 = vld [vmem:[%s2257_s24 + $0x30] ss:$12 sps:$4 sm:$0xff]  }
  0x1a   : > { %737 = vmatprep.mubr.bf16.mxu0 %v2021_v11  ;;  %833 = vmatprep.mubr.bf16.mxu1 %v2024_v12  ;;  %v2031_v25 = vld [vmem:[%s2257_s24 + $0x138] ss:$12 sps:$4 sm:$0xff]   ;;  %v2034_v27 = vld [vmem:[%s2257_s24 + $0x154] ss:$12 sps:$4 sm:$0xff]   ;;  %v2037_v29 = vld [vmem:[%s2257_s24 + $0x150] ss:$12 sps:$4 sm:$0xff]  }
  0x1b   : > { %v2039_v30 = vld [vmem:[%s2257_s24 + $0x4c] ss:$12 sps:$4 sm:$0xff]   ;;  %v2043_v32 = vld [vmem:[%s2257_s24 + $0x48] ss:$12 sps:$4 sm:$0xff]   ;;  %v2045_v34 = vld [vmem:[%s2257_s24 + $0x64] ss:$12 sps:$4 sm:$0xff]  }
  0x1c   : > { %1741 = vmatpush3.bf16.msra.mxu0 %v2012_v9  ;;  %1910 = vmatpush3.bf16.msra.mxu1 %v2012_v9  ;;  %v2041_v31 = vld [vmem:[%s2257_s24 + $0x16c] ss:$12 sps:$4 sm:$0xff]   ;;  %v2044_v33 = vld [vmem:[%s2257_s24 + $0x168] ss:$12 sps:$4 sm:$0xff]   ;;  %v2054_v41 = vld [vmem:[%s2257_s24 + $0x50] ss:$12 sps:$4 sm:$0xff]  }
  0x1d   : > { %1742 = vmatprep.subr.bf16.mxu0 %v2013_v10  ;;  %1903 = vmatprep.subr.bf16.mxu1 %v2013_v10  ;;  %v2047_v35 = vld [vmem:[%s2257_s24 + $0x8] ss:$12 sps:$4 sm:$0xff]   ;;  %v2048_v36 = vld [vmem:[%s2257_s24 + $0x60] ss:$12 sps:$4 sm:$0xff]   ;;  %v2052_v39 = vld [vmem:[%s2257_s24 + $0x38] ss:$12 sps:$4 sm:$0xff]  }
  0x1e   : > { %v2049_v37 = vld [vmem:[%s2257_s24 + $0x20] ss:$12 sps:$4 sm:$0xff]   ;;  %v2050_v38 = vld [vmem:[%s2257_s24 + $0x7c] ss:$12 sps:$4 sm:$0xff]   ;;  %v2053_v40 = vld [vmem:[%s2257_s24 + $0x78] ss:$12 sps:$4 sm:$0xff]  }
  0x1f   : > { %v2055_v42 = vld [vmem:[%s2257_s24 + $0x94] ss:$12 sps:$4 sm:$0xff]   ;;  %v2058_v44 = vld [vmem:[%s2257_s24 + $0x90] ss:$12 sps:$4 sm:$0xff]   ;;  %v2060_v46 = vld [vmem:[%s2257_s24 + $0xac] ss:$12 sps:$4 sm:$0xff]  }
  0x20   : > { %1743 = vmatpush3.bf16.msra.mxu0 %v2014_v13  ;;  %1911 = vmatpush3.bf16.msra.mxu1 %v2014_v13  ;;  %v2057_v43 = vld [vmem:[%s2257_s24 + $0x68] ss:$12 sps:$4 sm:$0xff]   ;;  %v2059_v45 = vld [vmem:[%s2257_s24 + $0x80] ss:$12 sps:$4 sm:$0xff]   ;;  %v2062_v47 = vld [vmem:[%s2257_s24 + $0x98] ss:$12 sps:$4 sm:$0xff]  }
  0x21   : > { %1744 = vmatprep.subr.bf16.mxu0 %v2015_v14  ;;  %1904 = vmatprep.subr.bf16.mxu1 %v2015_v14  ;;  %v2063_v48 = vld [vmem:[%s2257_s24 + $0xa8] ss:$12 sps:$4 sm:$0xff]   ;;  %v2064_v49 = vld [vmem:[%s2257_s24 + $0xb0] ss:$12 sps:$4 sm:$0xff]   ;;  %v2068_v52 = vld [vmem:[%s2257_s24 + $0xc0] ss:$12 sps:$4 sm:$0xff]  }
  0x22   : > { %v2065_v50 = vld [vmem:[%s2257_s24 + $0xc4] ss:$12 sps:$4 sm:$0xff]   ;;  %v2067_v51 = vld [vmem:[%s2257_s24 + $0xc8] ss:$12 sps:$4 sm:$0xff]   ;;  %v2069_v53 = vld [vmem:[%s2257_s24 + $0xe0] ss:$12 sps:$4 sm:$0xff]  }
  0x23   : > { %v2070_v54 = vld [vmem:[%s2257_s24 + $0xdc] ss:$12 sps:$4 sm:$0xff]   ;;  %v2072_v55 = vld [vmem:[%s2257_s24 + $0xf8] ss:$12 sps:$4 sm:$0xff]   ;;  %v2075_v58 = vld [vmem:[%s2257_s24 + $0xf4] ss:$12 sps:$4 sm:$0xff]  }
  0x24   : > { %1745 = vmatpush3.bf16.msra.mxu0 %v2016_v15  ;;  %1912 = vmatpush3.bf16.msra.mxu1 %v2016_v15  ;;  %v2073_v56 = vld [vmem:[%s2257_s24 + $0xd8] ss:$12 sps:$4 sm:$0xff]   ;;  %v2074_v57 = vld [vmem:[%s2257_s24 + $0x110] ss:$12 sps:$4 sm:$0xff]   ;;  %v2077_v59 = vld [vmem:[%s2257_s24 + $0x128] ss:$12 sps:$4 sm:$0xff]  }
  0x25   : > { %1746 = vmatprep.subr.bf16.mxu0 %v2017_v16  ;;  %1905 = vmatprep.subr.bf16.mxu1 %v2017_v16  ;;  %v2078_v60 = vld [vmem:[%s2257_s24 + $0xf0] ss:$12 sps:$4 sm:$0xff]   ;;  %v2079_v61 = vld [vmem:[%s2257_s24 + $0x140] ss:$12 sps:$4 sm:$0xff]   ;;  %v2082_v63 = vld [vmem:[%s2257_s24 + $0x158] ss:$12 sps:$4 sm:$0xff]  }
  0x26   : > { %v2080_v62 = vld [vmem:[%s2257_s24 + $0x10c] ss:$12 sps:$4 sm:$0xff]   ;;  %v2083_v0 = vld [vmem:[%s2257_s24 + $0x108] ss:$12 sps:$4 sm:$0xff]   ;;  %v2084_v1 = vld [vmem:[%s2257_s24 + $0x170] ss:$12 sps:$4 sm:$0xff]  }
  0x28   : > { %1747 = vmatpush3.bf16.msra.mxu0 %v2018_v17  ;;  %1913 = vmatpush3.bf16.msra.mxu1 %v2018_v17 }
  0x29   : > { %1862 = vmatprep.subr.bf16.mxu1 %v2025_v18 }
  0x2b   : > { %738 = vmatmul.mubr.bf16.vlgmr.msra.gmra.mrb[0].mxu0 %v2019_v19  ;;  %834 = vmatmul.mubr.bf16.vlgmr.msra.gmra.mrb[0].mxu1 %v2022_v20 }
  0x2c   : > { %1863 = vmatpush3.bf16.msra.mxu1 %v2025_v18  ;;  %745 = vmatprep.mubr.bf16.mxu0 %v2026_v21 }
  0x2d   : > { %841 = vmatprep.mubr.bf16.mxu1 %v2028_v22  ;;  %1864 = vmatprep.subr.bf16.mxu1 %v2038_v23 }
  0x30   : > { %1865 = vmatpush3.bf16.msra.mxu1 %v2038_v23 }
  0x33   : > { %746 = vmatmul.mubr.bf16.gmra.mrb[4].mxu0 %v2030_v24  ;;  %842 = vmatmul.mubr.bf16.gmra.mrb[4].mxu1 %v2031_v25 }
  0x34   : > { %753 = vmatprep.mubr.bf16.mxu0 %v2032_v26  ;;  %849 = vmatprep.mubr.bf16.mxu1 %v2034_v27 }
  0x3b   : > { %754 = vmatmul.mubr.bf16.gmra.mrb[8].mxu0 %v2036_v28  ;;  %850 = vmatmul.mubr.bf16.gmra.mrb[8].mxu1 %v2037_v29 }
  0x3c   : > { %761 = vmatprep.mubr.bf16.mxu0 %v2039_v30  ;;  %857 = vmatprep.mubr.bf16.mxu1 %v2041_v31 }
  0x43   : > { %762 = vmatmul.mubr.bf16.gmra.mrb[12].mxu0 %v2043_v32  ;;  %858 = vmatmul.mubr.bf16.gmra.mrb[12].mxu1 %v2044_v33 }
  0x44   : > { %769 = vmatprep.mubr.bf16.mxu0 %v2045_v34  ;;  %1866 = vmatprep.mubr.msk.bf16.mxu1 %vm656_vm0, %v2047_v35 }
  0x4b   : > { %770 = vmatmul.mubr.bf16.gmra.mrb[16].mxu0 %v2048_v36  ;;  %1867 = vmatmul.mubr.msk.bf16.vlgmr.msra.gmra.mrb[16].mxu1 %vm656_vm0, %v2049_v37 }
  0x4c   : > { %777 = vmatprep.mubr.bf16.mxu0 %v2050_v38  ;;  %1870 = vmatprep.mubr.msk.bf16.mxu1 %vm656_vm0, %v2052_v39 }
  0x53   : > { %778 = vmatmul.mubr.bf16.gmra.mrb[20].mxu0 %v2053_v40  ;;  %1871 = vmatmul.mubr.msk.bf16.gmra.mrb[20].mxu1 %vm656_vm0, %v2054_v41 }
  0x54   : > { %785 = vmatprep.mubr.bf16.mxu0 %v2055_v42  ;;  %1874 = vmatprep.mubr.msk.bf16.mxu1 %vm656_vm0, %v2057_v43 }
  0x5b   : > { %786 = vmatmul.mubr.bf16.gmra.mrb[24].mxu0 %v2058_v44  ;;  %1875 = vmatmul.mubr.msk.bf16.gmra.mrb[24].mxu1 %vm656_vm0, %v2059_v45 }
  0x5c   : > { %793 = vmatprep.mubr.bf16.mxu0 %v2060_v46  ;;  %1878 = vmatprep.mubr.msk.bf16.mxu1 %vm656_vm0, %v2062_v47 }
  0x63   : > { %794 = vmatmul.mubr.bf16.gmra.mrb[28].mxu0 %v2063_v48  ;;  %1879 = vmatmul.mubr.msk.bf16.gmra.mrb[28].mxu1 %vm656_vm0, %v2064_v49 }
  0x64   : > { %801 = vmatprep.mubr.bf16.mxu0 %v2065_v50  ;;  %1882 = vmatprep.mubr.msk.bf16.mxu1 %vm656_vm0, %v2067_v51  ;;  %v2369_v50 = vld [vmem:[%s2621_s2] ss:$0 sm:$0xff] }
  0x6b   : > { %802 = vmatmul.mubr.bf16.gmra.mrb[32].mxu0 %v2068_v52  ;;  %1883 = vmatmul.mubr.msk.bf16.gmra.mrb[32].mxu1 %vm656_vm0, %v2069_v53 }
  0x6c   : > { %809 = vmatprep.mubr.bf16.mxu0 %v2070_v54  ;;  %1886 = vmatprep.mubr.msk.bf16.mxu1 %vm656_vm0, %v2072_v55 }
  0x73   : > { %810 = vmatmul.mubr.bf16.gmra.mrb[36].mxu0 %v2073_v56  ;;  %1887 = vmatmul.mubr.msk.bf16.gmra.mrb[36].mxu1 %vm656_vm0, %v2074_v57 }
  0x74   : > { %817 = vmatprep.mubr.bf16.mxu0 %v2075_v58  ;;  %1890 = vmatprep.mubr.msk.bf16.mxu1 %vm656_vm0, %v2077_v59 }
  0x7b   : > { %818 = vmatmul.mubr.bf16.gmra.mrb[40].mxu0 %v2078_v60  ;;  %1891 = vmatmul.mubr.msk.bf16.gmra.mrb[40].mxu1 %vm656_vm0, %v2079_v61 }
  0x7c   : > { %825 = vmatprep.mubr.bf16.mxu0 %v2080_v62  ;;  %1894 = vmatprep.mubr.msk.bf16.mxu1 %vm656_vm0, %v2082_v63 }
  0x83   : > { %826 = vmatmul.mubr.bf16.gmra.mrb[44].mxu0 %v2083_v0  ;;  %1895 = vmatmul.mubr.msk.bf16.gmra.mrb[44].mxu1 %vm656_vm0, %v2084_v1 }
  0xfe   : > { %v1748_v2 = vpop.f32.mrb[0].mxu0  ;;  %v1820_v3 = vpop.f32.mrb[0].mxu1 }
  0xff   : > { %v1749_v4 = vpop.f32.mrb[1].mxu0  ;;  %v1821_v5 = vpop.f32.mrb[1].mxu1 }
 0x100   : > { %v1750_v6 = vadd.f32 %v1749_v4, %v1748_v2  ;;  %v1751_v7 = vpop.f32.mrb[2].mxu0  ;;  %v2350_v8 = vadd.f32 %v1821_v5, %v1820_v3  ;;  %v1823_v9 = vpop.f32.mrb[2].mxu1 }
 0x101   : > { %v1752_v10 = vpop.f32.mrb[3].mxu0  ;;  %v1824_v11 = vpop.f32.mrb[3].mxu1 }
 0x102   : > { %v1753_v12 = vadd.f32 %v1752_v10, %v1751_v7  ;;  %v2352_v13 = vadd.f32 %v1824_v11, %v1823_v9  ;;  %v740_v54 = vadd.f32 %v1750_v6, %v2369_v50 }
 0x104   : > { %v743_v63 = vadd.f32 %v1753_v12, %v2369_v50 }
 0x106   : > { %v1754_v14 = vpop.f32.mrb[4].mxu0  ;;  %v1826_v15 = vpop.f32.mrb[4].mxu1 }
 0x107   : > { %v1755_v16 = vpop.f32.mrb[5].mxu0  ;;  %v1827_v17 = vpop.f32.mrb[5].mxu1 }
 0x108   : > { %v1756_v18 = vadd.f32 %v1755_v16, %v1754_v14  ;;  %v1757_v19 = vpop.f32.mrb[6].mxu0  ;;  %v2354_v20 = vadd.f32 %v1827_v17, %v1826_v15  ;;  %v1829_v21 = vpop.f32.mrb[6].mxu1 }
 0x109   : > { %v1758_v22 = vpop.f32.mrb[7].mxu0  ;;  %v1830_v23 = vpop.f32.mrb[7].mxu1 }
 0x10a   : > { %v1759_v24 = vadd.f32 %v1758_v22, %v1757_v19  ;;  %v2356_v25 = vadd.f32 %v1830_v23, %v1829_v21  ;;  %v748_v51 = vadd.f32 %v1756_v18, %v2369_v50 }
 0x10c   : > { %v751_v58 = vadd.f32 %v1759_v24, %v2369_v50 }
 0x10e   : > { %v1760_v26 = vpop.f32.mrb[8].mxu0  ;;  %v1832_v27 = vpop.f32.mrb[8].mxu1 }
 0x10f   : > { %v1761_v28 = vpop.f32.mrb[9].mxu0  ;;  %v1833_v29 = vpop.f32.mrb[9].mxu1 }
 0x110   : > { %v1762_v30 = vadd.f32 %v1761_v28, %v1760_v26  ;;  %v1763_v31 = vpop.f32.mrb[10].mxu0  ;;  %v2358_v32 = vadd.f32 %v1833_v29, %v1832_v27  ;;  %v1835_v33 = vpop.f32.mrb[10].mxu1 }
 0x111   : > { %v1764_v34 = vpop.f32.mrb[11].mxu0  ;;  %v1836_v35 = vpop.f32.mrb[11].mxu1 }
 0x112   : > { %v1765_v36 = vadd.f32 %v1764_v34, %v1763_v31  ;;  %v2360_v37 = vadd.f32 %v1836_v35, %v1835_v33  ;;  %v756_v18 = vadd.f32 %v1762_v30, %v2369_v50 }
 0x114   : > { %v759_v29 = vadd.f32 %v1765_v36, %v2369_v50 }
 0x116   : > { %v1766_v38 = vpop.f32.mrb[12].mxu0  ;;  %v1838_v39 = vpop.f32.mrb[12].mxu1 }
 0x117   : > { %v1767_v40 = vpop.f32.mrb[13].mxu0  ;;  %v1839_v41 = vpop.f32.mrb[13].mxu1 }
 0x118   : > { %v1768_v42 = vadd.f32 %v1767_v40, %v1766_v38  ;;  %v1769_v43 = vpop.f32.mrb[14].mxu0  ;;  %v2362_v44 = vadd.f32 %v1839_v41, %v1838_v39  ;;  %v1841_v45 = vpop.f32.mrb[14].mxu1 }
 0x119   : > { %v1770_v46 = vpop.f32.mrb[15].mxu0  ;;  %v1842_v47 = vpop.f32.mrb[15].mxu1 }
 0x11a   : > { %v1771_v48 = vadd.f32 %v1770_v46, %v1769_v43  ;;  %v2364_v49 = vadd.f32 %v1842_v47, %v1841_v45  ;;  %v764_v14 = vadd.f32 %v1768_v42, %v2369_v50 }
 0x11c   : > { %v767_v23 = vadd.f32 %v1771_v48, %v2369_v50 }
 0x11e   : > { %v1772_v52 = vpop.f32.mrb[16].mxu0  ;;  %v1868_v53 = vpop.f32.mrb[16].mxu1 }
 0x11f   : > { %v909_v55 = vadd.f32 %v1868_v53, %v748_v51  ;;  %v1773_v56 = vpop.f32.mrb[17].mxu0  ;;  %v900_v57 = vpop.f32.mrb[17].mxu1 }
 0x120   : > { %v1774_v59 = vadd.f32 %v1773_v56, %v1772_v52  ;;  %v901_v60 = vadd.f32 %v900_v57, %v740_v54  ;;  %v1775_v61 = vpop.f32.mrb[18].mxu0  ;;  %v1869_v62 = vpop.f32.mrb[18].mxu1 }
 0x121   : > { %v1029_v0 = vmax.f32 %v909_v55, 0.0  ;;  %v912_v1 = vadd.f32 %v1869_v62, %v751_v58  ;;  %v1776_v2 = vpop.f32.mrb[19].mxu0  ;;  %v903_v3 = vpop.f32.mrb[19].mxu1 }
 0x122   : > { %v1027_v4 = vmax.f32 %v901_v60, 0.0  ;;  %v1777_v5 = vadd.f32 %v1776_v2, %v1775_v61  ;;  %v904_v6 = vadd.f32 %v903_v3, %v743_v63  ;;  %v772_v51 = vadd.f32 %v1774_v59, %v2369_v50 }
 0x123   : > { %v1699_v7 = vpack.c.bf16 %v1029_v0, %v1029_v0  ;;  %v1030_v9 = vmax.f32 %v912_v1, 0.0 }
 0x124   : > { %v1697_v10 = vpack.c.bf16 %v1027_v4, %v1027_v4  ;;  %v1028_v11 = vmax.f32 %v904_v6, 0.0  ;;  %v775_v61 = vadd.f32 %v1777_v5, %v2369_v50 }
 0x125   : > { %1190 = vst.msk [vmem:[%s2376_s12 + $0x8] sm:$0xf] %vm1187_vm1, %v1699_v7  ;;  %v1700_v12 = vpack.c.bf16 %v1030_v9, %v1030_v9 }
 0x126   : > { %1188 = vst.msk [vmem:[%s2376_s12] sm:$0xf] %vm1187_vm1, %v1697_v10  ;;  %v1698_v15 = vpack.c.bf16 %v1028_v11, %v1028_v11  ;;  %v1778_v16 = vpop.f32.mrb[20].mxu0  ;;  %v1872_v17 = vpop.f32.mrb[20].mxu1 }
 0x127   : > { %1191 = vst.msk [vmem:[%s2376_s12 + $0xc] sm:$0xf] %vm1187_vm1, %v1700_v12  ;;  %v925_v19 = vadd.f32 %v1872_v17, %v764_v14  ;;  %v1779_v21 = vpop.f32.mrb[21].mxu0  ;;  %v916_v22 = vpop.f32.mrb[21].mxu1 }
 0x128   : > { %1189 = vst.msk [vmem:[%s2376_s12 + $0x4] sm:$0xf] %vm1187_vm1, %v1698_v15  ;;  %v1780_v24 = vadd.f32 %v1779_v21, %v1778_v16  ;;  %v917_v26 = vadd.f32 %v916_v22, %v756_v18  ;;  %v1781_v27 = vpop.f32.mrb[22].mxu0  ;;  %v1873_v28 = vpop.f32.mrb[22].mxu1 }
 0x129   : > { %v1033_v31 = vmax.f32 %v925_v19, 0.0  ;;  %v928_v33 = vadd.f32 %v1873_v28, %v767_v23  ;;  %v1782_v30 = vpop.f32.mrb[23].mxu0  ;;  %v919_v34 = vpop.f32.mrb[23].mxu1 }
 0x12a   : > { %v1031_v35 = vmax.f32 %v917_v26, 0.0  ;;  %v1783_v38 = vadd.f32 %v1782_v30, %v1781_v27  ;;  %v920_v39 = vadd.f32 %v919_v34, %v759_v29  ;;  %v780_v46 = vadd.f32 %v1780_v24, %v2369_v50 }
 0x12b   : > { %v1703_v40 = vpack.c.bf16 %v1033_v31, %v1033_v31  ;;  %v1034_v41 = vmax.f32 %v928_v33, 0.0 }
 0x12c   : > { %v1701_v42 = vpack.c.bf16 %v1031_v35, %v1031_v35  ;;  %v1032_v43 = vmax.f32 %v920_v39, 0.0  ;;  %v783_v55 = vadd.f32 %v1783_v38, %v2369_v50 }
 0x12d   : > { %1194 = vst.msk [vmem:[%s2376_s12 + $0x18] sm:$0xf] %vm1187_vm1, %v1703_v40  ;;  %v1704_v45 = vpack.c.bf16 %v1034_v41, %v1034_v41 }
 0x12e   : > { %1192 = vst.msk [vmem:[%s2376_s12 + $0x10] sm:$0xf] %vm1187_vm1, %v1701_v42  ;;  %v1702_v36 = vpack.c.bf16 %v1032_v43, %v1032_v43  ;;  %v1784_v47 = vpop.f32.mrb[24].mxu0  ;;  %v1876_v48 = vpop.f32.mrb[24].mxu1 }
 0x12f   : > { %1195 = vst.msk [vmem:[%s2376_s12 + $0x1c] sm:$0xf] %vm1187_vm1, %v1704_v45  ;;  %v941_v52 = vadd.f32 %v1876_v48, %v780_v46  ;;  %v1785_v53 = vpop.f32.mrb[25].mxu0  ;;  %v932_v54 = vpop.f32.mrb[25].mxu1 }
 0x130   : > { %1193 = vst.msk [vmem:[%s2376_s12 + $0x14] sm:$0xf] %vm1187_vm1, %v1702_v36  ;;  %v1786_v56 = vadd.f32 %v1785_v53, %v1784_v47  ;;  %v933_v57 = vadd.f32 %v932_v54, %v772_v51  ;;  %v1787_v58 = vpop.f32.mrb[26].mxu0  ;;  %v1877_v60 = vpop.f32.mrb[26].mxu1 }
 0x131   : > { %v1037_v62 = vmax.f32 %v941_v52, 0.0  ;;  %v944_v63 = vadd.f32 %v1877_v60, %v783_v55  ;;  %v1788_v59 = vpop.f32.mrb[27].mxu0  ;;  %v935_v0 = vpop.f32.mrb[27].mxu1 }
 0x132   : > { %v1035_v1 = vmax.f32 %v933_v57, 0.0  ;;  %v1789_v2 = vadd.f32 %v1788_v59, %v1787_v58  ;;  %v936_v3 = vadd.f32 %v935_v0, %v775_v61  ;;  %v788_v14 = vadd.f32 %v1786_v56, %v2369_v50 }
 0x133   : > { %v1707_v4 = vpack.c.bf16 %v1037_v62, %v1037_v62  ;;  %v1038_v6 = vmax.f32 %v944_v63, 0.0 }
 0x134   : > { %v1705_v7 = vpack.c.bf16 %v1035_v1, %v1035_v1  ;;  %v1036_v9 = vmax.f32 %v936_v3, 0.0  ;;  %v791_v22 = vadd.f32 %v1789_v2, %v2369_v50 }
 0x135   : > { %1198 = vst.msk [vmem:[%s2376_s12 + $0x28] sm:$0xf] %vm1187_vm1, %v1707_v4  ;;  %v1708_v10 = vpack.c.bf16 %v1038_v6, %v1038_v6 }
 0x136   : > { %1196 = vst.msk [vmem:[%s2376_s12 + $0x20] sm:$0xf] %vm1187_vm1, %v1705_v7  ;;  %v1706_v11 = vpack.c.bf16 %v1036_v9, %v1036_v9  ;;  %v1790_v5 = vpop.f32.mrb[28].mxu0  ;;  %v1880_v12 = vpop.f32.mrb[28].mxu1 }
 0x137   : > { %1199 = vst.msk [vmem:[%s2376_s12 + $0x2c] sm:$0xf] %vm1187_vm1, %v1708_v10  ;;  %v1791_v15 = vpop.f32.mrb[29].mxu0  ;;  %v948_v16 = vpop.f32.mrb[29].mxu1 }
 0x138   : > { %1197 = vst.msk [vmem:[%s2376_s12 + $0x24] sm:$0xf] %vm1187_vm1, %v1706_v11  ;;  %v1792_v17 = vadd.f32 %v1791_v15, %v1790_v5  ;;  %v949_v18 = vadd.f32 %v948_v16, %v788_v14  ;;  %v1793_v19 = vpop.f32.mrb[30].mxu0  ;;  %v1881_v21 = vpop.f32.mrb[30].mxu1  ;;  %v844_v14 = vadd.f32 %v2354_v20, %v2369_v50 }
 0x139   : > { %v1794_v23 = vpop.f32.mrb[31].mxu0  ;;  %v951_v24 = vpop.f32.mrb[31].mxu1 }
 0x13a   : > { %v796_v26 = vadd.f32 %v1792_v17, %v2369_v50  ;;  %v1039_v27 = vmax.f32 %v949_v18, 0.0  ;;  %v1795_v28 = vadd.f32 %v1794_v23, %v1793_v19  ;;  %v952_v29 = vadd.f32 %v951_v24, %v791_v22 }
 0x13b   : > { %v836_v19 = vadd.f32 %v2350_v8, %v2369_v50  ;;  %v847_v24 = vadd.f32 %v2356_v25, %v2369_v50  ;;  %v839_v8 = vadd.f32 %v2352_v13, %v2369_v50 }
 0x13c   : > { %v957_v31 = vadd.f32 %v1880_v12, %v796_v26  ;;  %v1709_v33 = vpack.c.bf16 %v1039_v27, %v1039_v27  ;;  %v799_v30 = vadd.f32 %v1795_v28, %v2369_v50  ;;  %v1040_v34 = vmax.f32 %v952_v29, 0.0 }
 0x13e   : > { %v1041_v35 = vmax.f32 %v957_v31, 0.0  ;;  %1200 = vst.msk [vmem:[%s2376_s12 + $0x30] sm:$0xf] %vm1187_vm1, %v1709_v33  ;;  %v960_v38 = vadd.f32 %v1881_v21, %v799_v30  ;;  %v1710_v39 = vpack.c.bf16 %v1040_v34, %v1040_v34  ;;  %v1796_v40 = vpop.f32.mrb[32].mxu0  ;;  %v1884_v41 = vpop.f32.mrb[32].mxu1 }
 0x13f   : > { %v1797_v42 = vpop.f32.mrb[33].mxu0  ;;  %v964_v43 = vpop.f32.mrb[33].mxu1 }
 0x140   : > { %v1711_v45 = vpack.c.bf16 %v1041_v35, %v1041_v35  ;;  %v1042_v46 = vmax.f32 %v960_v38, 0.0  ;;  %1201 = vst.msk [vmem:[%s2376_s12 + $0x34] sm:$0xf] %vm1187_vm1, %v1710_v39  ;;  %v1798_v36 = vadd.f32 %v1797_v42, %v1796_v40  ;;  %v1799_v47 = vpop.f32.mrb[34].mxu0  ;;  %v1885_v48 = vpop.f32.mrb[34].mxu1 }
 0x141   : > { %v1800_v51 = vpop.f32.mrb[35].mxu0  ;;  %v967_v52 = vpop.f32.mrb[35].mxu1 }
 0x142   : > { %1202 = vst.msk [vmem:[%s2376_s12 + $0x38] sm:$0xf] %vm1187_vm1, %v1711_v45  ;;  %v1712_v53 = vpack.c.bf16 %v1042_v46, %v1042_v46  ;;  %v804_v54 = vadd.f32 %v1798_v36, %v2369_v50  ;;  %v1801_v55 = vadd.f32 %v1800_v51, %v1799_v47 }
 0x144   : > { %1203 = vst.msk [vmem:[%s2376_s12 + $0x3c] sm:$0xf] %vm1187_vm1, %v1712_v53  ;;  %v965_v56 = vadd.f32 %v964_v43, %v804_v54  ;;  %v807_v57 = vadd.f32 %v1801_v55, %v2369_v50  ;;  %v852_v55 = vadd.f32 %v2358_v32, %v2369_v50 }
 0x146   : > { %v1043_v58 = vmax.f32 %v965_v56, 0.0  ;;  %v968_v60 = vadd.f32 %v967_v52, %v807_v57  ;;  %v1802_v61 = vpop.f32.mrb[36].mxu0  ;;  %v2424_v62 = vpop.f32.mrb[36].mxu1 }
 0x147   : > { %v1803_v63 = vpop.f32.mrb[37].mxu0  ;;  %v980_v59 = vpop.f32.mrb[37].mxu1 }
 0x148   : > { %v1713_v0 = vpack.c.bf16 %v1043_v58, %v1043_v58  ;;  %v1044_v1 = vmax.f32 %v968_v60, 0.0  ;;  %v1804_v2 = vadd.f32 %v1803_v63, %v1802_v61  ;;  %v1805_v3 = vpop.f32.mrb[38].mxu0  ;;  %v2426_v4 = vpop.f32.mrb[38].mxu1 }
 0x149   : > { %v1806_v6 = vpop.f32.mrb[39].mxu0  ;;  %v983_v7 = vpop.f32.mrb[39].mxu1 }
 0x14a   : > { %1204 = vst.msk [vmem:[%s2376_s12 + $0x40] sm:$0xf] %vm1187_vm1, %v1713_v0  ;;  %v1714_v9 = vpack.c.bf16 %v1044_v1, %v1044_v1  ;;  %v812_v10 = vadd.f32 %v1804_v2, %v2369_v50  ;;  %v1807_v11 = vadd.f32 %v1806_v6, %v1805_v3 }
 0x14c   : > { %1205 = vst.msk [vmem:[%s2376_s12 + $0x44] sm:$0xf] %vm1187_vm1, %v1714_v9  ;;  %v973_v5 = vadd.f32 %v1884_v41, %v812_v10  ;;  %v815_v12 = vadd.f32 %v1807_v11, %v2369_v50 }
 0x14e   : > { %v1045_v15 = vmax.f32 %v973_v5, 0.0  ;;  %v976_v16 = vadd.f32 %v1885_v48, %v815_v12  ;;  %v1808_v17 = vpop.f32.mrb[40].mxu0  ;;  %v1892_v18 = vpop.f32.mrb[40].mxu1  ;;  %v860_v48 = vadd.f32 %v2362_v44, %v2369_v50  ;;  %v863_v44 = vadd.f32 %v2364_v49, %v2369_v50 }
 0x14f   : > { %v1005_v21 = vadd.f32 %v1892_v18, %v844_v14  ;;  %v1809_v22 = vpop.f32.mrb[41].mxu0  ;;  %v996_v23 = vpop.f32.mrb[41].mxu1 }
 0x150   : > { %v1715_v26 = vpack.c.bf16 %v1045_v15, %v1045_v15  ;;  %v1046_v27 = vmax.f32 %v976_v16, 0.0  ;;  %v1810_v28 = vadd.f32 %v1809_v22, %v1808_v17  ;;  %v997_v29 = vadd.f32 %v996_v23, %v836_v19  ;;  %v1811_v20 = vpop.f32.mrb[42].mxu0  ;;  %v1893_v31 = vpop.f32.mrb[42].mxu1 }
 0x151   : > { %v1053_v33 = vmax.f32 %v1005_v21, 0.0  ;;  %v1008_v30 = vadd.f32 %v1893_v31, %v847_v24  ;;  %v1812_v34 = vpop.f32.mrb[43].mxu0  ;;  %v999_v35 = vpop.f32.mrb[43].mxu1 }
 0x152   : > { %1206 = vst.msk [vmem:[%s2376_s12 + $0x48] sm:$0xf] %vm1187_vm1, %v1715_v26  ;;  %v1716_v38 = vpack.c.bf16 %v1046_v27, %v1046_v27  ;;  %v820_v25 = vadd.f32 %v1810_v28, %v2369_v50  ;;  %v1051_v39 = vmax.f32 %v997_v29, 0.0  ;;  %v1813_v40 = vadd.f32 %v1812_v34, %v1811_v20 }
 0x153   : > { %v1723_v41 = vpack.c.bf16 %v1053_v33, %v1053_v33  ;;  %v1054_v42 = vmax.f32 %v1008_v30, 0.0  ;;  %v1000_v43 = vadd.f32 %v999_v35, %v839_v8 }
 0x154   : > { %1207 = vst.msk [vmem:[%s2376_s12 + $0x4c] sm:$0xf] %vm1187_vm1, %v1716_v38  ;;  %v981_v45 = vadd.f32 %v980_v59, %v820_v25  ;;  %v1721_v46 = vpack.c.bf16 %v1051_v39, %v1051_v39  ;;  %v823_v36 = vadd.f32 %v1813_v40, %v2369_v50 }
 0x155   : > { %1214 = vst.msk [vmem:[%s2376_s12 + $0x68] sm:$0xf] %vm1187_vm1, %v1723_v41  ;;  %v1724_v13 = vpack.c.bf16 %v1054_v42, %v1054_v42  ;;  %v1052_v47 = vmax.f32 %v1000_v43, 0.0 }
 0x156   : > { %v1047_v51 = vmax.f32 %v981_v45, 0.0  ;;  %1212 = vst.msk [vmem:[%s2376_s12 + $0x60] sm:$0xf] %vm1187_vm1, %v1721_v46  ;;  %v984_v52 = vadd.f32 %v983_v7, %v823_v36  ;;  %v1814_v53 = vpop.f32.mrb[44].mxu0  ;;  %v1896_v54 = vpop.f32.mrb[44].mxu1  ;;  %v855_v7 = vadd.f32 %v2360_v37, %v2369_v50 }
 0x157   : > { %1215 = vst.msk [vmem:[%s2376_s12 + $0x6c] sm:$0xf] %vm1187_vm1, %v1724_v13  ;;  %v1722_v56 = vpack.c.bf16 %v1052_v47, %v1052_v47  ;;  %v1021_v57 = vadd.f32 %v1896_v54, %v860_v48  ;;  %v1815_v58 = vpop.f32.mrb[45].mxu0  ;;  %v1012_v60 = vpop.f32.mrb[45].mxu1 }
 0x158   : > { %v1717_v61 = vpack.c.bf16 %v1047_v51, %v1047_v51  ;;  %v1048_v63 = vmax.f32 %v984_v52, 0.0  ;;  %v1816_v59 = vadd.f32 %v1815_v58, %v1814_v53  ;;  %v1013_v0 = vadd.f32 %v1012_v60, %v852_v55  ;;  %v1817_v1 = vpop.f32.mrb[46].mxu0  ;;  %v1897_v2 = vpop.f32.mrb[46].mxu1 }
 0x159   : > { %1213 = vst.msk [vmem:[%s2376_s12 + $0x64] sm:$0xf] %vm1187_vm1, %v1722_v56  ;;  %v1057_v32 = vmax.f32 %v1021_v57, 0.0  ;;  %v1024_v3 = vadd.f32 %v1897_v2, %v863_v44  ;;  %v1818_v6 = vpop.f32.mrb[47].mxu0  ;;  %v1015_v9 = vpop.f32.mrb[47].mxu1 }
 0x15a   : > { %1208 = vst.msk [vmem:[%s2376_s12 + $0x50] sm:$0xf] %vm1187_vm1, %v1717_v61  ;;  %v1718_v49 = vpack.c.bf16 %v1048_v63, %v1048_v63  ;;  %v828_v10 = vadd.f32 %v1816_v59, %v2369_v50  ;;  %v1055_v11 = vmax.f32 %v1013_v0, 0.0  ;;  %v1819_v5 = vadd.f32 %v1818_v6, %v1817_v1 }
 0x15b   : > { %v1727_v12 = vpack.c.bf16 %v1057_v32, %v1057_v32  ;;  %v1058_v14 = vmax.f32 %v1024_v3, 0.0  ;;  %v1016_v15 = vadd.f32 %v1015_v9, %v855_v7 }
 0x15c   : > { %1209 = vst.msk [vmem:[%s2376_s12 + $0x54] sm:$0xf] %vm1187_vm1, %v1718_v49  ;;  %v989_v16 = vadd.f32 %v2424_v62, %v828_v10  ;;  %v1725_v37 = vpack.c.bf16 %v1055_v11, %v1055_v11  ;;  %v831_v17 = vadd.f32 %v1819_v5, %v2369_v50 }
 0x15d   : > { %1218 = vst.msk [vmem:[%s2376_s12 + $0x78] sm:$0xf] %vm1187_vm1, %v1727_v12  ;;  %v1728_v18 = vpack.c.bf16 %v1058_v14, %v1058_v14  ;;  %v1056_v19 = vmax.f32 %v1016_v15, 0.0 }
 0x15e   : > { %v1049_v21 = vmax.f32 %v989_v16, 0.0  ;;  %1216 = vst.msk [vmem:[%s2376_s12 + $0x70] sm:$0xf] %vm1187_vm1, %v1725_v37  ;;  %v992_v22 = vadd.f32 %v2426_v4, %v831_v17  ;;  %1226 = sbr.rel (!%p2218_p4) target bundleno = 427 (0x1ab), region = 36 }
 0x15f   : > { %1219 = vst.msk [vmem:[%s2376_s12 + $0x7c] sm:$0xf] %vm1187_vm1, %v1728_v18  ;;  %v1726_v23 = vpack.c.bf16 %v1056_v19, %v1056_v19 }
 0x160   : > { %v1719_v24 = vpack.c.bf16 %v1049_v21, %v1049_v21  ;;  %v1050_v26 = vmax.f32 %v992_v22, 0.0 }
 0x161   : > { %1217 = vst.msk [vmem:[%s2376_s12 + $0x74] sm:$0xf] %vm1187_vm1, %v1726_v23 }
 0x162   : > { %1210 = vst.msk [vmem:[%s2376_s12 + $0x58] sm:$0xf] %vm1187_vm1, %v1719_v24  ;;  %v1720_v62 = vpack.c.bf16 %v1050_v26, %v1050_v26 }
 0x164   : > { %1211 = vst.msk [vmem:[%s2376_s12 + $0x5c] sm:$0xf] %vm1187_vm1, %v1720_v62 }
 0x165   : > { %s2631_s27 = smov (!%p1229_p8, %s1228_s27), 32 }
 0x166   : > { %s1682_s5 = sshll.u32 %s2631_s27, 6 }
 0x167   : > { %p1685_p9 = scmp.eq.s32.totalorder %s1682_s5, 0 }
 0x168   : > { %s2497_s6 = sshrl.u32 (!%p1685_p9), %s2631_s27, 5 }
 0x169   : > { %1237 = sbr.rel (%p1685_p9) target bundleno = 427 (0x1ab), region = 40  ;;  %p1686_p10 = scmp.le.s32.totalorder (!%p1685_p9), %s2497_s6, 0 }
 0x170   : > { %1514 = sbr.rel (%p1686_p10) target bundleno = 406 (0x196), region = 112  ;;  %s2624_s15 = smov (!%p1686_p10), %s2491_s4 }
 0x171   : > { %s2625_s20 = smov (!%p1686_p10), %s2376_s12  ;;  %s2506_s23 = smov (!%p1686_p10), 0  }
 0x172   : > { %s2508_s7 = smov (!%p1686_p10), 0  }
 0x177 LB: >> { %v1253_v50 = vld [vmem:[%s2147_s20] sm:$0xf]  ;;  %v1255_v4 = vld [vmem:[%s2147_s20 + $0x4] sm:$0xf]  ;;  %v1257_v27 = vld [vmem:[%s2147_s20 + $0x8] sm:$0xf]  ;;  %s2155_s7 = sphi %s2508_s7, %s1247_s7   ;;  %s2151_s23 = sphi %s2506_s23, %s2626_s23   ;;  %s2147_s20 = sphi %s2625_s20, %s1322_s20   ;;  %s2143_s15 = sphi %s2624_s15, %s1323_s15  }
 0x178   : >> { %1254 = vst [vmem:[%s2143_s15] sm:$0xf] %v1253_v50  ;;  %1256 = vst [vmem:[%s2143_s15 + $0x4] sm:$0xf] %v1255_v4  ;;  %v1259_v28 = vld [vmem:[%s2147_s20 + $0xc] sm:$0xf]  ;;  %s1317_s8 = sadd.s32 1, %s2151_s23 }
 0x179   : >> { %1258 = vst [vmem:[%s2143_s15 + $0x8] sm:$0xf] %v1257_v27  ;;  %v1261_v29 = vld [vmem:[%s2147_s20 + $0x10] sm:$0xf]  ;;  %v1263_v20 = vld [vmem:[%s2147_s20 + $0x14] sm:$0xf]  ;;  %p1318_p11 = scmp.ge.s32.totalorder %s1317_s8, %s2497_s6 }
 0x17a   : >> { %1260 = vst [vmem:[%s2143_s15 + $0xc] sm:$0xf] %v1259_v28  ;;  %1262 = vst [vmem:[%s2143_s15 + $0x10] sm:$0xf] %v1261_v29  ;;  %v1265_v31 = vld [vmem:[%s2147_s20 + $0x18] sm:$0xf] }
 0x17b   : >> { %1264 = vst [vmem:[%s2143_s15 + $0x14] sm:$0xf] %v1263_v20  ;;  %v1267_v33 = vld [vmem:[%s2147_s20 + $0x1c] sm:$0xf]  ;;  %v1269_v30 = vld [vmem:[%s2147_s20 + $0x20] sm:$0xf] }
 0x17c   : >> { %1266 = vst [vmem:[%s2143_s15 + $0x18] sm:$0xf] %v1265_v31  ;;  %1268 = vst [vmem:[%s2143_s15 + $0x1c] sm:$0xf] %v1267_v33  ;;  %v1271_v34 = vld [vmem:[%s2147_s20 + $0x24] sm:$0xf] }
 0x17d   : >> { %1270 = vst [vmem:[%s2143_s15 + $0x20] sm:$0xf] %v1269_v30  ;;  %v1273_v8 = vld [vmem:[%s2147_s20 + $0x28] sm:$0xf]  ;;  %v1275_v35 = vld [vmem:[%s2147_s20 + $0x2c] sm:$0xf] }
 0x17e   : >> { %1272 = vst [vmem:[%s2143_s15 + $0x24] sm:$0xf] %v1271_v34  ;;  %1274 = vst [vmem:[%s2143_s15 + $0x28] sm:$0xf] %v1273_v8  ;;  %v1277_v38 = vld [vmem:[%s2147_s20 + $0x30] sm:$0xf] }
 0x17f   : >> { %1276 = vst [vmem:[%s2143_s15 + $0x2c] sm:$0xf] %v1275_v35  ;;  %v1279_v25 = vld [vmem:[%s2147_s20 + $0x34] sm:$0xf]  ;;  %v1281_v39 = vld [vmem:[%s2147_s20 + $0x38] sm:$0xf] }
 0x180   : >> { %1278 = vst [vmem:[%s2143_s15 + $0x30] sm:$0xf] %v1277_v38  ;;  %1280 = vst [vmem:[%s2143_s15 + $0x34] sm:$0xf] %v1279_v25  ;;  %v1283_v40 = vld [vmem:[%s2147_s20 + $0x3c] sm:$0xf] }
 0x181   : >> { %1282 = vst [vmem:[%s2143_s15 + $0x38] sm:$0xf] %v1281_v39  ;;  %v1285_v41 = vld [vmem:[%s2147_s20 + $0x40] sm:$0xf]  ;;  %v1287_v42 = vld [vmem:[%s2147_s20 + $0x44] sm:$0xf] }
 0x182   : >> { %1284 = vst [vmem:[%s2143_s15 + $0x3c] sm:$0xf] %v1283_v40  ;;  %1286 = vst [vmem:[%s2143_s15 + $0x40] sm:$0xf] %v1285_v41  ;;  %v1289_v43 = vld [vmem:[%s2147_s20 + $0x48] sm:$0xf] }
 0x183   : >> { %1288 = vst [vmem:[%s2143_s15 + $0x44] sm:$0xf] %v1287_v42  ;;  %v1291_v45 = vld [vmem:[%s2147_s20 + $0x4c] sm:$0xf]  ;;  %v1293_v46 = vld [vmem:[%s2147_s20 + $0x50] sm:$0xf] }
 0x184   : >> { %1290 = vst [vmem:[%s2143_s15 + $0x48] sm:$0xf] %v1289_v43  ;;  %1292 = vst [vmem:[%s2143_s15 + $0x4c] sm:$0xf] %v1291_v45  ;;  %v1295_v36 = vld [vmem:[%s2147_s20 + $0x54] sm:$0xf] }
 0x185   : >> { %1294 = vst [vmem:[%s2143_s15 + $0x50] sm:$0xf] %v1293_v46  ;;  %v1297_v13 = vld [vmem:[%s2147_s20 + $0x58] sm:$0xf]  ;;  %v1299_v47 = vld [vmem:[%s2147_s20 + $0x5c] sm:$0xf] }
 0x186   : >> { %1296 = vst [vmem:[%s2143_s15 + $0x54] sm:$0xf] %v1295_v36  ;;  %1298 = vst [vmem:[%s2143_s15 + $0x58] sm:$0xf] %v1297_v13  ;;  %v1301_v48 = vld [vmem:[%s2147_s20 + $0x60] sm:$0xf] }
 0x187   : >> { %1300 = vst [vmem:[%s2143_s15 + $0x5c] sm:$0xf] %v1299_v47  ;;  %v1303_v51 = vld [vmem:[%s2147_s20 + $0x64] sm:$0xf]  ;;  %v1305_v52 = vld [vmem:[%s2147_s20 + $0x68] sm:$0xf] }
 0x188   : >> { %1302 = vst [vmem:[%s2143_s15 + $0x60] sm:$0xf] %v1301_v48  ;;  %1304 = vst [vmem:[%s2143_s15 + $0x64] sm:$0xf] %v1303_v51  ;;  %v1307_v53 = vld [vmem:[%s2147_s20 + $0x6c] sm:$0xf] }
 0x189   : >> { %1306 = vst [vmem:[%s2143_s15 + $0x68] sm:$0xf] %v1305_v52  ;;  %v1309_v54 = vld [vmem:[%s2147_s20 + $0x70] sm:$0xf]  ;;  %v1311_v55 = vld [vmem:[%s2147_s20 + $0x74] sm:$0xf] }
 0x18a   : >> { %1308 = vst [vmem:[%s2143_s15 + $0x6c] sm:$0xf] %v1307_v53  ;;  %1310 = vst [vmem:[%s2143_s15 + $0x70] sm:$0xf] %v1309_v54  ;;  %v1313_v56 = vld [vmem:[%s2147_s20 + $0x78] sm:$0xf] }
 0x18b   : >> { %1312 = vst [vmem:[%s2143_s15 + $0x74] sm:$0xf] %v1311_v55  ;;  %v1315_v57 = vld [vmem:[%s2147_s20 + $0x7c] sm:$0xf]  ;;  %1314 = vst [vmem:[%s2143_s15 + $0x78] sm:$0xf] %v1313_v56 }
 0x18c   : >> { %1316 = vst [vmem:[%s2143_s15 + $0x7c] sm:$0xf] %v1315_v57  ;;  %s2633_s8 = smov (%p1318_p11, %s1317_s8), 0  ;;  %s1247_s7 = sadd.s32 1, %s2155_s7  }
 0x18d   : >> { %s1687_s9 = sshll.u32 %s2633_s8, 7  ;;  %p1246_p12 = scmp.ge.s32.totalorder %s1247_s7, %s2497_s6 }
 0x18e   : >> { %s1322_s20 = scalar_lea.vmem %s2376_s12, %s1687_s9 [#allocation2]   ;;  %s1323_s15 = scalar_lea.vmem %s2491_s4, %s1687_s9  }
 0x18f   : >> { %s2626_s23 = smov %s2633_s8  ;;  %1249 = sbr.rel (!%p1246_p12) target bundleno = 375 (0x177), region = 118 }
 0x196 PF: > { %s2601_s10 = sand.u32 31, %s2631_s27   ;;  %s1730_s11 = sshll.u32 %s2497_s6, 7 }
 0x197   : > { %s1328_s14 = scalar_lea.vmem %s2376_s12, %s1730_s11 [#allocation2]   ;;  %s1330_s17 = scalar_lea.vmem %s2491_s4, %s1730_s11  }
 0x198   : > { %p1692_p13 = scmp.le.s32.totalorder %s2601_s10, 0 }
 0x199   : > { %s2157_s18 = smov (!%p1692_p13), %s1330_s17   ;;  %s2161_s21 = smov (!%p1692_p13), %s1328_s14  }
 0x19a   : > { %1528 = sbr.rel (%p1692_p13) target bundleno = 427 (0x1ab), region = 123  ;;  %s2165_s22 = smov (!%p1692_p13), 0  }
 0x19b   : > { %s2169_s24 = smov (!%p1692_p13), 0  }
 0x1a1 LB: >> { %v1340_v58 = vld [vmem:[%s2163_s21] sm:$0xf]  ;;  %s1342_s25 = sadd.s32 1, %s2167_s22  ;;  %s1334_s24 = sadd.s32 1, %s2171_s24   ;;  %s2171_s24 = sphi %s2169_s24, %s1334_s24   ;;  %s2167_s22 = sphi %s2165_s22, %s2166_s22   ;;  %s2163_s21 = sphi %s2161_s21, %s1347_s21   ;;  %s2159_s18 = sphi %s2157_s18, %s1348_s18  }
 0x1a2   : >> { %1341 = vst [vmem:[%s2159_s18] sm:$0xf] %v1340_v58  ;;  %p1343_p0 = scmp.ge.s32.totalorder %s1342_s25, %s2601_s10  ;;  %p1333_p1 = scmp.ge.s32.totalorder %s1334_s24, %s2601_s10 }
 0x1a4   : >> { %s2635_s25 = smov (%p1343_p0, %s1342_s25), 0  ;;  %1336 = sbr.rel (!%p1333_p1) target bundleno = 417 (0x1a1), region = 129 }
 0x1a5   : >> { %s1693_s26 = sshll.u32 %s2635_s25, 2  ;;  %s2166_s22 = smov %s2635_s25  }
 0x1a6   : >> { %s1347_s21 = scalar_lea.vmem %s1328_s14, %s1693_s26 [#allocation2]   ;;  %s1348_s18 = scalar_lea.vmem %s1330_s17, %s1693_s26  }
 0x1ab PF: > { %p10_p2 = scmp.ge.s32.totalorder %s2208_s16, 7   ;;  %s2627_s12 = smov %s2135_s13 }
 0x1ac   : > { %s2628_s13 = smov %s2216_s19  ;;  %s2629_s14 = smov %s2208_s16 }
 0x1ad   :  { %12 = sbr.rel (!%p10_p2) target bundleno = 2 (0x2), region = 140 }

// kernel: cnn_forward.6
= control target key start
LH: loop header
LB: loop body
LE: loop exit
PB: predicated region body
PF: predicated region fallthrough
CT: control target
= control target key end

     0   :  { %vm344_vm0 = vcmask 519168   ;;  %vm346_vm1 = vcmask 517120   ;;  %s1176_s0 = inlined_call_operand.vmem [shape: bf16[2,2,2,12,12,64], index: 0, kind: input, shape index: {}]   ;;  %s1177_s1 = inlined_call_operand.vmem [shape: bf16[2,12,12,64], index: 1, kind: output, shape index: {}]  }
   0x1   :  { %v8_v0 = vld [vmem:[%s1176_s0] sm:$0xf]  ;;  %v9_v5 = vld [vmem:[%s1176_s0 + $0x4] sm:$0x3]  ;;  %v10_v11 = vld [vmem:[%s1176_s0 + $0x8] sm:$0xf] }
   0x2   :  { %v32_v1 = vld [vmem:[%s1176_s0 + $0x60] sm:$0xf]  ;;  %v33_v6 = vld [vmem:[%s1176_s0 + $0x64] sm:$0x3]  ;;  %v34_v13 = vld [vmem:[%s1176_s0 + $0x68] sm:$0xf] }
   0x3   :  { %v56_v2 = vld [vmem:[%s1176_s0 + $0xc0] sm:$0xf]  ;;  %v200_v4 = vmax.bf16 %v32_v1, %v8_v0  ;;  %v57_v8 = vld [vmem:[%s1176_s0 + $0xc4] sm:$0x3]  ;;  %v201_v10 = vmax.bf16 %v33_v6, %v9_v5  ;;  %v58_v14 = vld [vmem:[%s1176_s0 + $0xc8] sm:$0xf]  ;;  %v202_v17 = vmax.bf16 %v34_v13, %v10_v11 }
   0x4   :  { %v80_v3 = vld [vmem:[%s1176_s0 + $0x120] sm:$0xf]  ;;  %v81_v9 = vld [vmem:[%s1176_s0 + $0x124] sm:$0x3]  ;;  %v82_v15 = vld [vmem:[%s1176_s0 + $0x128] sm:$0xf] }
   0x5   :  { %v248_v7 = vmax.bf16 %v80_v3, %v56_v2  ;;  %v249_v12 = vmax.bf16 %v81_v9, %v57_v8  ;;  %v250_v18 = vmax.bf16 %v82_v15, %v58_v14  ;;  %v11_v19 = vld [vmem:[%s1176_s0 + $0xc] sm:$0x3]  ;;  %v12_v25 = vld [vmem:[%s1176_s0 + $0x10] sm:$0xf]  ;;  %v13_v32 = vld [vmem:[%s1176_s0 + $0x14] sm:$0x3] }
   0x6   :  { %v35_v20 = vld [vmem:[%s1176_s0 + $0x6c] sm:$0x3]  ;;  %v36_v26 = vld [vmem:[%s1176_s0 + $0x70] sm:$0xf]  ;;  %v37_v34 = vld [vmem:[%s1176_s0 + $0x74] sm:$0x3] }
   0x7   :  { %v296_v16 = vmax.bf16 %v248_v7, %v200_v4  ;;  %v59_v21 = vld [vmem:[%s1176_s0 + $0xcc] sm:$0x3]  ;;  %v297_v22 = vmax.bf16 %v249_v12, %v201_v10  ;;  %v203_v24 = vmax.bf16 %v35_v20, %v11_v19  ;;  %v298_v27 = vmax.bf16 %v250_v18, %v202_v17  ;;  %v60_v29 = vld [vmem:[%s1176_s0 + $0xd0] sm:$0xf]  ;;  %v61_v35 = vld [vmem:[%s1176_s0 + $0xd4] sm:$0x3] }
   0x8   :  { %v83_v23 = vld [vmem:[%s1176_s0 + $0x12c] sm:$0x3]  ;;  %v84_v30 = vld [vmem:[%s1176_s0 + $0x130] sm:$0xf]  ;;  %v204_v31 = vmax.bf16 %v36_v26, %v12_v25  ;;  %v85_v36 = vld [vmem:[%s1176_s0 + $0x134] sm:$0x3]  ;;  %v205_v38 = vmax.bf16 %v37_v34, %v13_v32 }
   0x9   :  { %345 = vst.msk [vmem:[%s1177_s1] sm:$0xf] %vm344_vm0, %v296_v16  ;;  %v251_v28 = vmax.bf16 %v83_v23, %v59_v21  ;;  %v252_v33 = vmax.bf16 %v84_v30, %v60_v29  ;;  %348 = vst.msk [vmem:[%s1177_s1 + $0x8] sm:$0xf] %vm344_vm0, %v298_v27  ;;  %v253_v39 = vmax.bf16 %v85_v36, %v61_v35  ;;  %v14_v40 = vld [vmem:[%s1176_s0 + $0x18] sm:$0xf] }
   0xa   :  { %347 = vst.msk [vmem:[%s1177_s1 + $0x4] sm:$0x3] %vm346_vm1, %v297_v22  ;;  %v38_v41 = vld [vmem:[%s1176_s0 + $0x78] sm:$0xf]  ;;  %v15_v46 = vld [vmem:[%s1176_s0 + $0x1c] sm:$0x3] }
   0xb   :  { %v299_v37 = vmax.bf16 %v251_v28, %v203_v24  ;;  %v62_v42 = vld [vmem:[%s1176_s0 + $0xd8] sm:$0xf]  ;;  %v300_v43 = vmax.bf16 %v252_v33, %v204_v31  ;;  %v206_v45 = vmax.bf16 %v38_v41, %v14_v40  ;;  %v39_v47 = vld [vmem:[%s1176_s0 + $0x7c] sm:$0x3]  ;;  %v301_v48 = vmax.bf16 %v253_v39, %v205_v38  ;;  %v16_v53 = vld [vmem:[%s1176_s0 + $0x20] sm:$0xf] }
   0xc   :  { %v86_v44 = vld [vmem:[%s1176_s0 + $0x138] sm:$0xf]  ;;  %v63_v50 = vld [vmem:[%s1176_s0 + $0xdc] sm:$0x3]  ;;  %v207_v52 = vmax.bf16 %v39_v47, %v15_v46  ;;  %v40_v55 = vld [vmem:[%s1176_s0 + $0x80] sm:$0xf] }
   0xd   :  { %349 = vst.msk [vmem:[%s1177_s1 + $0xc] sm:$0x3] %vm346_vm1, %v299_v37  ;;  %v254_v49 = vmax.bf16 %v86_v44, %v62_v42  ;;  %v87_v51 = vld [vmem:[%s1176_s0 + $0x13c] sm:$0x3]  ;;  %v64_v56 = vld [vmem:[%s1176_s0 + $0xe0] sm:$0xf]  ;;  %v208_v59 = vmax.bf16 %v40_v55, %v16_v53 }
   0xe   :  { %350 = vst.msk [vmem:[%s1177_s1 + $0x10] sm:$0xf] %vm344_vm0, %v300_v43  ;;  %v255_v54 = vmax.bf16 %v87_v51, %v63_v50  ;;  %v88_v57 = vld [vmem:[%s1176_s0 + $0x140] sm:$0xf]  ;;  %v17_v61 = vld [vmem:[%s1176_s0 + $0x24] sm:$0x3] }
   0xf   :  { %351 = vst.msk [vmem:[%s1177_s1 + $0x14] sm:$0x3] %vm346_vm1, %v301_v48  ;;  %v302_v58 = vmax.bf16 %v254_v49, %v206_v45  ;;  %v256_v60 = vmax.bf16 %v88_v57, %v64_v56  ;;  %v41_v62 = vld [vmem:[%s1176_s0 + $0x84] sm:$0x3]  ;;  %v18_v3 = vld [vmem:[%s1176_s0 + $0x28] sm:$0xf] }
  0x10   :  { %v65_v63 = vld [vmem:[%s1176_s0 + $0xe4] sm:$0x3]  ;;  %v303_v0 = vmax.bf16 %v255_v54, %v207_v52  ;;  %v209_v2 = vmax.bf16 %v41_v62, %v17_v61  ;;  %v42_v4 = vld [vmem:[%s1176_s0 + $0x88] sm:$0xf]  ;;  %v19_v10 = vld [vmem:[%s1176_s0 + $0x2c] sm:$0x3] }
  0x11   :  { %v89_v1 = vld [vmem:[%s1176_s0 + $0x144] sm:$0x3]  ;;  %352 = vst.msk [vmem:[%s1177_s1 + $0x18] sm:$0xf] %vm344_vm0, %v302_v58  ;;  %v304_v5 = vmax.bf16 %v256_v60, %v208_v59  ;;  %v66_v7 = vld [vmem:[%s1176_s0 + $0xe8] sm:$0xf]  ;;  %v210_v9 = vmax.bf16 %v42_v4, %v18_v3 }
  0x12   :  { %v257_v6 = vmax.bf16 %v89_v1, %v65_v63  ;;  %v90_v8 = vld [vmem:[%s1176_s0 + $0x148] sm:$0xf]  ;;  %353 = vst.msk [vmem:[%s1177_s1 + $0x1c] sm:$0x3] %vm346_vm1, %v303_v0  ;;  %v43_v12 = vld [vmem:[%s1176_s0 + $0x8c] sm:$0x3] }
  0x13   :  { %v258_v11 = vmax.bf16 %v90_v8, %v66_v7  ;;  %v67_v13 = vld [vmem:[%s1176_s0 + $0xec] sm:$0x3]  ;;  %354 = vst.msk [vmem:[%s1177_s1 + $0x20] sm:$0xf] %vm344_vm0, %v304_v5  ;;  %v211_v16 = vmax.bf16 %v43_v12, %v19_v10  ;;  %v20_v18 = vld [vmem:[%s1176_s0 + $0x30] sm:$0xf] }
  0x14   :  { %v91_v14 = vld [vmem:[%s1176_s0 + $0x14c] sm:$0x3]  ;;  %v305_v15 = vmax.bf16 %v257_v6, %v209_v2  ;;  %v44_v19 = vld [vmem:[%s1176_s0 + $0x90] sm:$0xf]  ;;  %v21_v24 = vld [vmem:[%s1176_s0 + $0x34] sm:$0x3] }
  0x15   :  { %v259_v17 = vmax.bf16 %v91_v14, %v67_v13  ;;  %v68_v20 = vld [vmem:[%s1176_s0 + $0xf0] sm:$0xf]  ;;  %v306_v21 = vmax.bf16 %v258_v11, %v210_v9  ;;  %v212_v23 = vmax.bf16 %v44_v19, %v20_v18  ;;  %v45_v25 = vld [vmem:[%s1176_s0 + $0x94] sm:$0x3]  ;;  %v22_v31 = vld [vmem:[%s1176_s0 + $0x38] sm:$0xf] }
  0x16   :  { %v92_v22 = vld [vmem:[%s1176_s0 + $0x150] sm:$0xf]  ;;  %355 = vst.msk [vmem:[%s1177_s1 + $0x24] sm:$0x3] %vm346_vm1, %v305_v15  ;;  %v69_v28 = vld [vmem:[%s1176_s0 + $0xf4] sm:$0x3]  ;;  %v213_v30 = vmax.bf16 %v45_v25, %v21_v24 }
  0x17   :  { %v307_v26 = vmax.bf16 %v259_v17, %v211_v16  ;;  %v260_v27 = vmax.bf16 %v92_v22, %v68_v20  ;;  %v93_v29 = vld [vmem:[%s1176_s0 + $0x154] sm:$0x3]  ;;  %356 = vst.msk [vmem:[%s1177_s1 + $0x28] sm:$0xf] %vm344_vm0, %v306_v21  ;;  %v46_v33 = vld [vmem:[%s1176_s0 + $0x98] sm:$0xf] }
  0x18   :  { %v261_v32 = vmax.bf16 %v93_v29, %v69_v28  ;;  %v70_v34 = vld [vmem:[%s1176_s0 + $0xf8] sm:$0xf]  ;;  %v214_v37 = vmax.bf16 %v46_v33, %v22_v31  ;;  %v23_v39 = vld [vmem:[%s1176_s0 + $0x3c] sm:$0x3]  ;;  %v24_v45 = vld [vmem:[%s1176_s0 + $0x40] sm:$0xf] }
  0x19   :  { %v94_v35 = vld [vmem:[%s1176_s0 + $0x158] sm:$0xf]  ;;  %357 = vst.msk [vmem:[%s1177_s1 + $0x2c] sm:$0x3] %vm346_vm1, %v307_v26  ;;  %v308_v36 = vmax.bf16 %v260_v27, %v212_v23  ;;  %v47_v40 = vld [vmem:[%s1176_s0 + $0x9c] sm:$0x3] }
  0x1a   :  { %v262_v38 = vmax.bf16 %v94_v35, %v70_v34  ;;  %v71_v41 = vld [vmem:[%s1176_s0 + $0xfc] sm:$0x3]  ;;  %v309_v42 = vmax.bf16 %v261_v32, %v213_v30  ;;  %v215_v44 = vmax.bf16 %v47_v40, %v23_v39  ;;  %v48_v46 = vld [vmem:[%s1176_s0 + $0xa0] sm:$0xf]  ;;  %v25_v52 = vld [vmem:[%s1176_s0 + $0x44] sm:$0x3] }
  0x1b   :  { %v95_v43 = vld [vmem:[%s1176_s0 + $0x15c] sm:$0x3]  ;;  %358 = vst.msk [vmem:[%s1177_s1 + $0x30] sm:$0xf] %vm344_vm0, %v308_v36  ;;  %v72_v49 = vld [vmem:[%s1176_s0 + $0x100] sm:$0xf]  ;;  %v216_v51 = vmax.bf16 %v48_v46, %v24_v45 }
  0x1c   :  { %v310_v47 = vmax.bf16 %v262_v38, %v214_v37  ;;  %v263_v48 = vmax.bf16 %v95_v43, %v71_v41  ;;  %v96_v50 = vld [vmem:[%s1176_s0 + $0x160] sm:$0xf]  ;;  %359 = vst.msk [vmem:[%s1177_s1 + $0x34] sm:$0x3] %vm346_vm1, %v309_v42  ;;  %v49_v54 = vld [vmem:[%s1176_s0 + $0xa4] sm:$0x3] }
  0x1d   :  { %v264_v53 = vmax.bf16 %v96_v50, %v72_v49  ;;  %v73_v55 = vld [vmem:[%s1176_s0 + $0x104] sm:$0x3]  ;;  %v217_v58 = vmax.bf16 %v49_v54, %v25_v52  ;;  %v26_v60 = vld [vmem:[%s1176_s0 + $0x48] sm:$0xf]  ;;  %v27_v2 = vld [vmem:[%s1176_s0 + $0x4c] sm:$0x3] }
  0x1e   :  { %v97_v56 = vld [vmem:[%s1176_s0 + $0x164] sm:$0x3]  ;;  %360 = vst.msk [vmem:[%s1177_s1 + $0x38] sm:$0xf] %vm344_vm0, %v310_v47  ;;  %v311_v57 = vmax.bf16 %v263_v48, %v215_v44  ;;  %v50_v61 = vld [vmem:[%s1176_s0 + $0xa8] sm:$0xf] }
  0x1f   :  { %v265_v59 = vmax.bf16 %v97_v56, %v73_v55  ;;  %v74_v62 = vld [vmem:[%s1176_s0 + $0x108] sm:$0xf]  ;;  %v312_v63 = vmax.bf16 %v264_v53, %v216_v51  ;;  %v218_v1 = vmax.bf16 %v50_v61, %v26_v60  ;;  %v51_v3 = vld [vmem:[%s1176_s0 + $0xac] sm:$0x3]  ;;  %v28_v9 = vld [vmem:[%s1176_s0 + $0x50] sm:$0xf] }
  0x20   :  { %v98_v0 = vld [vmem:[%s1176_s0 + $0x168] sm:$0xf]  ;;  %361 = vst.msk [vmem:[%s1177_s1 + $0x3c] sm:$0x3] %vm346_vm1, %v311_v57  ;;  %v75_v6 = vld [vmem:[%s1176_s0 + $0x10c] sm:$0x3]  ;;  %v219_v8 = vmax.bf16 %v51_v3, %v27_v2 }
  0x21   :  { %v313_v4 = vmax.bf16 %v265_v59, %v217_v58  ;;  %v266_v5 = vmax.bf16 %v98_v0, %v74_v62  ;;  %v99_v7 = vld [vmem:[%s1176_s0 + $0x16c] sm:$0x3]  ;;  %362 = vst.msk [vmem:[%s1177_s1 + $0x40] sm:$0xf] %vm344_vm0, %v312_v63  ;;  %v52_v11 = vld [vmem:[%s1176_s0 + $0xb0] sm:$0xf] }
  0x22   :  { %v267_v10 = vmax.bf16 %v99_v7, %v75_v6  ;;  %v76_v12 = vld [vmem:[%s1176_s0 + $0x110] sm:$0xf]  ;;  %v220_v15 = vmax.bf16 %v52_v11, %v28_v9  ;;  %v29_v17 = vld [vmem:[%s1176_s0 + $0x54] sm:$0x3]  ;;  %v30_v23 = vld [vmem:[%s1176_s0 + $0x58] sm:$0xf] }
  0x23   :  { %v100_v13 = vld [vmem:[%s1176_s0 + $0x170] sm:$0xf]  ;;  %363 = vst.msk [vmem:[%s1177_s1 + $0x44] sm:$0x3] %vm346_vm1, %v313_v4  ;;  %v314_v14 = vmax.bf16 %v266_v5, %v218_v1  ;;  %v53_v18 = vld [vmem:[%s1176_s0 + $0xb4] sm:$0x3] }
  0x24   :  { %v268_v16 = vmax.bf16 %v100_v13, %v76_v12  ;;  %v77_v19 = vld [vmem:[%s1176_s0 + $0x114] sm:$0x3]  ;;  %v315_v20 = vmax.bf16 %v267_v10, %v219_v8  ;;  %v221_v22 = vmax.bf16 %v53_v18, %v29_v17  ;;  %v54_v24 = vld [vmem:[%s1176_s0 + $0xb8] sm:$0xf]  ;;  %v31_v30 = vld [vmem:[%s1176_s0 + $0x5c] sm:$0x3] }
  0x25   :  { %v101_v21 = vld [vmem:[%s1176_s0 + $0x174] sm:$0x3]  ;;  %364 = vst.msk [vmem:[%s1177_s1 + $0x48] sm:$0xf] %vm344_vm0, %v314_v14  ;;  %v78_v27 = vld [vmem:[%s1176_s0 + $0x118] sm:$0xf]  ;;  %v222_v29 = vmax.bf16 %v54_v24, %v30_v23 }
  0x26   :  { %v316_v25 = vmax.bf16 %v268_v16, %v220_v15  ;;  %v269_v26 = vmax.bf16 %v101_v21, %v77_v19  ;;  %v102_v28 = vld [vmem:[%s1176_s0 + $0x178] sm:$0xf]  ;;  %365 = vst.msk [vmem:[%s1177_s1 + $0x4c] sm:$0x3] %vm346_vm1, %v315_v20  ;;  %v55_v32 = vld [vmem:[%s1176_s0 + $0xbc] sm:$0x3] }
  0x27   :  { %v270_v31 = vmax.bf16 %v102_v28, %v78_v27  ;;  %v79_v33 = vld [vmem:[%s1176_s0 + $0x11c] sm:$0x3]  ;;  %v223_v36 = vmax.bf16 %v55_v32, %v31_v30  ;;  %v104_v38 = vld [vmem:[%s1176_s0 + $0x180] sm:$0xf]  ;;  %v105_v44 = vld [vmem:[%s1176_s0 + $0x184] sm:$0x3] }
  0x28   :  { %v103_v34 = vld [vmem:[%s1176_s0 + $0x17c] sm:$0x3]  ;;  %366 = vst.msk [vmem:[%s1177_s1 + $0x50] sm:$0xf] %vm344_vm0, %v316_v25  ;;  %v317_v35 = vmax.bf16 %v269_v26, %v221_v22  ;;  %v128_v39 = vld [vmem:[%s1176_s0 + $0x1e0] sm:$0xf] }
  0x29   :  { %v271_v37 = vmax.bf16 %v103_v34, %v79_v33  ;;  %v152_v40 = vld [vmem:[%s1176_s0 + $0x240] sm:$0xf]  ;;  %v318_v41 = vmax.bf16 %v270_v31, %v222_v29  ;;  %v224_v43 = vmax.bf16 %v128_v39, %v104_v38  ;;  %v129_v45 = vld [vmem:[%s1176_s0 + $0x1e4] sm:$0x3]  ;;  %v106_v51 = vld [vmem:[%s1176_s0 + $0x188] sm:$0xf] }
  0x2a   :  { %v176_v42 = vld [vmem:[%s1176_s0 + $0x2a0] sm:$0xf]  ;;  %367 = vst.msk [vmem:[%s1177_s1 + $0x54] sm:$0x3] %vm346_vm1, %v317_v35  ;;  %v153_v48 = vld [vmem:[%s1176_s0 + $0x244] sm:$0x3]  ;;  %v225_v50 = vmax.bf16 %v129_v45, %v105_v44 }
  0x2b   :  { %v319_v46 = vmax.bf16 %v271_v37, %v223_v36  ;;  %v272_v47 = vmax.bf16 %v176_v42, %v152_v40  ;;  %v177_v49 = vld [vmem:[%s1176_s0 + $0x2a4] sm:$0x3]  ;;  %368 = vst.msk [vmem:[%s1177_s1 + $0x58] sm:$0xf] %vm344_vm0, %v318_v41  ;;  %v130_v53 = vld [vmem:[%s1176_s0 + $0x1e8] sm:$0xf] }
  0x2c   :  { %v273_v52 = vmax.bf16 %v177_v49, %v153_v48  ;;  %v154_v54 = vld [vmem:[%s1176_s0 + $0x248] sm:$0xf]  ;;  %v226_v57 = vmax.bf16 %v130_v53, %v106_v51  ;;  %v107_v59 = vld [vmem:[%s1176_s0 + $0x18c] sm:$0x3]  ;;  %v108_v1 = vld [vmem:[%s1176_s0 + $0x190] sm:$0xf] }
  0x2d   :  { %v178_v55 = vld [vmem:[%s1176_s0 + $0x2a8] sm:$0xf]  ;;  %369 = vst.msk [vmem:[%s1177_s1 + $0x5c] sm:$0x3] %vm346_vm1, %v319_v46  ;;  %v320_v56 = vmax.bf16 %v272_v47, %v224_v43  ;;  %v131_v60 = vld [vmem:[%s1176_s0 + $0x1ec] sm:$0x3] }
  0x2e   :  { %v274_v58 = vmax.bf16 %v178_v55, %v154_v54  ;;  %v155_v61 = vld [vmem:[%s1176_s0 + $0x24c] sm:$0x3]  ;;  %v321_v62 = vmax.bf16 %v273_v52, %v225_v50  ;;  %v227_v0 = vmax.bf16 %v131_v60, %v107_v59  ;;  %v132_v2 = vld [vmem:[%s1176_s0 + $0x1f0] sm:$0xf]  ;;  %v109_v8 = vld [vmem:[%s1176_s0 + $0x194] sm:$0x3] }
  0x2f   :  { %v179_v63 = vld [vmem:[%s1176_s0 + $0x2ac] sm:$0x3]  ;;  %370 = vst.msk [vmem:[%s1177_s1 + $0x60] sm:$0xf] %vm344_vm0, %v320_v56  ;;  %v156_v5 = vld [vmem:[%s1176_s0 + $0x250] sm:$0xf]  ;;  %v228_v7 = vmax.bf16 %v132_v2, %v108_v1 }
  0x30   :  { %v322_v3 = vmax.bf16 %v274_v58, %v226_v57  ;;  %v275_v4 = vmax.bf16 %v179_v63, %v155_v61  ;;  %v180_v6 = vld [vmem:[%s1176_s0 + $0x2b0] sm:$0xf]  ;;  %371 = vst.msk [vmem:[%s1177_s1 + $0x64] sm:$0x3] %vm346_vm1, %v321_v62  ;;  %v133_v10 = vld [vmem:[%s1176_s0 + $0x1f4] sm:$0x3] }
  0x31   :  { %v276_v9 = vmax.bf16 %v180_v6, %v156_v5  ;;  %v157_v11 = vld [vmem:[%s1176_s0 + $0x254] sm:$0x3]  ;;  %v229_v14 = vmax.bf16 %v133_v10, %v109_v8  ;;  %v110_v16 = vld [vmem:[%s1176_s0 + $0x198] sm:$0xf]  ;;  %v111_v22 = vld [vmem:[%s1176_s0 + $0x19c] sm:$0x3] }
  0x32   :  { %v181_v12 = vld [vmem:[%s1176_s0 + $0x2b4] sm:$0x3]  ;;  %372 = vst.msk [vmem:[%s1177_s1 + $0x68] sm:$0xf] %vm344_vm0, %v322_v3  ;;  %v323_v13 = vmax.bf16 %v275_v4, %v227_v0  ;;  %v134_v17 = vld [vmem:[%s1176_s0 + $0x1f8] sm:$0xf] }
  0x33   :  { %v277_v15 = vmax.bf16 %v181_v12, %v157_v11  ;;  %v158_v18 = vld [vmem:[%s1176_s0 + $0x258] sm:$0xf]  ;;  %v324_v19 = vmax.bf16 %v276_v9, %v228_v7  ;;  %v230_v21 = vmax.bf16 %v134_v17, %v110_v16  ;;  %v135_v23 = vld [vmem:[%s1176_s0 + $0x1fc] sm:$0x3]  ;;  %v112_v29 = vld [vmem:[%s1176_s0 + $0x1a0] sm:$0xf] }
  0x34   :  { %v182_v20 = vld [vmem:[%s1176_s0 + $0x2b8] sm:$0xf]  ;;  %373 = vst.msk [vmem:[%s1177_s1 + $0x6c] sm:$0x3] %vm346_vm1, %v323_v13  ;;  %v159_v26 = vld [vmem:[%s1176_s0 + $0x25c] sm:$0x3]  ;;  %v231_v28 = vmax.bf16 %v135_v23, %v111_v22 }
  0x35   :  { %v325_v24 = vmax.bf16 %v277_v15, %v229_v14  ;;  %v278_v25 = vmax.bf16 %v182_v20, %v158_v18  ;;  %v183_v27 = vld [vmem:[%s1176_s0 + $0x2bc] sm:$0x3]  ;;  %374 = vst.msk [vmem:[%s1177_s1 + $0x70] sm:$0xf] %vm344_vm0, %v324_v19  ;;  %v136_v31 = vld [vmem:[%s1176_s0 + $0x200] sm:$0xf] }
  0x36   :  { %v279_v30 = vmax.bf16 %v183_v27, %v159_v26  ;;  %v160_v32 = vld [vmem:[%s1176_s0 + $0x260] sm:$0xf]  ;;  %v232_v35 = vmax.bf16 %v136_v31, %v112_v29  ;;  %v113_v37 = vld [vmem:[%s1176_s0 + $0x1a4] sm:$0x3]  ;;  %v114_v43 = vld [vmem:[%s1176_s0 + $0x1a8] sm:$0xf] }
  0x37   :  { %v184_v33 = vld [vmem:[%s1176_s0 + $0x2c0] sm:$0xf]  ;;  %375 = vst.msk [vmem:[%s1177_s1 + $0x74] sm:$0x3] %vm346_vm1, %v325_v24  ;;  %v326_v34 = vmax.bf16 %v278_v25, %v230_v21  ;;  %v137_v38 = vld [vmem:[%s1176_s0 + $0x204] sm:$0x3] }
  0x38   :  { %v280_v36 = vmax.bf16 %v184_v33, %v160_v32  ;;  %v161_v39 = vld [vmem:[%s1176_s0 + $0x264] sm:$0x3]  ;;  %v327_v40 = vmax.bf16 %v279_v30, %v231_v28  ;;  %v233_v42 = vmax.bf16 %v137_v38, %v113_v37  ;;  %v138_v44 = vld [vmem:[%s1176_s0 + $0x208] sm:$0xf]  ;;  %v115_v50 = vld [vmem:[%s1176_s0 + $0x1ac] sm:$0x3] }
  0x39   :  { %v185_v41 = vld [vmem:[%s1176_s0 + $0x2c4] sm:$0x3]  ;;  %376 = vst.msk [vmem:[%s1177_s1 + $0x78] sm:$0xf] %vm344_vm0, %v326_v34  ;;  %v162_v47 = vld [vmem:[%s1176_s0 + $0x268] sm:$0xf]  ;;  %v234_v49 = vmax.bf16 %v138_v44, %v114_v43 }
  0x3a   :  { %v328_v45 = vmax.bf16 %v280_v36, %v232_v35  ;;  %v281_v46 = vmax.bf16 %v185_v41, %v161_v39  ;;  %v186_v48 = vld [vmem:[%s1176_s0 + $0x2c8] sm:$0xf]  ;;  %377 = vst.msk [vmem:[%s1177_s1 + $0x7c] sm:$0x3] %vm346_vm1, %v327_v40  ;;  %v139_v52 = vld [vmem:[%s1176_s0 + $0x20c] sm:$0x3] }
  0x3b   :  { %v282_v51 = vmax.bf16 %v186_v48, %v162_v47  ;;  %v163_v53 = vld [vmem:[%s1176_s0 + $0x26c] sm:$0x3]  ;;  %v235_v56 = vmax.bf16 %v139_v52, %v115_v50  ;;  %v116_v58 = vld [vmem:[%s1176_s0 + $0x1b0] sm:$0xf]  ;;  %v117_v0 = vld [vmem:[%s1176_s0 + $0x1b4] sm:$0x3] }
  0x3c   :  { %v187_v54 = vld [vmem:[%s1176_s0 + $0x2cc] sm:$0x3]  ;;  %378 = vst.msk [vmem:[%s1177_s1 + $0x80] sm:$0xf] %vm344_vm0, %v328_v45  ;;  %v329_v55 = vmax.bf16 %v281_v46, %v233_v42  ;;  %v140_v59 = vld [vmem:[%s1176_s0 + $0x210] sm:$0xf] }
  0x3d   :  { %v283_v57 = vmax.bf16 %v187_v54, %v163_v53  ;;  %v164_v60 = vld [vmem:[%s1176_s0 + $0x270] sm:$0xf]  ;;  %v330_v61 = vmax.bf16 %v282_v51, %v234_v49  ;;  %v236_v63 = vmax.bf16 %v140_v59, %v116_v58  ;;  %v141_v1 = vld [vmem:[%s1176_s0 + $0x214] sm:$0x3]  ;;  %v118_v7 = vld [vmem:[%s1176_s0 + $0x1b8] sm:$0xf] }
  0x3e   :  { %v188_v62 = vld [vmem:[%s1176_s0 + $0x2d0] sm:$0xf]  ;;  %379 = vst.msk [vmem:[%s1177_s1 + $0x84] sm:$0x3] %vm346_vm1, %v329_v55  ;;  %v165_v4 = vld [vmem:[%s1176_s0 + $0x274] sm:$0x3]  ;;  %v237_v6 = vmax.bf16 %v141_v1, %v117_v0 }
  0x3f   :  { %v331_v2 = vmax.bf16 %v283_v57, %v235_v56  ;;  %v284_v3 = vmax.bf16 %v188_v62, %v164_v60  ;;  %v189_v5 = vld [vmem:[%s1176_s0 + $0x2d4] sm:$0x3]  ;;  %380 = vst.msk [vmem:[%s1177_s1 + $0x88] sm:$0xf] %vm344_vm0, %v330_v61  ;;  %v142_v9 = vld [vmem:[%s1176_s0 + $0x218] sm:$0xf] }
  0x40   :  { %v285_v8 = vmax.bf16 %v189_v5, %v165_v4  ;;  %v166_v10 = vld [vmem:[%s1176_s0 + $0x278] sm:$0xf]  ;;  %v238_v13 = vmax.bf16 %v142_v9, %v118_v7  ;;  %v119_v15 = vld [vmem:[%s1176_s0 + $0x1bc] sm:$0x3]  ;;  %v120_v21 = vld [vmem:[%s1176_s0 + $0x1c0] sm:$0xf] }
  0x41   :  { %v190_v11 = vld [vmem:[%s1176_s0 + $0x2d8] sm:$0xf]  ;;  %381 = vst.msk [vmem:[%s1177_s1 + $0x8c] sm:$0x3] %vm346_vm1, %v331_v2  ;;  %v332_v12 = vmax.bf16 %v284_v3, %v236_v63  ;;  %v143_v16 = vld [vmem:[%s1176_s0 + $0x21c] sm:$0x3] }
  0x42   :  { %v286_v14 = vmax.bf16 %v190_v11, %v166_v10  ;;  %v167_v17 = vld [vmem:[%s1176_s0 + $0x27c] sm:$0x3]  ;;  %v333_v18 = vmax.bf16 %v285_v8, %v237_v6  ;;  %v239_v20 = vmax.bf16 %v143_v16, %v119_v15  ;;  %v144_v22 = vld [vmem:[%s1176_s0 + $0x220] sm:$0xf]  ;;  %v121_v28 = vld [vmem:[%s1176_s0 + $0x1c4] sm:$0x3] }
  0x43   :  { %v191_v19 = vld [vmem:[%s1176_s0 + $0x2dc] sm:$0x3]  ;;  %382 = vst.msk [vmem:[%s1177_s1 + $0x90] sm:$0xf] %vm344_vm0, %v332_v12  ;;  %v168_v25 = vld [vmem:[%s1176_s0 + $0x280] sm:$0xf]  ;;  %v240_v27 = vmax.bf16 %v144_v22, %v120_v21 }
  0x44   :  { %v334_v23 = vmax.bf16 %v286_v14, %v238_v13  ;;  %v287_v24 = vmax.bf16 %v191_v19, %v167_v17  ;;  %v192_v26 = vld [vmem:[%s1176_s0 + $0x2e0] sm:$0xf]  ;;  %383 = vst.msk [vmem:[%s1177_s1 + $0x94] sm:$0x3] %vm346_vm1, %v333_v18  ;;  %v145_v30 = vld [vmem:[%s1176_s0 + $0x224] sm:$0x3] }
  0x45   :  { %v288_v29 = vmax.bf16 %v192_v26, %v168_v25  ;;  %v169_v31 = vld [vmem:[%s1176_s0 + $0x284] sm:$0x3]  ;;  %v241_v34 = vmax.bf16 %v145_v30, %v121_v28  ;;  %v122_v36 = vld [vmem:[%s1176_s0 + $0x1c8] sm:$0xf]  ;;  %v123_v42 = vld [vmem:[%s1176_s0 + $0x1cc] sm:$0x3] }
  0x46   :  { %v193_v32 = vld [vmem:[%s1176_s0 + $0x2e4] sm:$0x3]  ;;  %384 = vst.msk [vmem:[%s1177_s1 + $0x98] sm:$0xf] %vm344_vm0, %v334_v23  ;;  %v335_v33 = vmax.bf16 %v287_v24, %v239_v20  ;;  %v146_v37 = vld [vmem:[%s1176_s0 + $0x228] sm:$0xf] }
  0x47   :  { %v289_v35 = vmax.bf16 %v193_v32, %v169_v31  ;;  %v170_v38 = vld [vmem:[%s1176_s0 + $0x288] sm:$0xf]  ;;  %v336_v39 = vmax.bf16 %v288_v29, %v240_v27  ;;  %v242_v41 = vmax.bf16 %v146_v37, %v122_v36  ;;  %v147_v43 = vld [vmem:[%s1176_s0 + $0x22c] sm:$0x3]  ;;  %v124_v49 = vld [vmem:[%s1176_s0 + $0x1d0] sm:$0xf] }
  0x48   :  { %v194_v40 = vld [vmem:[%s1176_s0 + $0x2e8] sm:$0xf]  ;;  %385 = vst.msk [vmem:[%s1177_s1 + $0x9c] sm:$0x3] %vm346_vm1, %v335_v33  ;;  %v171_v46 = vld [vmem:[%s1176_s0 + $0x28c] sm:$0x3]  ;;  %v243_v48 = vmax.bf16 %v147_v43, %v123_v42 }
  0x49   :  { %v337_v44 = vmax.bf16 %v289_v35, %v241_v34  ;;  %v290_v45 = vmax.bf16 %v194_v40, %v170_v38  ;;  %v195_v47 = vld [vmem:[%s1176_s0 + $0x2ec] sm:$0x3]  ;;  %386 = vst.msk [vmem:[%s1177_s1 + $0xa0] sm:$0xf] %vm344_vm0, %v336_v39  ;;  %v148_v51 = vld [vmem:[%s1176_s0 + $0x230] sm:$0xf] }
  0x4a   :  { %v291_v50 = vmax.bf16 %v195_v47, %v171_v46  ;;  %v172_v52 = vld [vmem:[%s1176_s0 + $0x290] sm:$0xf]  ;;  %v244_v55 = vmax.bf16 %v148_v51, %v124_v49  ;;  %v125_v57 = vld [vmem:[%s1176_s0 + $0x1d4] sm:$0x3]  ;;  %v126_v63 = vld [vmem:[%s1176_s0 + $0x1d8] sm:$0xf] }
  0x4b   :  { %v196_v53 = vld [vmem:[%s1176_s0 + $0x2f0] sm:$0xf]  ;;  %387 = vst.msk [vmem:[%s1177_s1 + $0xa4] sm:$0x3] %vm346_vm1, %v337_v44  ;;  %v338_v54 = vmax.bf16 %v290_v45, %v242_v41  ;;  %v149_v58 = vld [vmem:[%s1176_s0 + $0x234] sm:$0x3] }
  0x4c   :  { %v292_v56 = vmax.bf16 %v196_v53, %v172_v52  ;;  %v173_v59 = vld [vmem:[%s1176_s0 + $0x294] sm:$0x3]  ;;  %v339_v60 = vmax.bf16 %v291_v50, %v243_v48  ;;  %v245_v62 = vmax.bf16 %v149_v58, %v125_v57  ;;  %v150_v0 = vld [vmem:[%s1176_s0 + $0x238] sm:$0xf]  ;;  %v127_v6 = vld [vmem:[%s1176_s0 + $0x1dc] sm:$0x3] }
  0x4d   :  { %v197_v61 = vld [vmem:[%s1176_s0 + $0x2f4] sm:$0x3]  ;;  %388 = vst.msk [vmem:[%s1177_s1 + $0xa8] sm:$0xf] %vm344_vm0, %v338_v54  ;;  %v174_v3 = vld [vmem:[%s1176_s0 + $0x298] sm:$0xf]  ;;  %v246_v5 = vmax.bf16 %v150_v0, %v126_v63 }
  0x4e   :  { %v340_v1 = vmax.bf16 %v292_v56, %v244_v55  ;;  %v293_v2 = vmax.bf16 %v197_v61, %v173_v59  ;;  %v198_v4 = vld [vmem:[%s1176_s0 + $0x2f8] sm:$0xf]  ;;  %389 = vst.msk [vmem:[%s1177_s1 + $0xac] sm:$0x3] %vm346_vm1, %v339_v60  ;;  %v151_v8 = vld [vmem:[%s1176_s0 + $0x23c] sm:$0x3] }
  0x4f   :  { %v294_v7 = vmax.bf16 %v198_v4, %v174_v3  ;;  %v175_v9 = vld [vmem:[%s1176_s0 + $0x29c] sm:$0x3]  ;;  %v247_v12 = vmax.bf16 %v151_v8, %v127_v6 }
  0x50   :  { %v199_v10 = vld [vmem:[%s1176_s0 + $0x2fc] sm:$0x3]  ;;  %390 = vst.msk [vmem:[%s1177_s1 + $0xb0] sm:$0xf] %vm344_vm0, %v340_v1  ;;  %v341_v11 = vmax.bf16 %v293_v2, %v245_v62 }
  0x51   :  { %v295_v13 = vmax.bf16 %v199_v10, %v175_v9  ;;  %v342_v14 = vmax.bf16 %v294_v7, %v246_v5 }
  0x52   :  { %391 = vst.msk [vmem:[%s1177_s1 + $0xb4] sm:$0x3] %vm346_vm1, %v341_v11 }
  0x53   :  { %v343_v15 = vmax.bf16 %v295_v13, %v247_v12  ;;  %392 = vst.msk [vmem:[%s1177_s1 + $0xb8] sm:$0xf] %vm344_vm0, %v342_v14 }
  0x55   :  { %393 = vst.msk [vmem:[%s1177_s1 + $0xbc] sm:$0x3] %vm346_vm1, %v343_v15 }

// kernel: cnn_forward.7
= control target key start
LH: loop header
LB: loop body
LE: loop exit
PB: predicated region body
PF: predicated region fallthrough
CT: control target
= control target key end

     0   :  { %10 = vsyncpa [#allocation4], 0  ;;  %s1791_s18 = smov 0   ;;  %s1793_s19 = smov 0   ;;  %s1984_s0 = inlined_call_operand.vmem [shape: bf16[2,9216], index: 0, kind: input, shape index: {}]   ;;  %s1985_s1 = inlined_call_operand.vmem [shape: bf16[9216,128], index: 1, kind: input, shape index: {}]   ;;  %s1986_s2 = inlined_call_operand.vmem [shape: f32[1,128], index: 2, kind: input, shape index: {}]   ;;  %s1987_s3 = inlined_call_operand.vmem [shape: bf16[128,10], index: 3, kind: input, shape index: {}]   ;;  %s1988_s4 = inlined_call_operand.vmem [shape: f32[1,10], index: 4, kind: input, shape index: {}]   ;;  %s1989_s5 = inlined_call_operand.hbm [shape: f32[2,10], index: 5, kind: output, shape index: {}]  }
   0x1   :  { %s1795_s20 = smov 0  }
   0x2 LB: > { %s1338_s21 = sadd.s32 4294967295, %s1752_s20   ;;  %s25_s22 = sadd.s32 1, %s1748_s19  ;;  %s1752_s20 = sphi %s1795_s20, %s16_s20   ;;  %s1748_s19 = sphi %s1793_s19, %s1992_s19   ;;  %s1744_s18 = sphi %s1791_s18, %s1991_s18  }
   0x3   : > { %p26_p0 = scmp.ge.s32.totalorder %s25_s22, 8  ;;  %p1341_p1 = scmp.ge.s32.totalorder %s1752_s20, 1 }
   0x4   : > { %p217_p2 = scmp.lt.s32.totalorder %s1752_s20, 9 }
   0x5   : > { %s1994_s22 = smov (%p26_p0, %s25_s22), 0 }
   0x6   : > { %p218_p3 = pnand %p1341_p1, %p217_p2 }
   0x7   : > { %s248_s23 = smul.u32 (!%p218_p3), 9, %s1744_s18  ;;  %p1343_p6 = scmp.ne.s32.totalorder (!%p218_p3), %s1744_s18, 0 }
   0x8   : > { %221 = sbr.rel (%p218_p3) target bundleno = 908 (0x38c), region = 40 }
   0x9   : > { %s257_s24 = smul.u32 (!%p218_p3), 144, %s1744_s18  ;;  %p251_p4 = scmp.lt.s32.totalorder (!%p218_p3), %s248_s23, 71 }
   0xb   : > { %p258_p5 = scmp.lt.s32.totalorder (!%p218_p3), %s257_s24, 1151 }
   0xf   : > { %s1996_s23 = smov (!%p251_p4, %s248_s23), 71  ;;  %s1998_s24 = smov (!%p258_p5, %s257_s24), 1151 }
  0x10   : > { %s1817_s27 = scalar_lea.vmem %s1984_s0, %s1996_s23  ;;  %s1342_s28 = sshll.u32 %s1998_s24, 2  ;;  %v1754_v0 = vmov (!%p1343_p6), 0.0  }
  0x11   : > { %s1822_s6 = scalar_lea.vmem %s1985_s1, %s1342_s28  ;;  %267 = sbr.rel (%p1343_p6) target bundleno = 24 (0x18), region = 44  ;;  %268 = vst [vmem:[#allocation2] sm:$0x3] (!%p1343_p6), %v1754_v0 }
  0x18 PF: > { %v1615_v1 = vld [vmem:[%s1822_s6 + $0x40] sm:$0xff]   ;;  %v1619_v5 = vld [vmem:[%s1822_s6 + $0x48] sm:$0xff]   ;;  %v1623_v9 = vld [vmem:[%s1822_s6 + $0x50] sm:$0xff]   ;;  %v422_v30 = vlaneseq  ;;  %v1755_v36 = vmov 1966171168   ;;  %vm1757_vm0 = vmmov 0  }
  0x19   : > { %v1616_v2 = vld [vmem:[%s1822_s6 + $0xc0] sm:$0xff]   ;;  %1432 = vmatprep.subr.bf16.mxu0 %v1615_v1  ;;  %v1620_v6 = vld [vmem:[%s1822_s6 + $0xc8] sm:$0xff]   ;;  %v1624_v10 = vld [vmem:[%s1822_s6 + $0xd0] sm:$0xff]   ;;  %v420_v37 = vunpack.c.l.s4 %v1755_v36  ;;  %p1417_p7 = scmp.ne.s32.totalorder %s1744_s18, 7 }
  0x1a   : > { %v1617_v3 = vld [vmem:[%s1822_s6] sm:$0xff]   ;;  %1454 = vmatprep.subr.bf16.mxu1 %v1616_v2  ;;  %v1621_v7 = vld [vmem:[%s1822_s6 + $0x8] sm:$0xff]   ;;  %v1625_v11 = vld [vmem:[%s1822_s6 + $0x10] sm:$0xff]   ;;  %v423_v34 = vshrl.u32 %v422_v30, 7  ;;  %vm1759_vm1 = vmmov (!%p1417_p7), 0   ;;  %vm1250_vm2 = vcmask (!%p1417_p7), 74752  }
  0x1b   : > { %v1618_v4 = vld [vmem:[%s1822_s6 + $0x80] sm:$0xff]   ;;  %1433 = vmatpush3.bf16.msra.mxu0 %v1617_v3  ;;  %v1622_v8 = vld [vmem:[%s1822_s6 + $0x88] sm:$0xff]   ;;  %v1626_v12 = vld [vmem:[%s1822_s6 + $0x90] sm:$0xff]   ;;  %v421_v40 = vunpack.c.0.s8 %v420_v37 }
  0x1c   : > { %1455 = vmatpush3.bf16.msra.mxu1 %v1618_v4  ;;  %1434 = vmatprep.subr.bf16.mxu0 %v1619_v5  ;;  %v1627_v13 = vld [vmem:[%s1822_s6 + $0x58] sm:$0xff]   ;;  %v1631_v17 = vld [vmem:[%s1822_s6 + $0x60] sm:$0xff]   ;;  %v1635_v21 = vld [vmem:[%s1822_s6 + $0x68] sm:$0xff]  }
  0x1d   : > { %1456 = vmatprep.subr.bf16.mxu1 %v1620_v6  ;;  %v1628_v14 = vld [vmem:[%s1822_s6 + $0xd8] sm:$0xff]   ;;  %v1632_v18 = vld [vmem:[%s1822_s6 + $0xe0] sm:$0xff]   ;;  %v1636_v22 = vld [vmem:[%s1822_s6 + $0xe8] sm:$0xff]   ;;  %v1860_v42 = vsub.s32 %v421_v40, %v423_v34 }
  0x1e   : > { %v1629_v15 = vld [vmem:[%s1822_s6 + $0x18] sm:$0xff]   ;;  %v1633_v19 = vld [vmem:[%s1822_s6 + $0x20] sm:$0xff]   ;;  %v1637_v23 = vld [vmem:[%s1822_s6 + $0x28] sm:$0xff]  }
  0x1f   : > { %1435 = vmatpush3.bf16.msra.mxu0 %v1621_v7  ;;  %v1630_v16 = vld [vmem:[%s1822_s6 + $0x98] sm:$0xff]   ;;  %v1634_v20 = vld [vmem:[%s1822_s6 + $0xa0] sm:$0xff]   ;;  %v1638_v24 = vld [vmem:[%s1822_s6 + $0xa8] sm:$0xff]  }
  0x20   : > { %1457 = vmatpush3.bf16.msra.mxu1 %v1622_v8  ;;  %1436 = vmatprep.subr.bf16.mxu0 %v1623_v9  ;;  %v1639_v25 = vld [vmem:[%s1822_s6 + $0x70] sm:$0xff]   ;;  %v1643_v29 = vld [vmem:[%s1822_s6 + $0x78] sm:$0xff]   ;;  %v1648_v35 = vld [vmem:[%s1822_s6 + $0x140] sm:$0xff]  }
  0x21   : > { %1458 = vmatprep.subr.bf16.mxu1 %v1624_v10  ;;  %v1640_v26 = vld [vmem:[%s1822_s6 + $0xf0] sm:$0xff]   ;;  %v1644_v31 = vld [vmem:[%s1822_s6 + $0xf8] sm:$0xff]   ;;  %v270_v38 = vld [vmem:[%s1817_s27] sm:$0xff] }
  0x22   : > { %v1641_v27 = vld [vmem:[%s1822_s6 + $0x30] sm:$0xff]   ;;  %v1645_v32 = vld [vmem:[%s1822_s6 + $0x38] sm:$0xff]   ;;  %v418_v39 = vcombine.high %v270_v38, %v270_v38  ;;  %v1650_v41 = vld [vmem:[%s1822_s6 + $0x1c0] sm:$0xff]   ;;  %v425_v43 = vrot.slane %v270_v38, %v1860_v42 }
  0x23   : > { %1437 = vmatpush3.bf16.msra.mxu0 %v1625_v11  ;;  %v1642_v28 = vld [vmem:[%s1822_s6 + $0xb0] sm:$0xff]   ;;  %v1646_v33 = vld [vmem:[%s1822_s6 + $0xb8] sm:$0xff]   ;;  %v1649_v49 = vld [vmem:[%s1822_s6 + $0x100] sm:$0xff]  }
  0x24   : > { %1459 = vmatpush3.bf16.msra.mxu1 %v1626_v12  ;;  %1438 = vmatprep.subr.bf16.mxu0 %v1627_v13  ;;  %v1864_v44 = vrot.slane %v418_v39, %v1860_v42  ;;  %v433_v45 = vcombine.high %v425_v43, %v425_v43  ;;  %v441_v46 = vrot.slane %v425_v43, %v1860_v42  ;;  %v1652_v52 = vld [vmem:[%s1822_s6 + $0x148] sm:$0xff]   ;;  %v1651_v54 = vld [vmem:[%s1822_s6 + $0x180] sm:$0xff]   ;;  %v1656_v58 = vld [vmem:[%s1822_s6 + $0x150] sm:$0xff]  }
  0x25   : > { %1460 = vmatprep.subr.bf16.mxu1 %v1628_v14  ;;  %v1654_v55 = vld [vmem:[%s1822_s6 + $0x1c8] sm:$0xff]   ;;  %v1658_v60 = vld [vmem:[%s1822_s6 + $0x1d0] sm:$0xff]   ;;  %v1660_v62 = vld [vmem:[%s1822_s6 + $0x158] sm:$0xff]  }
  0x26   : > { %v434_v47 = vcombine.high %v1864_v44, %v1864_v44  ;;  %v455_v48 = vrot.slane %v433_v45, %v1860_v42  ;;  %v463_v51 = vcombine.high %v441_v46, %v441_v46  ;;  %v1653_v57 = vld [vmem:[%s1822_s6 + $0x108] sm:$0xff]   ;;  %v1657_v61 = vld [vmem:[%s1822_s6 + $0x110] sm:$0xff]   ;;  %v1662_v0 = vld [vmem:[%s1822_s6 + $0x1d8] sm:$0xff]  }
  0x27   : > { %1439 = vmatpush3.bf16.msra.mxu0 %v1629_v15  ;;  %v1655_v59 = vld [vmem:[%s1822_s6 + $0x188] sm:$0xff]   ;;  %v1659_v63 = vld [vmem:[%s1822_s6 + $0x190] sm:$0xff]   ;;  %v1661_v1 = vld [vmem:[%s1822_s6 + $0x118] sm:$0xff]  }
  0x28   : > { %1461 = vmatpush3.bf16.msra.mxu1 %v1630_v16  ;;  %1440 = vmatprep.subr.bf16.mxu0 %v1631_v17  ;;  %v462_v50 = vrot.slane %v434_v47, %v1860_v42  ;;  %v465_v53 = vcombine.high %v455_v48, %v455_v48  ;;  %v1664_v2 = vld [vmem:[%s1822_s6 + $0x160] sm:$0xff]   ;;  %v1663_v3 = vld [vmem:[%s1822_s6 + $0x198] sm:$0xff]   ;;  %v1668_v6 = vld [vmem:[%s1822_s6 + $0x168] sm:$0xff]  }
  0x29   : > { %1462 = vmatprep.subr.bf16.mxu1 %v1632_v18  ;;  %954 = vmatprep.mubr.bf16.mxu0 %v455_v48  ;;  %v1666_v4 = vld [vmem:[%s1822_s6 + $0x1e0] sm:$0xff]   ;;  %v1670_v8 = vld [vmem:[%s1822_s6 + $0x1e8] sm:$0xff]   ;;  %v1672_v10 = vld [vmem:[%s1822_s6 + $0x170] sm:$0xff]   ;;  %v448_v18 = vrot.slane %v1864_v44, %v1860_v42 }
  0x2a   : > { %v466_v56 = vcombine.high %v462_v50, %v462_v50  ;;  %994 = vmatprep.mubr.bf16.mxu1 %v465_v53  ;;  %v1665_v5 = vld [vmem:[%s1822_s6 + $0x120] sm:$0xff]   ;;  %v1669_v9 = vld [vmem:[%s1822_s6 + $0x128] sm:$0xff]   ;;  %v1674_v12 = vld [vmem:[%s1822_s6 + $0x1f0] sm:$0xff]  }
  0x2b   : > { %1441 = vmatpush3.bf16.msra.mxu0 %v1633_v19  ;;  %v1667_v7 = vld [vmem:[%s1822_s6 + $0x1a0] sm:$0xff]   ;;  %v1671_v11 = vld [vmem:[%s1822_s6 + $0x1a8] sm:$0xff]   ;;  %v1673_v13 = vld [vmem:[%s1822_s6 + $0x130] sm:$0xff]  }
  0x2c   : > { %1463 = vmatpush3.bf16.msra.mxu1 %v1634_v20  ;;  %1442 = vmatprep.subr.bf16.mxu0 %v1635_v21  ;;  %v1676_v14 = vld [vmem:[%s1822_s6 + $0x178] sm:$0xff]   ;;  %v1675_v15 = vld [vmem:[%s1822_s6 + $0x1b0] sm:$0xff]   ;;  %v1680_v20 = vld [vmem:[%s1822_s6 + $0x200] sm:$0xff]   ;;  %v1756_v21 = vmov 0.0  }
  0x2d   : > { %1464 = vmatprep.subr.bf16.mxu1 %v1636_v22  ;;  %v1678_v16 = vld [vmem:[%s1822_s6 + $0x1f8] sm:$0xff]   ;;  %v464_v22 = vcombine.high %v448_v18, %v448_v18  ;;  %v1344_v30 = vld.sshfl [vmem:[%s1817_s27 + $0x8] sm:$0x1 pattern:$0x75316420] }
  0x2e   : > { %v1677_v17 = vld [vmem:[%s1822_s6 + $0x138] sm:$0xff]  }
  0x2f   : > { %1443 = vmatpush3.bf16.msra.mxu0 %v1637_v23  ;;  %v1679_v19 = vld [vmem:[%s1822_s6 + $0x1b8] sm:$0xff]   ;;  %v1681_v23 = vld [vmem:[%s1822_s6 + $0x208] sm:$0xff]  }
  0x30   : > { %1465 = vmatpush3.bf16.msra.mxu1 %v1638_v24  ;;  %1444 = vmatprep.subr.bf16.mxu0 %v1639_v25  ;;  %v1682_v24 = vld [vmem:[%s1822_s6 + $0x210] sm:$0xff]   ;;  %v1683_v25 = vld [vmem:[%s1822_s6 + $0x218] sm:$0xff]  }
  0x31   : > { %1466 = vmatprep.subr.bf16.mxu1 %v1640_v26  ;;  %v1684_v26 = vld [vmem:[%s1822_s6 + $0x220] sm:$0xff]  }
  0x33   : > { %1445 = vmatpush3.bf16.msra.mxu0 %v1641_v27  ;;  %v1685_v27 = vld [vmem:[%s1822_s6 + $0x228] sm:$0xff]  }
  0x34   : > { %1467 = vmatpush3.bf16.msra.mxu1 %v1642_v28  ;;  %1446 = vmatprep.subr.bf16.mxu0 %v1643_v29  ;;  %v1686_v28 = vld [vmem:[%s1822_s6 + $0x230] sm:$0xff]   ;;  %v1687_v29 = vld [vmem:[%s1822_s6 + $0x238] sm:$0xff]  }
  0x35   : > { %1468 = vmatprep.subr.bf16.mxu1 %v1644_v31  ;;  %v480_v31 = vrot.slane %v1344_v30, %v1860_v42 }
  0x37   : > { %1447 = vmatpush3.bf16.msra.mxu0 %v1645_v32 }
  0x38   : > { %1469 = vmatpush3.bf16.msra.mxu1 %v1646_v33  ;;  %1476 = vmatprep.subr.bf16.mxu0 %v1648_v35 }
  0x39   : > { %1498 = vmatprep.subr.bf16.mxu1 %v1650_v41 }
  0x3a   : > { %955 = vmatmul.mubr.bf16.vlgmr.msra.gmra.mrb[0].mxu0 %v441_v46 }
  0x3b   : > { %1477 = vmatpush3.bf16.msra.mxu0 %v1649_v49  ;;  %995 = vmatmul.mubr.bf16.vlgmr.msra.gmra.mrb[0].mxu1 %v463_v51 }
  0x3c   : > { %1478 = vmatprep.subr.bf16.mxu0 %v1652_v52  ;;  %1499 = vmatpush3.bf16.msra.mxu1 %v1651_v54 }
  0x3d   : > { %1034 = vmatprep.mubr.bf16.mxu0 %v462_v50  ;;  %1500 = vmatprep.subr.bf16.mxu1 %v1654_v55  ;;  %v269_v55 = vld [vmem:[#allocation2] sm:$0x3] }
  0x3e   : > { %1074 = vmatprep.mubr.bf16.mxu1 %v466_v56 }
  0x3f   : > { %1479 = vmatpush3.bf16.msra.mxu0 %v1653_v57 }
  0x40   : > { %1480 = vmatprep.subr.bf16.mxu0 %v1656_v58  ;;  %1501 = vmatpush3.bf16.msra.mxu1 %v1655_v59 }
  0x41   : > { %1502 = vmatprep.subr.bf16.mxu1 %v1658_v60 }
  0x43   : > { %1481 = vmatpush3.bf16.msra.mxu0 %v1657_v61 }
  0x44   : > { %1482 = vmatprep.subr.bf16.mxu0 %v1660_v62  ;;  %1503 = vmatpush3.bf16.msra.mxu1 %v1659_v63  ;;  %v1688_v62 = vld [vmem:[%s1987_s3] sm:$0xff] (!%p1417_p7)   ;;  %v1758_v63 = vmov (!%p1417_p7), 0.0  }
  0x45   : > { %1504 = vmatprep.subr.bf16.mxu1 %v1662_v0  ;;  %v1689_v0 = vld [vmem:[%s1987_s3 + $0x8] sm:$0xff] (!%p1417_p7)  }
  0x47   : > { %1483 = vmatpush3.bf16.msra.mxu0 %v1661_v1  ;;  %v1690_v1 = vld [vmem:[%s1987_s3 + $0x10] sm:$0xff] (!%p1417_p7)  }
  0x48   : > { %1484 = vmatprep.subr.bf16.mxu0 %v1664_v2  ;;  %1505 = vmatpush3.bf16.msra.mxu1 %v1663_v3  ;;  %v1691_v2 = vld [vmem:[%s1987_s3 + $0x18] sm:$0xff] (!%p1417_p7)   ;;  %v1692_v3 = vld [vmem:[%s1987_s3 + $0x20] sm:$0xff] (!%p1417_p7)  }
  0x49   : > { %1506 = vmatprep.subr.bf16.mxu1 %v1666_v4  ;;  %v1693_v4 = vld [vmem:[%s1987_s3 + $0x28] sm:$0xff] (!%p1417_p7)  }
  0x4b   : > { %1485 = vmatpush3.bf16.msra.mxu0 %v1665_v5 }
  0x4c   : > { %1486 = vmatprep.subr.bf16.mxu0 %v1668_v6  ;;  %1507 = vmatpush3.bf16.msra.mxu1 %v1667_v7  ;;  %v1418_v6 = vld [vmem:[%s1986_s2] ss:$0 sm:$0xff] (!%p1417_p7) }
  0x4d   : > { %1508 = vmatprep.subr.bf16.mxu1 %v1670_v8  ;;  %v1694_v8 = vld [vmem:[%s1987_s3 + $0x30] sm:$0xff] (!%p1417_p7)  }
  0x4f   : > { %1487 = vmatpush3.bf16.msra.mxu0 %v1669_v9 }
  0x50   : > { %1488 = vmatprep.subr.bf16.mxu0 %v1672_v10  ;;  %1509 = vmatpush3.bf16.msra.mxu1 %v1671_v11  ;;  %v1695_v10 = vld [vmem:[%s1987_s3 + $0x38] sm:$0xff] (!%p1417_p7)  }
  0x51   : > { %1510 = vmatprep.subr.bf16.mxu1 %v1674_v12  ;;  %v1419_v12 = vld [vmem:[%s1988_s4] ss:$0 sm:$0xff] (!%p1417_p7) }
  0x53   : > { %1489 = vmatpush3.bf16.msra.mxu0 %v1673_v13 }
  0x54   : > { %1490 = vmatprep.subr.bf16.mxu0 %v1676_v14  ;;  %1511 = vmatpush3.bf16.msra.mxu1 %v1675_v15 }
  0x55   : > { %1512 = vmatprep.subr.bf16.mxu1 %v1678_v16 }
  0x57   : > { %1491 = vmatpush3.bf16.msra.mxu0 %v1677_v17 }
  0x58   : > { %1538 = vmatprep.subr.bf16.mxu0 %v1756_v21  ;;  %1513 = vmatpush3.bf16.msra.mxu1 %v1679_v19 }
  0x5a   : > { %1035 = vmatmul.mubr.bf16.vlgmr.msra.gmra.mrb[4].mxu0 %v448_v18 }
  0x5b   : > { %1539 = vmatpush3.bf16.msra.mxu0 %v1680_v20  ;;  %1554 = vmatprep.mubr.msk.bf16.mxu0 %vm1757_vm0, %v1756_v21 }
  0x5c   : > { %1075 = vmatmul.mubr.bf16.vlgmr.msra.gmra.mrb[4].mxu1 %v464_v22  ;;  %1540 = vmatprep.subr.bf16.mxu0 %v1756_v21 }
  0x5f   : > { %1541 = vmatpush3.bf16.msra.mxu0 %v1681_v23 }
  0x60   : > { %1542 = vmatprep.subr.bf16.mxu0 %v1756_v21 }
  0x63   : > { %1543 = vmatpush3.bf16.msra.mxu0 %v1682_v24 }
  0x64   : > { %1544 = vmatprep.subr.bf16.mxu0 %v1756_v21 }
  0x67   : > { %1545 = vmatpush3.bf16.msra.mxu0 %v1683_v25 }
  0x68   : > { %1546 = vmatprep.subr.bf16.mxu0 %v1756_v21 }
  0x6b   : > { %1547 = vmatpush3.bf16.msra.mxu0 %v1684_v26 }
  0x6c   : > { %1548 = vmatprep.subr.bf16.mxu0 %v1756_v21 }
  0x6f   : > { %1549 = vmatpush3.bf16.msra.mxu0 %v1685_v27 }
  0x70   : > { %1550 = vmatprep.subr.bf16.mxu0 %v1756_v21 }
  0x73   : > { %1551 = vmatpush3.bf16.msra.mxu0 %v1686_v28 }
  0x74   : > { %1552 = vmatprep.subr.bf16.mxu0 %v1756_v21 }
  0x77   : > { %1553 = vmatpush3.bf16.msra.mxu0 %v1687_v29 }
  0x78   : > { %1558 = vmatprep.subr.bf16.mxu0 (!%p1417_p7), %v1758_v63 }
  0x7a   : > { %1555 = vmatmul.mubr.bf16.vlgmr.msra.gmra.mrb[8].mxu0 %v480_v31 }
  0x7b   : > { %1559 = vmatpush3.bf16.msra.mxu0 (!%p1417_p7), %v1688_v62  ;;  %1574 = vmatprep.mubr.msk.bf16.mxu0 (!%p1417_p7), %vm1759_vm1, %v1758_v63 }
  0x7c   : > { %1560 = vmatprep.subr.bf16.mxu0 (!%p1417_p7), %v1758_v63 }
  0x7f   : > { %1561 = vmatpush3.bf16.msra.mxu0 (!%p1417_p7), %v1689_v0 }
  0x80   : > { %1562 = vmatprep.subr.bf16.mxu0 (!%p1417_p7), %v1758_v63 }
  0x83   : > { %1563 = vmatpush3.bf16.msra.mxu0 (!%p1417_p7), %v1690_v1 }
  0x84   : > { %1564 = vmatprep.subr.bf16.mxu0 (!%p1417_p7), %v1758_v63 }
  0x87   : > { %1565 = vmatpush3.bf16.msra.mxu0 (!%p1417_p7), %v1691_v2 }
  0x88   : > { %1566 = vmatprep.subr.bf16.mxu0 (!%p1417_p7), %v1758_v63 }
  0x8b   : > { %1567 = vmatpush3.bf16.msra.mxu0 (!%p1417_p7), %v1692_v3 }
  0x8c   : > { %1568 = vmatprep.subr.bf16.mxu0 (!%p1417_p7), %v1758_v63 }
  0x8f   : > { %1569 = vmatpush3.bf16.msra.mxu0 (!%p1417_p7), %v1693_v4 }
  0x90   : > { %1570 = vmatprep.subr.bf16.mxu0 (!%p1417_p7), %v1758_v63 }
  0x93   : > { %1571 = vmatpush3.bf16.msra.mxu0 (!%p1417_p7), %v1694_v8 }
  0x94   : > { %1572 = vmatprep.subr.bf16.mxu0 (!%p1417_p7), %v1758_v63 }
  0x97   : > { %1573 = vmatpush3.bf16.msra.mxu0 (!%p1417_p7), %v1695_v10 }
 0x10d   : > { %v1448_v32 = vpop.f32.mrb[0].mxu0 }
 0x10e   : > { %v1449_v33 = vpop.f32.mrb[1].mxu0  ;;  %v1470_v34 = vpop.f32.mrb[0].mxu1 }
 0x10f   : > { %v1450_v35 = vadd.f32 %v1449_v33, %v1448_v32  ;;  %v1451_v36 = vpop.f32.mrb[2].mxu0  ;;  %v1471_v37 = vpop.f32.mrb[1].mxu1 }
 0x110   : > { %v1452_v38 = vpop.f32.mrb[3].mxu0  ;;  %v1472_v39 = vadd.f32 %v1471_v37, %v1470_v34  ;;  %v1473_v40 = vpop.f32.mrb[2].mxu1 }
 0x111   : > { %v1474_v41 = vpop.f32.mrb[3].mxu1 }
 0x112   : > { %v997_v43 = vadd.f32 %v1472_v39, %v1450_v35 }
 0x12d   : > { %v1492_v44 = vpop.f32.mrb[4].mxu0 }
 0x12e   : > { %v1493_v45 = vpop.f32.mrb[5].mxu0 }
 0x12f   : > { %v1494_v46 = vadd.f32 %v1493_v45, %v1492_v44  ;;  %v1495_v47 = vpop.f32.mrb[6].mxu0  ;;  %v1514_v48 = vpop.f32.mrb[4].mxu1 }
 0x130   : > { %v1496_v49 = vpop.f32.mrb[7].mxu0  ;;  %v1515_v42 = vpop.f32.mrb[5].mxu1 }
 0x131   : > { %v1037_v50 = vadd.f32 %v1494_v46, %v997_v43  ;;  %v1516_v51 = vadd.f32 %v1515_v42, %v1514_v48  ;;  %v1517_v52 = vpop.f32.mrb[6].mxu1 }
 0x132   : > { %v1518_v53 = vpop.f32.mrb[7].mxu1 }
 0x133   : > { %v1077_v54 = vadd.f32 %v1516_v51, %v1037_v50 }
 0x14c   : > { %1127 = sbr.rel (%p1417_p7) target bundleno = 883 (0x373), region = 48 }
 0x14d   : > { %v1116_v56 = vpop.f32.mrb[8].mxu0 }
 0x14e   : > { %v1117_v57 = vadd.f32 %v1116_v56, %v1077_v54  ;;  %v1556_v58 = vpop.f32.mrb[9].mxu0 }
 0x14f   : > { %v1119_v59 = vpop.f32.mrb[10].mxu0 }
 0x150   : > { %v1122_v60 = vadd.f32 %v1117_v57, %v269_v55  ;;  %v1557_v61 = vpop.f32.mrb[11].mxu0 }
 0x152   : > { %1123 = vst [vmem:[#allocation2] sm:$0x3] %v1122_v60 }
 0x159   : > { %v1128_v5 = vld [vmem:[#allocation2] sm:$0x3] }
 0x15a   : > { %v1136_v7 = vadd.f32 %v1418_v6, %v1128_v5 }
 0x15c   : > { %v1137_v9 = vmax.f32 %v1136_v7, 0.0 }
 0x15e   : > { %v1138_v11 = vpack.c.bf16 %v1137_v9, %v1137_v9 }
 0x160   : > { %1575 = vmatmul.mubr.bf16.vlgmr.msra.gmra.mrb[0].mxu0 %v1138_v11 }
 0x233   : > { %v1244_v13 = vpop.f32.mrb[0].mxu0 }
 0x234   : > { %v1245_v14 = vadd.f32 %v1419_v12, %v1244_v13  ;;  %v1576_v15 = vpop.f32.mrb[1].mxu0 }
 0x235   : > { %v1247_v16 = vpop.f32.mrb[2].mxu0 }
 0x236   : > { %v1577_v17 = vpop.f32.mrb[3].mxu0  ;;  %v1251_v18 = vsel %vm1250_vm2, %v1245_v14, -inf }
 0x237   : > { %1252 = vmax.xlane.f32.xlu0 %v1251_v18 }
 0x2c4   : > { %v1253_v19 = vpop.xlane.xlu0 %1252 }
 0x2c5   : > { %v1254_v20 = vsub.f32 %v1245_v14, %v1253_v19 }
 0x2c7   : > { %v1255_v21 = vmul.f32 1.442695, %v1254_v20 }
 0x2c9   : > { %1696 = vpow2.f32 %v1255_v21 }
 0x2d3   : > { %v1697_v22 = vpop.eup %1696 }
 0x2d4   : > { %v1257_v23 = vsel %vm1250_vm2, %v1697_v22, 0.0 }
 0x2d5   : > { %1258 = vadd.xlane.f32.xlu0 %v1257_v23 }
 0x362   : > { %v1259_v24 = vpop.xlane.xlu0 %1258 }
 0x363   : > { %1698 = vlog2.f32 %v1259_v24 }
 0x36d   : > { %v1699_v25 = vpop.eup %1698 }
 0x36e   : > { %v1261_v26 = vmul.f32 0.6931472, %v1699_v25 }
 0x370   : > { %v1262_v27 = vsub.f32 %v1254_v20, %v1261_v26 }
 0x372   : > { %1263 = vst.msk [vmem:[#allocation3] sm:$0x3] %vm1250_vm2, %v1262_v27 }
 0x373 PF: > { %p1949_p8 = scmp.eq.s32.totalorder %s1338_s21, 7  ;;  %s1760_s7 = smov [#allocation3]  }
 0x374   : > { %s1273_s8 = sshll.u32 %s1760_s7, 4  ;;  %s1274_s8 = int_to_ptr.vmem [resolvable:$true] %s1273_s8 }
 0x375   : > { %s1700_s9 = scalar_lea.vmem %s1274_s8, 32  ;;  %p1707_p12 = scmp.lt.s32.totalorder %s1274_s8, %s1274_s8 }
 0x376   : > { %p1701_p9 = scmp.ne.s32.totalorder %s1274_s8, %s1700_s9  ;;  %p1708_p13 = scmp.lt.s32.totalorder %s1700_s9, %s1700_s9 }
 0x378   : > { %p1702_p10 = pnand %p1701_p9, %p1949_p8  ;;  %p1709_p0 = por %p1708_p13, %p1707_p12 }
 0x37a   : > { %p1703_p11 = pneg %p1702_p10 }
 0x37c   : > { %p1710_p1 = pnand %p1709_p0, %p1703_p11 }
 0x37e   : > { %1713 = shalt.err (!%p1710_p1)
}
 0x37f   : > { %s1714_s21 = scalar_lea.hbm %s1989_s5, 32 }
 0x380   : > { %p1715_p2 = scmp.ne.s32.totalorder %s1989_s5, %s1714_s21  ;;  %p1720_p5 = scmp.lt.u32.totalorder %s1714_s21, %s1989_s5 }
 0x382   : > { %p1716_p3 = pnand %p1715_p2, %p1949_p8 }
 0x384   : > { %p1717_p4 = pneg %p1716_p3 }
 0x386   : > { %p1722_p6 = pnand %p1720_p5, %p1717_p4 }
 0x388   : > { %1725 = shalt.err (!%p1722_p6)
}
 0x389   : > { %1579 = dma.vmem_to_hbm [thread:$0]  (%p1949_p8), %s1274_s8, 32, %s1989_s5, [#allocation4]  }
 0x38a   : > { %1739 = dma.done.wait (%p1949_p8), [#allocation4], 32  }
 0x38b   : > { %1741 = vsyncadd (%p1949_p8), [#allocation4], 4294967264 }
 0x38c PF: > { %s16_s20 = sadd.s32 1, %s1752_s20   ;;  %s1991_s18 = smov %s1748_s19 }
 0x38d   : > { %p13_p7 = scmp.ge.s32.totalorder %s16_s20, 10   ;;  %s1992_s19 = smov %s1994_s22 }
 0x38f   :  { %15 = sbr.rel (!%p13_p7) target bundleno = 2 (0x2), region = 79 }
 0x396   :  { %1286 = vsyncpa [#allocation4], 1 }
 0x397   :  { %1288 = vsyncpa [#allocation4 + $0x1], 1 }

</bundles_post_ra>
